<compile_context>
chip_gen: v7x
topology: tpu7x:2x2x1
jax: 0.10.0
libtpu: 0.0.40
codegen_flags: <defaults>
</compile_context>

<pallas_src>
import functools

import jax
import jax.numpy as jnp
import numpy as np
from jax.experimental import pallas as pl
from jax.experimental.pallas import tpu as pltpu

GROUP_NORM_LOOKUP = {16: 2, 32: 4, 64: 8, 128: 8, 256: 16, 512: 32, 1024: 32, 2048: 32}
_GN_EPS = 1e-5  # torch.nn.GroupNorm default


def residual_block_kernel(xv_ref, bw1_ref, bw2_ref, gproj_ref, gb1_ref, gb2_ref,
                          out_ref, mid_ref, *, BB, H, W, C):
    """BB images per grid step.

    xv_ref   : (BB, H+2, W*C)  vertically zero-padded input slabs (lanes = W*C)
    bw*_ref  : (3, W*C, W*C)   block-Toeplitz conv weights (indexed by dy)
    gproj_ref: (W*C, W*C)      group-averaging projector (already / (H*W*C/groups))
    gb*_ref  : (2, W*C)        row0 = gamma per lane, row1 = beta per lane
    out_ref  : (BB, H, W*C)
    mid_ref  : (BB, H+2, W*C)  VMEM scratch: vertically re-padded intermediate
    """
    WC = W * C
    BH = BB * H

    def conv3x3(src_ref, bw_ref):
        # 3 lane-dense MXU matmuls at M = BB*H rows; horizontal padding is
        # folded into bw, vertical padding lives in the source slab.
        acc = jnp.dot(src_ref[:, 0:H, :].reshape(BH, WC), bw_ref[0],
                      preferred_element_type=jnp.float32)
        acc += jnp.dot(src_ref[:, 1:H + 1, :].reshape(BH, WC), bw_ref[1],
                       preferred_element_type=jnp.float32)
        acc += jnp.dot(src_ref[:, 2:H + 2, :].reshape(BH, WC), bw_ref[2],
                       preferred_element_type=jnp.float32)
        return acc.reshape(BB, H, WC)                       # (BB, H, WC) f32

    def group_norm(a, gb_ref):
        # Single-pass GroupNorm for all BB images: per-image per-lane column
        # sums -> per-group mean / E[x^2] via one projector matmul (which also
        # broadcasts the group statistic back to every lane of that group).
        colsum = jnp.sum(a, axis=1)                                   # (BB, WC)
        colsq = jnp.sum(a * a, axis=1)                                # (BB, WC)
        mean = jnp.dot(colsum, gproj_ref[...],
                       preferred_element_type=jnp.float32)            # (BB, WC)
        meansq = jnp.dot(colsq, gproj_ref[...],
                         preferred_element_type=jnp.float32)          # (BB, WC)
        var = meansq - mean * mean
        inv = jax.lax.rsqrt(var + _GN_EPS)
        scale = inv * gb_ref[0:1, :]                                  # (BB, WC)
        shift = gb_ref[1:2, :] - mean * scale                         # (BB, WC)
        return a * scale[:, None, :] + shift[:, None, :]

    # ---- conv1 -> GN1 -> ReLU ----
    h1 = jnp.maximum(group_norm(conv3x3(xv_ref, bw1_ref), gb1_ref), 0.0)

    # ---- vertical re-pad into scratch: zero ONLY the 2 border rows ----
    mid_ref[:, 0:1, :] = jnp.zeros((BB, 1, WC), jnp.float32)
    mid_ref[:, H + 1:H + 2, :] = jnp.zeros((BB, 1, WC), jnp.float32)
    mid_ref[:, 1:H + 1, :] = h1

    # ---- conv2 -> GN2 -> +identity -> ReLU ----
    acc2 = group_norm(conv3x3(mid_ref, bw2_ref), gb2_ref)
    identity = xv_ref[:, 1:H + 1, :]                        # lane-dense residual read
    out_ref[...] = jnp.maximum(acc2 + identity, 0.0)


def _block_toeplitz_weights(w_oihw, W):
    """(Cout, Cin, 3, 3) OIHW -> (3, W*Cin, W*Cout).

    BW[dy][(x+dx-1)*Cin + ci, x*Cout + co] = w[co, ci, dy, dx] for 0 <= x+dx-1 < W,
    i.e. the horizontal shift + zero padding is baked into the weight matrix.
    """
    w = w_oihw.astype(jnp.float32)
    rows = []
    for dy in range(3):
        acc = None
        for dx in range(3):
            shift = jnp.eye(W, k=1 - dx, dtype=jnp.float32)   # S[x+dx-1, x] = 1
            mix = jnp.transpose(w[:, :, dy, dx])               # (Cin, Cout)
            term = jnp.kron(shift, mix)                        # (W*Cin, W*Cout)
            acc = term if acc is None else acc + term
        rows.append(acc)
    return jnp.stack(rows)                                     # (3, W*Cin, W*Cout)


def residual_block(x_nchw, w1_oihw, g1, b1, w2_oihw, g2, b2):
    """PyTorch-convention NCHW input / OIHW weights -> NCHW output."""
    N, C, H, W = x_nchw.shape
    groups = GROUP_NORM_LOOKUP[C]
    WC = W * C

    # Images per grid step: target ~128 MXU rows (BB*H), must divide N.
    bb_target = max(1, 128 // H)
    BB = 1
    for cand in range(min(bb_target, N), 0, -1):
        if N % cand == 0:
            BB = cand
            break

    # --- layout glue in plain JAX: NHWC, fuse W*C onto lanes, pad H only. ---
    x_slab = jnp.transpose(x_nchw, (0, 2, 3, 1)).astype(jnp.float32).reshape(N, H, WC)
    xv = jnp.pad(x_slab, ((0, 0), (1, 1), (0, 0)))             # (N, H+2, WC)

    bw1 = _block_toeplitz_weights(w1_oihw, W)                  # (3, WC, WC)
    bw2 = _block_toeplitz_weights(w2_oihw, W)

    # group-averaging projector: 1/(H*W*C/groups) where lanes share a group.
    chan = jnp.arange(WC) % C
    grp = chan // (C // groups)
    gproj = (grp[:, None] == grp[None, :]).astype(jnp.float32) / float(
        H * W * (C // groups))                                 # (WC, WC)

    gb1 = jnp.stack([jnp.tile(g1.astype(jnp.float32), W),
                     jnp.tile(b1.astype(jnp.float32), W)])     # (2, WC)
    gb2 = jnp.stack([jnp.tile(g2.astype(jnp.float32), W),
                     jnp.tile(b2.astype(jnp.float32), W)])

    kernel = functools.partial(residual_block_kernel, BB=BB, H=H, W=W, C=C)

    out_slab = pl.pallas_call(
        kernel,
        out_shape=jax.ShapeDtypeStruct((N, H, WC), jnp.float32),
        grid_spec=pltpu.PrefetchScalarGridSpec(
            num_scalar_prefetch=0,
            grid=(N // BB,),
            in_specs=[
                pl.BlockSpec((BB, H + 2, WC), lambda n: (n, 0, 0)),
                pl.BlockSpec((3, WC, WC), lambda n: (0, 0, 0)),
                pl.BlockSpec((3, WC, WC), lambda n: (0, 0, 0)),
                pl.BlockSpec((WC, WC), lambda n: (0, 0)),
                pl.BlockSpec((2, WC), lambda n: (0, 0)),
                pl.BlockSpec((2, WC), lambda n: (0, 0)),
            ],
            out_specs=pl.BlockSpec((BB, H, WC), lambda n: (n, 0, 0)),
            scratch_shapes=[pltpu.VMEM((BB, H + 2, WC), jnp.float32)],
        ),
        compiler_params=pltpu.CompilerParams(dimension_semantics=("parallel",)),
    )(xv, bw1, bw2, gproj, gb1, gb2)

    out_nhwc = out_slab.reshape(N, H, W, C)
    return jnp.transpose(out_nhwc, (0, 3, 1, 2))               # back to NCHW


def _reference(x, w1, g1, b1, w2, g2, b2, groups):
    """Pure-JAX reference with identical semantics (NCHW / OIHW)."""
    def conv(y, w):
        return jax.lax.conv_general_dilated(
            y, w, window_strides=(1, 1), padding=((1, 1), (1, 1)),
            dimension_numbers=("NCHW", "OIHW", "NCHW"))

    def gn(y, gamma, beta):
        N, C, H, W = y.shape
        yg = y.reshape(N, groups, C // groups, H, W)
        mean = yg.mean(axis=(2, 3, 4), keepdims=True)
        var = ((yg - mean) ** 2).mean(axis=(2, 3, 4), keepdims=True)
        yn = ((yg - mean) * jax.lax.rsqrt(var + _GN_EPS)).reshape(N, C, H, W)
        return yn * gamma[None, :, None, None] + beta[None, :, None, None]

    out = jax.nn.relu(gn(conv(x, w1), g1, b1))
    out = gn(conv(out, w2), g2, b2)
    return jax.nn.relu(out + x)


if __name__ == "__main__":
    # Channels must be a key of GROUP_NORM_LOOKUP -> 16 channels (2 groups),
    # batch=2, 16x16 spatial (W*C = 256 lanes).
    N, C, H, W = 2, 16, 16, 16

    key = jax.random.PRNGKey(0)
    kx, kw1, kw2, kg1, kb1, kg2, kb2 = jax.random.split(key, 7)

    x = jax.random.normal(kx, (N, C, H, W), jnp.float32)
    # conv3x3 weights in PyTorch OIHW convention, bias=False.
    w1 = jax.random.normal(kw1, (C, C, 3, 3), jnp.float32) * 0.1
    w2 = jax.random.normal(kw2, (C, C, 3, 3), jnp.float32) * 0.1
    # GroupNorm affine params (non-trivial but deterministic).
    g1 = 1.0 + 0.1 * jax.random.normal(kg1, (C,), jnp.float32)
    b1 = 0.05 * jax.random.normal(kb1, (C,), jnp.float32)
    g2 = 1.0 + 0.1 * jax.random.normal(kg2, (C,), jnp.float32)
    b2 = 0.05 * jax.random.normal(kb2, (C,), jnp.float32)

    out = residual_block(x, w1, g1, b1, w2, g2, b2)
    out = jax.block_until_ready(out)

    ref = jax.block_until_ready(
        _reference(x, w1, g1, b1, w2, g2, b2, GROUP_NORM_LOOKUP[C]))
    np.testing.assert_allclose(np.asarray(out), np.asarray(ref), rtol=1e-3, atol=1e-3)

    print("KERNEL_OK")
</pallas_src>

<mosaic_0001>
module attributes {stable_mosaic.version = 11 : i64} {
  func.func @residual_block_kernel(%arg0: i32, %arg1: memref<2x18x256xf32, #tpu.memory_space<vmem>>, %arg2: memref<3x256x256xf32, #tpu.memory_space<vmem>>, %arg3: memref<3x256x256xf32, #tpu.memory_space<vmem>>, %arg4: memref<256x256xf32, #tpu.memory_space<vmem>>, %arg5: memref<2x256xf32, #tpu.memory_space<vmem>>, %arg6: memref<2x256xf32, #tpu.memory_space<vmem>>, %arg7: memref<2x16x256xf32, #tpu.memory_space<vmem>>, %arg8: memref<2x18x256xf32, #tpu.memory_space<vmem>>) attributes {dimension_semantics = [#tpu.dimension_semantics<parallel>], iteration_bounds = array<i64: 1>, scalar_prefetch = 0 : i64, scratch_operands = 1 : i64, tpu.core_type = #tpu.core_type<tc>, window_params = [{transform_indices = @transform_0, window_bounds = array<i64: 2, 18, 256>}, {pipeline_mode = #tpu.pipeline_mode<synchronous>, transform_indices = @transform_1, window_bounds = array<i64: 3, 256, 256>}, {pipeline_mode = #tpu.pipeline_mode<synchronous>, transform_indices = @transform_2, window_bounds = array<i64: 3, 256, 256>}, {pipeline_mode = #tpu.pipeline_mode<synchronous>, transform_indices = @transform_3, window_bounds = array<i64: 256, 256>}, {pipeline_mode = #tpu.pipeline_mode<synchronous>, transform_indices = @transform_4, window_bounds = array<i64: 2, 256>}, {pipeline_mode = #tpu.pipeline_mode<synchronous>, transform_indices = @transform_5, window_bounds = array<i64: 2, 256>}, {transform_indices = @transform_6, window_bounds = array<i64: 2, 16, 256>}]} {
    %c0 = arith.constant 0 : index
    %c0_0 = arith.constant 0 : index
    %c0_1 = arith.constant 0 : index
    %0 = vector.load %arg1[%c0, %c0_0, %c0_1] : memref<2x18x256xf32, #tpu.memory_space<vmem>>, vector<2x16x256xf32>
    %1 = vector.shape_cast %0 : vector<2x16x256xf32> to vector<32x256xf32>
    %c0_2 = arith.constant 0 : index
    %c0_3 = arith.constant 0 : index
    %c0_4 = arith.constant 0 : index
    %2 = vector.load %arg2[%c0_2, %c0_3, %c0_4] : memref<3x256x256xf32, #tpu.memory_space<vmem>>, vector<1x256x256xf32>
    %3 = vector.shape_cast %2 : vector<1x256x256xf32> to vector<256x256xf32>
    %cst = arith.constant dense<0.000000e+00> : vector<32x256xf32>
    %4 = tpu.matmul %1, %3, %cst {dimension_numbers = #tpu.dot_dimension_numbers<[1], [0], [0], [1], [0, 0, 1, 1], [], []>} : vector<32x256xf32>, vector<256x256xf32>, vector<32x256xf32> -> vector<32x256xf32>
    %c0_5 = arith.constant 0 : index
    %c1 = arith.constant 1 : index
    %c0_6 = arith.constant 0 : index
    %5 = vector.load %arg1[%c0_5, %c1, %c0_6] : memref<2x18x256xf32, #tpu.memory_space<vmem>>, vector<2x16x256xf32>
    %6 = vector.shape_cast %5 : vector<2x16x256xf32> to vector<32x256xf32>
    %c1_7 = arith.constant 1 : index
    %c0_8 = arith.constant 0 : index
    %c0_9 = arith.constant 0 : index
    %7 = vector.load %arg2[%c1_7, %c0_8, %c0_9] : memref<3x256x256xf32, #tpu.memory_space<vmem>>, vector<1x256x256xf32>
    %8 = vector.shape_cast %7 : vector<1x256x256xf32> to vector<256x256xf32>
    %cst_10 = arith.constant dense<0.000000e+00> : vector<32x256xf32>
    %9 = tpu.matmul %6, %8, %cst_10 {dimension_numbers = #tpu.dot_dimension_numbers<[1], [0], [0], [1], [0, 0, 1, 1], [], []>} : vector<32x256xf32>, vector<256x256xf32>, vector<32x256xf32> -> vector<32x256xf32>
    %10 = arith.addf %4, %9 : vector<32x256xf32>
    %c0_11 = arith.constant 0 : index
    %c2 = arith.constant 2 : index
    %c0_12 = arith.constant 0 : index
    %11 = vector.load %arg1[%c0_11, %c2, %c0_12] : memref<2x18x256xf32, #tpu.memory_space<vmem>>, vector<2x16x256xf32>
    %12 = vector.shape_cast %11 : vector<2x16x256xf32> to vector<32x256xf32>
    %c2_13 = arith.constant 2 : index
    %c0_14 = arith.constant 0 : index
    %c0_15 = arith.constant 0 : index
    %13 = vector.load %arg2[%c2_13, %c0_14, %c0_15] : memref<3x256x256xf32, #tpu.memory_space<vmem>>, vector<1x256x256xf32>
    %14 = vector.shape_cast %13 : vector<1x256x256xf32> to vector<256x256xf32>
    %cst_16 = arith.constant dense<0.000000e+00> : vector<32x256xf32>
    %15 = tpu.matmul %12, %14, %cst_16 {dimension_numbers = #tpu.dot_dimension_numbers<[1], [0], [0], [1], [0, 0, 1, 1], [], []>} : vector<32x256xf32>, vector<256x256xf32>, vector<32x256xf32> -> vector<32x256xf32>
    %16 = arith.addf %10, %15 : vector<32x256xf32>
    %17 = vector.shape_cast %16 : vector<32x256xf32> to vector<2x16x256xf32>
    %cst_17 = arith.constant dense<0.000000e+00> : vector<2x256xf32>
    %18 = vector.multi_reduction <add>, %17, %cst_17 [1] : vector<2x16x256xf32> to vector<2x256xf32>
    %19 = arith.mulf %17, %17 : vector<2x16x256xf32>
    %cst_18 = arith.constant dense<0.000000e+00> : vector<2x256xf32>
    %20 = vector.multi_reduction <add>, %19, %cst_18 [1] : vector<2x16x256xf32> to vector<2x256xf32>
    %c0_19 = arith.constant 0 : index
    %c0_20 = arith.constant 0 : index
    %21 = vector.load %arg4[%c0_19, %c0_20] : memref<256x256xf32, #tpu.memory_space<vmem>>, vector<256x256xf32>
    %cst_21 = arith.constant dense<0.000000e+00> : vector<2x256xf32>
    %22 = tpu.matmul %18, %21, %cst_21 {dimension_numbers = #tpu.dot_dimension_numbers<[1], [0], [0], [1], [0, 0, 1, 1], [], []>} : vector<2x256xf32>, vector<256x256xf32>, vector<2x256xf32> -> vector<2x256xf32>
    %c0_22 = arith.constant 0 : index
    %c0_23 = arith.constant 0 : index
    %23 = vector.load %arg4[%c0_22, %c0_23] : memref<256x256xf32, #tpu.memory_space<vmem>>, vector<256x256xf32>
    %cst_24 = arith.constant dense<0.000000e+00> : vector<2x256xf32>
    %24 = tpu.matmul %20, %23, %cst_24 {dimension_numbers = #tpu.dot_dimension_numbers<[1], [0], [0], [1], [0, 0, 1, 1], [], []>} : vector<2x256xf32>, vector<256x256xf32>, vector<2x256xf32> -> vector<2x256xf32>
    %25 = arith.mulf %22, %22 : vector<2x256xf32>
    %26 = arith.subf %24, %25 : vector<2x256xf32>
    %cst_25 = arith.constant 9.99999974E-6 : f32
    %27 = vector.broadcast %cst_25 : f32 to vector<2x256xf32>
    %28 = arith.addf %26, %27 : vector<2x256xf32>
    %29 = math.rsqrt %28 : vector<2x256xf32>
    %c0_26 = arith.constant 0 : index
    %c0_27 = arith.constant 0 : index
    %30 = vector.load %arg5[%c0_26, %c0_27] : memref<2x256xf32, #tpu.memory_space<vmem>>, vector<1x256xf32>
    %31 = vector.broadcast %30 : vector<1x256xf32> to vector<2x256xf32>
    %32 = arith.mulf %29, %31 : vector<2x256xf32>
    %c1_28 = arith.constant 1 : index
    %c0_29 = arith.constant 0 : index
    %33 = vector.load %arg5[%c1_28, %c0_29] : memref<2x256xf32, #tpu.memory_space<vmem>>, vector<1x256xf32>
    %34 = arith.mulf %22, %32 : vector<2x256xf32>
    %35 = vector.broadcast %33 : vector<1x256xf32> to vector<2x256xf32>
    %36 = arith.subf %35, %34 : vector<2x256xf32>
    %37 = vector.shape_cast %32 : vector<2x256xf32> to vector<2x1x256xf32>
    %38 = vector.broadcast %37 : vector<2x1x256xf32> to vector<2x16x256xf32>
    %39 = arith.mulf %17, %38 : vector<2x16x256xf32>
    %40 = vector.shape_cast %36 : vector<2x256xf32> to vector<2x1x256xf32>
    %41 = vector.broadcast %40 : vector<2x1x256xf32> to vector<2x16x256xf32>
    %42 = arith.addf %39, %41 : vector<2x16x256xf32>
    %cst_30 = arith.constant 0.000000e+00 : f32
    %43 = vector.broadcast %cst_30 : f32 to vector<2x16x256xf32>
    %44 = arith.maximumf %42, %43 : vector<2x16x256xf32>
    %cst_31 = arith.constant 0.000000e+00 : f32
    %45 = vector.broadcast %cst_31 : f32 to vector<2x1x256xf32>
    %c0_32 = arith.constant 0 : index
    %c0_33 = arith.constant 0 : index
    %c0_34 = arith.constant 0 : index
    %46 = vector.load %arg8[%c0_32, %c0_33, %c0_34] : memref<2x18x256xf32, #tpu.memory_space<vmem>>, vector<2x1x256xf32>
    tpu.vector_store %arg8[%c0_32, %c0_33, %c0_34], %45 {strides = array<i32>} : memref<2x18x256xf32, #tpu.memory_space<vmem>>, vector<2x1x256xf32>,
    %cst_35 = arith.constant 0.000000e+00 : f32
    %47 = vector.broadcast %cst_35 : f32 to vector<2x1x256xf32>
    %c0_36 = arith.constant 0 : index
    %c17 = arith.constant 17 : index
    %c0_37 = arith.constant 0 : index
    %48 = vector.load %arg8[%c0_36, %c17, %c0_37] : memref<2x18x256xf32, #tpu.memory_space<vmem>>, vector<2x1x256xf32>
    tpu.vector_store %arg8[%c0_36, %c17, %c0_37], %47 {strides = array<i32>} : memref<2x18x256xf32, #tpu.memory_space<vmem>>, vector<2x1x256xf32>,
    %c0_38 = arith.constant 0 : index
    %c1_39 = arith.constant 1 : index
    %c0_40 = arith.constant 0 : index
    %49 = vector.load %arg8[%c0_38, %c1_39, %c0_40] : memref<2x18x256xf32, #tpu.memory_space<vmem>>, vector<2x16x256xf32>
    tpu.vector_store %arg8[%c0_38, %c1_39, %c0_40], %44 {strides = array<i32>} : memref<2x18x256xf32, #tpu.memory_space<vmem>>, vector<2x16x256xf32>,
    %c0_41 = arith.constant 0 : index
    %c0_42 = arith.constant 0 : index
    %c0_43 = arith.constant 0 : index
    %50 = vector.load %arg8[%c0_41, %c0_42, %c0_43] : memref<2x18x256xf32, #tpu.memory_space<vmem>>, vector<2x16x256xf32>
    %51 = vector.shape_cast %50 : vector<2x16x256xf32> to vector<32x256xf32>
    %c0_44 = arith.constant 0 : index
    %c0_45 = arith.constant 0 : index
    %c0_46 = arith.constant 0 : index
    %52 = vector.load %arg3[%c0_44, %c0_45, %c0_46] : memref<3x256x256xf32, #tpu.memory_space<vmem>>, vector<1x256x256xf32>
    %53 = vector.shape_cast %52 : vector<1x256x256xf32> to vector<256x256xf32>
    %cst_47 = arith.constant dense<0.000000e+00> : vector<32x256xf32>
    %54 = tpu.matmul %51, %53, %cst_47 {dimension_numbers = #tpu.dot_dimension_numbers<[1], [0], [0], [1], [0, 0, 1, 1], [], []>} : vector<32x256xf32>, vector<256x256xf32>, vector<32x256xf32> -> vector<32x256xf32>
    %c0_48 = arith.constant 0 : index
    %c1_49 = arith.constant 1 : index
    %c0_50 = arith.constant 0 : index
    %55 = vector.load %arg8[%c0_48, %c1_49, %c0_50] : memref<2x18x256xf32, #tpu.memory_space<vmem>>, vector<2x16x256xf32>
    %56 = vector.shape_cast %55 : vector<2x16x256xf32> to vector<32x256xf32>
    %c1_51 = arith.constant 1 : index
    %c0_52 = arith.constant 0 : index
    %c0_53 = arith.constant 0 : index
    %57 = vector.load %arg3[%c1_51, %c0_52, %c0_53] : memref<3x256x256xf32, #tpu.memory_space<vmem>>, vector<1x256x256xf32>
    %58 = vector.shape_cast %57 : vector<1x256x256xf32> to vector<256x256xf32>
    %cst_54 = arith.constant dense<0.000000e+00> : vector<32x256xf32>
    %59 = tpu.matmul %56, %58, %cst_54 {dimension_numbers = #tpu.dot_dimension_numbers<[1], [0], [0], [1], [0, 0, 1, 1], [], []>} : vector<32x256xf32>, vector<256x256xf32>, vector<32x256xf32> -> vector<32x256xf32>
    %60 = arith.addf %54, %59 : vector<32x256xf32>
    %c0_55 = arith.constant 0 : index
    %c2_56 = arith.constant 2 : index
    %c0_57 = arith.constant 0 : index
    %61 = vector.load %arg8[%c0_55, %c2_56, %c0_57] : memref<2x18x256xf32, #tpu.memory_space<vmem>>, vector<2x16x256xf32>
    %62 = vector.shape_cast %61 : vector<2x16x256xf32> to vector<32x256xf32>
    %c2_58 = arith.constant 2 : index
    %c0_59 = arith.constant 0 : index
    %c0_60 = arith.constant 0 : index
    %63 = vector.load %arg3[%c2_58, %c0_59, %c0_60] : memref<3x256x256xf32, #tpu.memory_space<vmem>>, vector<1x256x256xf32>
    %64 = vector.shape_cast %63 : vector<1x256x256xf32> to vector<256x256xf32>
    %cst_61 = arith.constant dense<0.000000e+00> : vector<32x256xf32>
    %65 = tpu.matmul %62, %64, %cst_61 {dimension_numbers = #tpu.dot_dimension_numbers<[1], [0], [0], [1], [0, 0, 1, 1], [], []>} : vector<32x256xf32>, vector<256x256xf32>, vector<32x256xf32> -> vector<32x256xf32>
    %66 = arith.addf %60, %65 : vector<32x256xf32>
    %67 = vector.shape_cast %66 : vector<32x256xf32> to vector<2x16x256xf32>
    %cst_62 = arith.constant dense<0.000000e+00> : vector<2x256xf32>
    %68 = vector.multi_reduction <add>, %67, %cst_62 [1] : vector<2x16x256xf32> to vector<2x256xf32>
    %69 = arith.mulf %67, %67 : vector<2x16x256xf32>
    %cst_63 = arith.constant dense<0.000000e+00> : vector<2x256xf32>
    %70 = vector.multi_reduction <add>, %69, %cst_63 [1] : vector<2x16x256xf32> to vector<2x256xf32>
    %c0_64 = arith.constant 0 : index
    %c0_65 = arith.constant 0 : index
    %71 = vector.load %arg4[%c0_64, %c0_65] : memref<256x256xf32, #tpu.memory_space<vmem>>, vector<256x256xf32>
    %cst_66 = arith.constant dense<0.000000e+00> : vector<2x256xf32>
    %72 = tpu.matmul %68, %71, %cst_66 {dimension_numbers = #tpu.dot_dimension_numbers<[1], [0], [0], [1], [0, 0, 1, 1], [], []>} : vector<2x256xf32>, vector<256x256xf32>, vector<2x256xf32> -> vector<2x256xf32>
    %c0_67 = arith.constant 0 : index
    %c0_68 = arith.constant 0 : index
    %73 = vector.load %arg4[%c0_67, %c0_68] : memref<256x256xf32, #tpu.memory_space<vmem>>, vector<256x256xf32>
    %cst_69 = arith.constant dense<0.000000e+00> : vector<2x256xf32>
    %74 = tpu.matmul %70, %73, %cst_69 {dimension_numbers = #tpu.dot_dimension_numbers<[1], [0], [0], [1], [0, 0, 1, 1], [], []>} : vector<2x256xf32>, vector<256x256xf32>, vector<2x256xf32> -> vector<2x256xf32>
    %75 = arith.mulf %72, %72 : vector<2x256xf32>
    %76 = arith.subf %74, %75 : vector<2x256xf32>
    %cst_70 = arith.constant 9.99999974E-6 : f32
    %77 = vector.broadcast %cst_70 : f32 to vector<2x256xf32>
    %78 = arith.addf %76, %77 : vector<2x256xf32>
    %79 = math.rsqrt %78 : vector<2x256xf32>
    %c0_71 = arith.constant 0 : index
    %c0_72 = arith.constant 0 : index
    %80 = vector.load %arg6[%c0_71, %c0_72] : memref<2x256xf32, #tpu.memory_space<vmem>>, vector<1x256xf32>
    %81 = vector.broadcast %80 : vector<1x256xf32> to vector<2x256xf32>
    %82 = arith.mulf %79, %81 : vector<2x256xf32>
    %c1_73 = arith.constant 1 : index
    %c0_74 = arith.constant 0 : index
    %83 = vector.load %arg6[%c1_73, %c0_74] : memref<2x256xf32, #tpu.memory_space<vmem>>, vector<1x256xf32>
    %84 = arith.mulf %72, %82 : vector<2x256xf32>
    %85 = vector.broadcast %83 : vector<1x256xf32> to vector<2x256xf32>
    %86 = arith.subf %85, %84 : vector<2x256xf32>
    %87 = vector.shape_cast %82 : vector<2x256xf32> to vector<2x1x256xf32>
    %88 = vector.broadcast %87 : vector<2x1x256xf32> to vector<2x16x256xf32>
    %89 = arith.mulf %67, %88 : vector<2x16x256xf32>
    %90 = vector.shape_cast %86 : vector<2x256xf32> to vector<2x1x256xf32>
    %91 = vector.broadcast %90 : vector<2x1x256xf32> to vector<2x16x256xf32>
    %92 = arith.addf %89, %91 : vector<2x16x256xf32>
    %c0_75 = arith.constant 0 : index
    %c1_76 = arith.constant 1 : index
    %c0_77 = arith.constant 0 : index
    %93 = vector.load %arg1[%c0_75, %c1_76, %c0_77] : memref<2x18x256xf32, #tpu.memory_space<vmem>>, vector<2x16x256xf32>
    %94 = arith.addf %92, %93 : vector<2x16x256xf32>
    %cst_78 = arith.constant 0.000000e+00 : f32
    %95 = vector.broadcast %cst_78 : f32 to vector<2x16x256xf32>
    %96 = arith.maximumf %94, %95 : vector<2x16x256xf32>
    %c0_79 = arith.constant 0 : index
    %c0_80 = arith.constant 0 : index
    %c0_81 = arith.constant 0 : index
    %97 = vector.load %arg7[%c0_79, %c0_80, %c0_81] : memref<2x16x256xf32, #tpu.memory_space<vmem>>, vector<2x16x256xf32>
    tpu.vector_store %arg7[%c0_79, %c0_80, %c0_81], %96 {strides = array<i32>} : memref<2x16x256xf32, #tpu.memory_space<vmem>>, vector<2x16x256xf32>,
    return
  }
  func.func @transform_0(%arg0: i32) -> (i32, i32, i32) {
    %c0_i32 = arith.constant 0 : i32
    %c0_i32_0 = arith.constant 0 : i32
    %c0_i32_1 = arith.constant 0 : i32
    return %arg0, %c0_i32, %c0_i32_0 : i32, i32, i32
  }
  func.func @transform_1(%arg0: i32) -> (i32, i32, i32) {
    %c0_i32 = arith.constant 0 : i32
    %c0_i32_0 = arith.constant 0 : i32
    %c0_i32_1 = arith.constant 0 : i32
    %c0_i32_2 = arith.constant 0 : i32
    return %c0_i32, %c0_i32_0, %c0_i32_1 : i32, i32, i32
  }
  func.func @transform_2(%arg0: i32) -> (i32, i32, i32) {
    %c0_i32 = arith.constant 0 : i32
    %c0_i32_0 = arith.constant 0 : i32
    %c0_i32_1 = arith.constant 0 : i32
    %c0_i32_2 = arith.constant 0 : i32
    return %c0_i32, %c0_i32_0, %c0_i32_1 : i32, i32, i32
  }
  func.func @transform_3(%arg0: i32) -> (i32, i32) {
    %c0_i32 = arith.constant 0 : i32
    %c0_i32_0 = arith.constant 0 : i32
    %c0_i32_1 = arith.constant 0 : i32
    return %c0_i32, %c0_i32_0 : i32, i32
  }
  func.func @transform_4(%arg0: i32) -> (i32, i32) {
    %c0_i32 = arith.constant 0 : i32
    %c0_i32_0 = arith.constant 0 : i32
    %c0_i32_1 = arith.constant 0 : i32
    return %c0_i32, %c0_i32_0 : i32, i32
  }
  func.func @transform_5(%arg0: i32) -> (i32, i32) {
    %c0_i32 = arith.constant 0 : i32
    %c0_i32_0 = arith.constant 0 : i32
    %c0_i32_1 = arith.constant 0 : i32
    return %c0_i32, %c0_i32_0 : i32, i32
  }
  func.func @transform_6(%arg0: i32) -> (i32, i32, i32) {
    %c0_i32 = arith.constant 0 : i32
    %c0_i32_0 = arith.constant 0 : i32
    %c0_i32_1 = arith.constant 0 : i32
    return %arg0, %c0_i32, %c0_i32_0 : i32, i32, i32
  }
}

</mosaic_0001>

<bundles_post_ra>
// kernel: tpu_custom_call.1
= control target key start
LH: loop header
LB: loop body
LE: loop exit
PB: predicated region body
PF: predicated region fallthrough
CT: control target
= control target key end

     0   :  { %11 = vsyncpa [#allocation4], 0  ;;  %s3742_s0 = inlined_call_operand.vmem [shape: f32[2,18,256], index: 0, kind: input, shape index: {}]   ;;  %s3743_s1 = inlined_call_operand.hbm [shape: f32[3,256,256], index: 1, kind: input, shape index: {}]   ;;  %s3744_s2 = inlined_call_operand.hbm [shape: f32[3,256,256], index: 2, kind: input, shape index: {}]   ;;  %s3745_s3 = inlined_call_operand.hbm [shape: f32[256,256], index: 3, kind: input, shape index: {}]   ;;  %s3746_s4 = inlined_call_operand.vmem [shape: f32[2,256], index: 4, kind: input, shape index: {}]   ;;  %s3747_s5 = inlined_call_operand.vmem [shape: f32[2,256], index: 5, kind: input, shape index: {}]   ;;  %s3748_s6 = inlined_call_operand.hbm [shape: f32[2,16,256], index: 6, kind: output, shape index: {}]  }
   0x1   :  { %12 = vsyncpa [#allocation7], 0 }
   0x2   :  { %13 = vsyncpa [#allocation5], 0  ;;  %s3014_s21 = smov [#allocation6]   ;;  %s3015_s23 = smov [#allocation3]  }
   0x3   :  { %s33_s22 = sshll.u32 %s3014_s21, 4  ;;  %s21_s24 = sshll.u32 %s3015_s23, 4  ;;  %s34_s22 = int_to_ptr.vmem [resolvable:$true] %s33_s22  ;;  %s3057_s24 = int_to_ptr.vmem [resolvable:$true] %s21_s24 }
   0x4   :  { %s2920_s27 = scalar_lea.hbm %s3744_s2, 24576 }
   0x5   :  { %p2921_p0 = scmp.ne.s32.totalorder %s3744_s2, %s2920_s27  ;;  %p2924_p1 = scmp.lt.u32.totalorder %s2920_s27, %s3744_s2 }
   0x7   :  { %p2926_p2 = pnand %p2924_p1, %p2921_p0 }
   0x9   :  { %2929 = shalt.err (!%p2926_p2)
}
   0xa   :  { %s2930_s8 = scalar_lea.vmem %s34_s22, 24576  ;;  %p2935_p4 = scmp.lt.s32.totalorder %s34_s22, %s34_s22 }
   0xb   :  { %p2931_p3 = scmp.ne.s32.totalorder %s34_s22, %s2930_s8  ;;  %p2936_p5 = scmp.lt.s32.totalorder %s2930_s8, %s2930_s8 }
   0xd   :  { %p2937_p6 = por %p2936_p5, %p2935_p4 }
   0xf   :  { %p2938_p7 = pnand %p2937_p6, %p2931_p3 }
  0x11   :  { %2941 = shalt.err (!%p2938_p7)
}
  0x12   :  { %s3016_s9 = smov 256   ;;  %s3017_s10 = smov 16  }
  0x13   :  { %39 = dma.hbm_to_vmem [thread:$0]  %s3744_s2, 24576, %s34_s22, [#allocation7], %s3016_s9, %s3016_s9, %s3017_s10  }
  0x14   :  { %s2942_s15 = scalar_lea.hbm %s3743_s1, 24576 }
  0x15   :  { %p2943_p8 = scmp.ne.s32.totalorder %s3743_s1, %s2942_s15  ;;  %p2946_p9 = scmp.lt.u32.totalorder %s2942_s15, %s3743_s1 }
  0x17   :  { %p2948_p10 = pnand %p2946_p9, %p2943_p8 }
  0x19   :  { %2951 = shalt.err (!%p2948_p10)
}
  0x1a   :  { %s2952_s20 = scalar_lea.vmem %s3057_s24, 24576  ;;  %p2957_p12 = scmp.lt.s32.totalorder %s3057_s24, %s3057_s24 }
  0x1b   :  { %p2953_p11 = scmp.ne.s32.totalorder %s3057_s24, %s2952_s20  ;;  %p2958_p13 = scmp.lt.s32.totalorder %s2952_s20, %s2952_s20 }
  0x1d   :  { %p2959_p0 = por %p2958_p13, %p2957_p12 }
  0x1f   :  { %p2960_p1 = pnand %p2959_p0, %p2953_p11 }
  0x21   :  { %2963 = shalt.err (!%p2960_p1)
}
  0x22   :  { %27 = dma.hbm_to_vmem [thread:$0]  %s3743_s1, 24576, %s3057_s24, [#allocation4], %s3016_s9, %s3016_s9, %s3017_s10  }
  0x23   :  { %s3018_s22 = smov [#allocation8]   ;;  %s2964_s27 = scalar_lea.hbm %s3745_s3, 8192 }
  0x24   :  { %s45_s23 = sshll.u32 %s3018_s22, 4  ;;  %p2965_p2 = scmp.ne.s32.totalorder %s3745_s3, %s2964_s27  ;;  %s46_s23 = int_to_ptr.vmem [resolvable:$true] %s45_s23 }
  0x25   :  { %p2968_p3 = scmp.lt.u32.totalorder %s2964_s27, %s3745_s3 }
  0x27   :  { %p2970_p4 = pnand %p2968_p3, %p2965_p2 }
  0x29   :  { %2973 = shalt.err (!%p2970_p4)
}
  0x2a   :  { %s2974_s8 = scalar_lea.vmem %s46_s23, 8192  ;;  %p2979_p6 = scmp.lt.s32.totalorder %s46_s23, %s46_s23 }
  0x2b   :  { %p2975_p5 = scmp.ne.s32.totalorder %s46_s23, %s2974_s8  ;;  %p2980_p7 = scmp.lt.s32.totalorder %s2974_s8, %s2974_s8 }
  0x2d   :  { %p2981_p8 = por %p2980_p7, %p2979_p6 }
  0x2f   :  { %p2982_p9 = pnand %p2981_p8, %p2975_p5 }
  0x31   :  { %2985 = shalt.err (!%p2982_p9)
}
  0x32   :  { %51 = dma.hbm_to_vmem [thread:$0]  %s3745_s3, 8192, %s46_s23, [#allocation7], %s3016_s9, %s3016_s9, %s3017_s10  }
  0x33   :  { %3008 = dma.done.wait [#allocation4], 24576  }
  0x34   :  { %3009 = vsyncadd [#allocation4], 4294942720 }
  0x35   :  { %3010 = dma.done.wait [#allocation7], 32768  }
  0x36   :  { %3011 = vsyncadd [#allocation7], 4294934528  ;;  %v188_v0 = vld [vmem:[#allocation3 + $0x208] sm:$0xff]  ;;  %v190_v1 = vld [vmem:[#allocation3 + $0x218] sm:$0xff]  ;;  %vm157_vm0 = vcmask 1046528   ;;  %vm445_vm1 = vcmask 1045504  }
  0x37   :  { %v187_v2 = vld [vmem:[#allocation3 + $0x200] sm:$0xff]  ;;  %v2232_v3 = vpack.c.bf16 %v190_v1, %v188_v0  ;;  %v189_v4 = vld [vmem:[#allocation3 + $0x210] sm:$0xff]  ;;  %v192_v5 = vld [vmem:[#allocation3 + $0x228] sm:$0xff]  ;;  %vm768_vm2 = vcmask 1041409   ;;  %vm1099_vm4 = vcmask 1040384  }
  0x38   :  { %v194_v6 = vld [vmem:[#allocation3 + $0x238] sm:$0xff]  ;;  %v2234_v7 = vpack.c.bf16 %v189_v4, %v187_v2  ;;  %v191_v9 = vld [vmem:[#allocation3 + $0x220] sm:$0xff]  ;;  %v193_v10 = vld [vmem:[#allocation3 + $0x230] sm:$0xff] }
  0x39   :  { %v2236_v8 = vpack.c.bf16 %v194_v6, %v192_v5  ;;  %v196_v11 = vld [vmem:[#allocation3 + $0x248] sm:$0xff]  ;;  %2233 = vmatprep.subr.bf16.mxu0 %v2232_v3  ;;  %v198_v12 = vld [vmem:[#allocation3 + $0x258] sm:$0xff]  ;;  %v2238_v13 = vpack.c.bf16 %v193_v10, %v191_v9  ;;  %v195_v15 = vld [vmem:[#allocation3 + $0x240] sm:$0xff] }
  0x3a   :  { %2235 = vmatpush1.bf16.msra.mxu0 %v2234_v7  ;;  %v2240_v14 = vpack.c.bf16 %v198_v12, %v196_v11  ;;  %v197_v16 = vld [vmem:[#allocation3 + $0x250] sm:$0xff]  ;;  %v200_v17 = vld [vmem:[#allocation3 + $0x268] sm:$0xff]  ;;  %v202_v18 = vld [vmem:[#allocation3 + $0x278] sm:$0xff] }
  0x3b   :  { %2237 = vmatprep.subr.bf16.mxu0 %v2236_v8  ;;  %v2242_v19 = vpack.c.bf16 %v197_v16, %v195_v15  ;;  %v2244_v20 = vpack.c.bf16 %v202_v18, %v200_v17  ;;  %v199_v21 = vld [vmem:[#allocation3 + $0x260] sm:$0xff]  ;;  %v201_v22 = vld [vmem:[#allocation3 + $0x270] sm:$0xff]  ;;  %v204_v23 = vld [vmem:[#allocation3 + $0x288] sm:$0xff] }
  0x3c   :  { %v206_v24 = vld [vmem:[#allocation3 + $0x298] sm:$0xff]  ;;  %v2246_v25 = vpack.c.bf16 %v201_v22, %v199_v21  ;;  %v203_v27 = vld [vmem:[#allocation3 + $0x280] sm:$0xff]  ;;  %v205_v28 = vld [vmem:[#allocation3 + $0x290] sm:$0xff] }
  0x3d   :  { %v2248_v26 = vpack.c.bf16 %v206_v24, %v204_v23  ;;  %v208_v29 = vld [vmem:[#allocation3 + $0x2a8] sm:$0xff]  ;;  %v210_v30 = vld [vmem:[#allocation3 + $0x2b8] sm:$0xff]  ;;  %v2250_v31 = vpack.c.bf16 %v205_v28, %v203_v27  ;;  %v207_v33 = vld [vmem:[#allocation3 + $0x2a0] sm:$0xff] }
  0x3e   :  { %2239 = vmatpush1.bf16.msra.mxu0 %v2238_v13  ;;  %v2252_v32 = vpack.c.bf16 %v210_v30, %v208_v29  ;;  %v209_v34 = vld [vmem:[#allocation3 + $0x2b0] sm:$0xff]  ;;  %v212_v35 = vld [vmem:[#allocation3 + $0x2c8] sm:$0xff]  ;;  %v214_v36 = vld [vmem:[#allocation3 + $0x2d8] sm:$0xff] }
  0x3f   :  { %2241 = vmatprep.subr.bf16.mxu0 %v2240_v14  ;;  %v2254_v37 = vpack.c.bf16 %v209_v34, %v207_v33  ;;  %v211_v38 = vld [vmem:[#allocation3 + $0x2c0] sm:$0xff]  ;;  %v2256_v39 = vpack.c.bf16 %v214_v36, %v212_v35  ;;  %v213_v40 = vld [vmem:[#allocation3 + $0x2d0] sm:$0xff]  ;;  %v3112_v41 = vld [vmem:[%s3742_s0 + $0x18] sm:$0xff] }
  0x40   :  { %v138_v42 = vld [vmem:[%s3742_s0 + $0x8] sm:$0xfe]  ;;  %v218_v44 = vld [vmem:[#allocation3 + $0x2f8] sm:$0xff]  ;;  %v162_v46 = vrot.slane %v3112_v41, 1  ;;  %v2258_v47 = vpack.c.bf16 %v213_v40, %v211_v38  ;;  %v215_v50 = vld [vmem:[#allocation3 + $0x2e0] sm:$0xff] }
  0x41   :  { %v216_v43 = vld [vmem:[#allocation3 + $0x2e8] sm:$0xff]  ;;  %v161_v45 = vrot.slane %v138_v42, 1  ;;  %v217_v51 = vld [vmem:[#allocation3 + $0x2f0] sm:$0xff]  ;;  %v222_v53 = vld [vmem:[#allocation3 + $0x318] sm:$0xff] }
  0x42   :  { %2243 = vmatpush1.bf16.msra.mxu0 %v2242_v19  ;;  %v2260_v49 = vpack.c.bf16 %v218_v44, %v216_v43  ;;  %v220_v52 = vld [vmem:[#allocation3 + $0x308] sm:$0xff]  ;;  %v2262_v54 = vpack.c.bf16 %v217_v51, %v215_v50  ;;  %v219_v56 = vld [vmem:[#allocation3 + $0x300] sm:$0xff]  ;;  %v221_v57 = vld [vmem:[#allocation3 + $0x310] sm:$0xff] }
  0x43   :  { %2245 = vmatprep.subr.bf16.mxu0 %v2244_v20  ;;  %v163_v48 = vsel %vm157_vm0, %v161_v45, %v162_v46  ;;  %v2264_v55 = vpack.c.bf16 %v222_v53, %v220_v52  ;;  %v224_v58 = vld [vmem:[#allocation3 + $0x328] sm:$0xff]  ;;  %v226_v59 = vld [vmem:[#allocation3 + $0x338] sm:$0xff]  ;;  %v2266_v60 = vpack.c.bf16 %v221_v57, %v219_v56  ;;  %v223_v62 = vld [vmem:[#allocation3 + $0x320] sm:$0xff] }
  0x44   :  { %315 = vmatprep.mubr.f32.mxu0 %v163_v48  ;;  %v2268_v61 = vpack.c.bf16 %v226_v59, %v224_v58  ;;  %v225_v63 = vld [vmem:[#allocation3 + $0x330] sm:$0xff]  ;;  %v228_v0 = vld [vmem:[#allocation3 + $0x348] sm:$0xff]  ;;  %v230_v1 = vld [vmem:[#allocation3 + $0x358] sm:$0xff] }
  0x45   :  { %v2270_v2 = vpack.c.bf16 %v225_v63, %v223_v62  ;;  %v2272_v3 = vpack.c.bf16 %v230_v1, %v228_v0  ;;  %v227_v4 = vld [vmem:[#allocation3 + $0x340] sm:$0xff]  ;;  %v229_v5 = vld [vmem:[#allocation3 + $0x350] sm:$0xff]  ;;  %v232_v6 = vld [vmem:[#allocation3 + $0x368] sm:$0xff] }
  0x46   :  { %2247 = vmatpush1.bf16.msra.mxu0 %v2246_v25  ;;  %v234_v7 = vld [vmem:[#allocation3 + $0x378] sm:$0xff]  ;;  %v2274_v8 = vpack.c.bf16 %v229_v5, %v227_v4  ;;  %v231_v10 = vld [vmem:[#allocation3 + $0x360] sm:$0xff]  ;;  %v233_v11 = vld [vmem:[#allocation3 + $0x370] sm:$0xff] }
  0x47   :  { %2249 = vmatprep.subr.bf16.mxu0 %v2248_v26  ;;  %v2276_v9 = vpack.c.bf16 %v234_v7, %v232_v6  ;;  %v236_v12 = vld [vmem:[#allocation3 + $0x388] sm:$0xff]  ;;  %v238_v13 = vld [vmem:[#allocation3 + $0x398] sm:$0xff]  ;;  %v2278_v14 = vpack.c.bf16 %v233_v11, %v231_v10  ;;  %v235_v16 = vld [vmem:[#allocation3 + $0x380] sm:$0xff] }
  0x48   :  { %v2280_v15 = vpack.c.bf16 %v238_v13, %v236_v12  ;;  %v237_v17 = vld [vmem:[#allocation3 + $0x390] sm:$0xff]  ;;  %v240_v18 = vld [vmem:[#allocation3 + $0x3a8] sm:$0xff]  ;;  %v242_v19 = vld [vmem:[#allocation3 + $0x3b8] sm:$0xff] }
  0x49   :  { %v2282_v20 = vpack.c.bf16 %v237_v17, %v235_v16  ;;  %v2284_v21 = vpack.c.bf16 %v242_v19, %v240_v18  ;;  %v239_v22 = vld [vmem:[#allocation3 + $0x3a0] sm:$0xff]  ;;  %v241_v23 = vld [vmem:[#allocation3 + $0x3b0] sm:$0xff]  ;;  %v244_v24 = vld [vmem:[#allocation3 + $0x3c8] sm:$0xff] }
  0x4a   :  { %2251 = vmatpush1.bf16.msra.mxu0 %v2250_v31  ;;  %v246_v25 = vld [vmem:[#allocation3 + $0x3d8] sm:$0xff]  ;;  %v2286_v26 = vpack.c.bf16 %v241_v23, %v239_v22  ;;  %v243_v28 = vld [vmem:[#allocation3 + $0x3c0] sm:$0xff]  ;;  %v245_v29 = vld [vmem:[#allocation3 + $0x3d0] sm:$0xff] }
  0x4b   :  { %2253 = vmatprep.subr.bf16.mxu0 %v2252_v32  ;;  %v2288_v27 = vpack.c.bf16 %v246_v25, %v244_v24  ;;  %v248_v30 = vld [vmem:[#allocation3 + $0x3e8] sm:$0xff]  ;;  %v250_v31 = vld [vmem:[#allocation3 + $0x3f8] sm:$0xff]  ;;  %v2290_v32 = vpack.c.bf16 %v245_v29, %v243_v28  ;;  %v247_v33 = vld [vmem:[#allocation3 + $0x3e0] sm:$0xff] }
  0x4c   :  { %v2292_v34 = vpack.c.bf16 %v250_v31, %v248_v30  ;;  %v249_v35 = vld [vmem:[#allocation3 + $0x3f0] sm:$0xff]  ;;  %v74_v38 = vld [vmem:[#allocation3 + $0x8] sm:$0xff]  ;;  %v73_v45 = vld [vmem:[#allocation3] sm:$0xff] }
  0x4d   :  { %v3124_v36 = vld [vmem:[%s3742_s0 + $0x10] sm:$0xff]  ;;  %v140_v40 = vld [vmem:[%s3742_s0 + $0x28] sm:$0x1]  ;;  %v2294_v42 = vpack.c.bf16 %v249_v35, %v247_v33  ;;  %v139_v51 = vld [vmem:[%s3742_s0 + $0x20] sm:$0x1] }
  0x4e   :  { %2255 = vmatpush1.bf16.msra.mxu0 %v2254_v37  ;;  %v137_v37 = vld [vmem:[%s3742_s0] sm:$0xfe]  ;;  %v159_v44 = vrot.slane %v3124_v36, 1  ;;  %v75_v48 = vld [vmem:[#allocation3 + $0x10] sm:$0xff]  ;;  %v166_v50 = vrot.slane %v140_v40, 1  ;;  %v80_v52 = vld [vmem:[#allocation3 + $0x38] sm:$0xff] }
  0x4f   :  { %2257 = vmatprep.subr.bf16.mxu0 %v2256_v39  ;;  %v76_v39 = vld [vmem:[#allocation3 + $0x18] sm:$0xff]  ;;  %v158_v43 = vrot.slane %v137_v37, 1  ;;  %v3139_v53 = vld [vmem:[%s3742_s0 + $0x48] sm:$0xff]  ;;  %v2298_v56 = vpack.c.bf16 %v75_v48, %v73_v45  ;;  %v77_v57 = vld [vmem:[#allocation3 + $0x20] sm:$0xff]  ;;  %v164_v58 = vrot.slane %v139_v51, 1 }
  0x50   :  { %v172_v63 = vrot.slane %v3139_v53, 1  ;;  %v3152_v0 = vld [vmem:[%s3742_s0 + $0x40] sm:$0xff]  ;;  %v141_v1 = vld [vmem:[%s3742_s0 + $0x30] sm:$0xfe]  ;;  %v144_v4 = vld [vmem:[%s3742_s0 + $0x58] sm:$0x1] }
  0x51   :  { %v165_v5 = vsel %vm157_vm0, %v159_v44, %v164_v58  ;;  %v168_v6 = vrot.slane %v141_v1, 1  ;;  %v169_v7 = vrot.slane %v3152_v0, 1  ;;  %v83_v10 = vld [vmem:[#allocation3 + $0x50] sm:$0xff]  ;;  %v176_v12 = vrot.slane %v144_v4, 1  ;;  %v90_v23 = vld [vmem:[#allocation3 + $0x88] sm:$0xff]  ;;  %v92_v24 = vld [vmem:[#allocation3 + $0x98] sm:$0xff] }
  0x52   :  { %2259 = vmatpush1.bf16.msra.mxu0 %v2258_v47  ;;  %v2296_v47 = vpack.c.bf16 %v76_v39, %v74_v38  ;;  %v143_v13 = vld [vmem:[%s3742_s0 + $0x50] sm:$0x1]  ;;  %v89_v28 = vld [vmem:[#allocation3 + $0x80] sm:$0xff]  ;;  %v66_v30 = vld [vmem:[%s3742_s0 + $0x8] sm:$0xff] }
  0x53   :  { %2261 = vmatprep.subr.bf16.mxu0 %v2260_v49  ;;  %v78_v49 = vld [vmem:[#allocation3 + $0x28] sm:$0xff]  ;;  %v170_v17 = vsel %vm157_vm0, %v168_v6, %v169_v7  ;;  %v174_v18 = vrot.slane %v143_v13, 1  ;;  %v177_v22 = vsel %vm157_vm0, %v172_v63, %v176_v12  ;;  %v91_v29 = vld [vmem:[#allocation3 + $0x90] sm:$0xff]  ;;  %v93_v33 = vld [vmem:[#allocation3 + $0xa0] sm:$0xff] }
  0x54   :  { %v2300_v59 = vpack.c.bf16 %v80_v52, %v78_v49  ;;  %v94_v31 = vld [vmem:[#allocation3 + $0xa8] sm:$0xff]  ;;  %v703_v37 = vld [vmem:[#allocation8 + $0x18] sm:$0xff]  ;;  %v700_v38 = vld [vmem:[#allocation8] sm:$0xff]  ;;  %v2314_v39 = vpack.c.bf16 %v91_v29, %v89_v28 }
  0x55   :  { %v701_v35 = vld [vmem:[#allocation8 + $0x8] sm:$0xff]  ;;  %v704_v49 = vld [vmem:[#allocation8 + $0x20] sm:$0xff]  ;;  %v104_v4 = vld [vmem:[#allocation3 + $0xf8] sm:$0xff] }
  0x56   :  { %2263 = vmatpush1.bf16.msra.mxu0 %v2262_v54  ;;  %v142_v54 = vld [vmem:[%s3742_s0 + $0x38] sm:$0xfe]  ;;  %v3172_v40 = vpack.c.bf16 %v703_v37, %v701_v35  ;;  %v709_v51 = vld [vmem:[#allocation8 + $0x48] sm:$0xff]  ;;  %v97_v58 = vld [vmem:[#allocation3 + $0xc0] sm:$0xff] }
  0x57   :  { %2265 = vmatprep.subr.bf16.mxu0 %v2264_v55  ;;  %v160_v55 = vsel %vm157_vm0, %v158_v43, %v159_v44  ;;  %v171_v62 = vrot.slane %v142_v54, 1  ;;  %v705_v43 = vld [vmem:[#allocation8 + $0x28] sm:$0xff]  ;;  %v707_v44 = vld [vmem:[#allocation8 + $0x38] sm:$0xff]  ;;  %v101_v6 = vld [vmem:[#allocation3 + $0xe0] sm:$0xff] }
  0x58   :  { %v3176_v48 = vpack.c.bf16 %v707_v44, %v705_v43  ;;  %v98_v52 = vld [vmem:[#allocation3 + $0xc8] sm:$0xff]  ;;  %v100_v54 = vld [vmem:[#allocation3 + $0xd8] sm:$0xff]  ;;  %2425 = vmatprep.subr.bf16.mxu1 %v3172_v40  ;;  %v111_v35 = vld [vmem:[#allocation3 + $0x130] sm:$0xff] }
  0x59   :  { %v173_v11 = vsel %vm157_vm0, %v171_v62, %v172_v63  ;;  %v2320_v62 = vpack.c.bf16 %v100_v54, %v98_v52  ;;  %v99_v63 = vld [vmem:[#allocation3 + $0xd0] sm:$0xff]  ;;  %v713_v1 = vld [vmem:[#allocation8 + $0x68] sm:$0xff]  ;;  %v719_v13 = vld [vmem:[#allocation8 + $0x98] sm:$0xff] }
  0x5a   :  { %2267 = vmatpush1.bf16.msra.mxu0 %v2266_v60  ;;  %v79_v60 = vld [vmem:[#allocation3 + $0x30] sm:$0xff]  ;;  %v717_v12 = vld [vmem:[#allocation8 + $0x88] sm:$0xff] }
  0x5b   :  { %2269 = vmatprep.subr.bf16.mxu0 %v2268_v61  ;;  %v167_v61 = vsel %vm157_vm0, %v162_v46, %v166_v50  ;;  %v2302_v46 = vpack.c.bf16 %v79_v60, %v77_v57  ;;  %v706_v50 = vld [vmem:[#allocation8 + $0x30] sm:$0xff]  ;;  %v708_v60 = vld [vmem:[#allocation8 + $0x40] sm:$0xff]  ;;  %v725_v37 = vld [vmem:[#allocation8 + $0xc8] sm:$0xff] }
  0x5c   :  { %v115_v54 = vld [vmem:[#allocation3 + $0x150] sm:$0xff] }
  0x5e   :  { %2271 = vmatpush1.bf16.msra.mxu0 %v2270_v2  ;;  %v82_v2 = vld [vmem:[#allocation3 + $0x48] sm:$0xff] }
  0x5f   :  { %2273 = vmatprep.subr.bf16.mxu0 %v2272_v3  ;;  %v84_v3 = vld [vmem:[#allocation3 + $0x58] sm:$0xff] }
  0x62   :  { %2275 = vmatpush1.bf16.msra.mxu0 %v2274_v8  ;;  %v2304_v8 = vpack.c.bf16 %v84_v3, %v82_v2  ;;  %v715_v2 = vld [vmem:[#allocation8 + $0x78] sm:$0xff]  ;;  %v102_v3 = vld [vmem:[#allocation3 + $0xe8] sm:$0xff] }
  0x63   :  { %2277 = vmatprep.subr.bf16.mxu0 %v2276_v9  ;;  %v81_v9 = vld [vmem:[#allocation3 + $0x40] sm:$0xff] }
  0x64   :  { %v2306_v16 = vpack.c.bf16 %v83_v10, %v81_v9  ;;  %v714_v9 = vld [vmem:[#allocation8 + $0x70] sm:$0xff]  ;;  %v2324_v10 = vpack.c.bf16 %v104_v4, %v102_v3 }
  0x65   :  { %v730_v3 = vld [vmem:[#allocation8 + $0xf0] sm:$0xff] }
  0x66   :  { %2279 = vmatpush1.bf16.msra.mxu0 %v2278_v14  ;;  %v86_v14 = vld [vmem:[#allocation3 + $0x68] sm:$0xff] }
  0x67   :  { %2281 = vmatprep.subr.bf16.mxu0 %v2280_v15  ;;  %v88_v15 = vld [vmem:[#allocation3 + $0x78] sm:$0xff] }
  0x68   :  { %v2308_v19 = vpack.c.bf16 %v88_v15, %v86_v14  ;;  %v106_v14 = vld [vmem:[#allocation3 + $0x108] sm:$0xff]  ;;  %v108_v15 = vld [vmem:[#allocation3 + $0x118] sm:$0xff] }
  0x6a   :  { %2283 = vmatpush1.bf16.msra.mxu0 %v2282_v20  ;;  %v85_v20 = vld [vmem:[#allocation3 + $0x60] sm:$0xff] }
  0x6b   :  { %2285 = vmatprep.subr.bf16.mxu0 %v2284_v21  ;;  %v87_v21 = vld [vmem:[#allocation3 + $0x70] sm:$0xff] }
  0x6c   :  { %v2310_v25 = vpack.c.bf16 %v87_v21, %v85_v20  ;;  %v716_v20 = vld [vmem:[#allocation8 + $0x80] sm:$0xff]  ;;  %v718_v21 = vld [vmem:[#allocation8 + $0x90] sm:$0xff] }
  0x6d   :  { %v3198_v28 = vpack.c.bf16 %v718_v21, %v716_v20  ;;  %v123_v20 = vld [vmem:[#allocation3 + $0x190] sm:$0xff]  ;;  %v126_v21 = vld [vmem:[#allocation3 + $0x1a8] sm:$0xff] }
  0x6e   :  { %2287 = vmatpush1.bf16.msra.mxu0 %v2286_v26  ;;  %v175_v26 = vsel %vm157_vm0, %v169_v7, %v174_v18  ;;  %v3189_v7 = vpack.c.bf16 %v715_v2, %v713_v1  ;;  %v105_v18 = vld [vmem:[#allocation3 + $0x100] sm:$0xff] }
  0x6f   :  { %2289 = vmatprep.subr.bf16.mxu0 %v2288_v27  ;;  %v2312_v27 = vpack.c.bf16 %v92_v24, %v90_v23  ;;  %v107_v23 = vld [vmem:[#allocation3 + $0x110] sm:$0xff]  ;;  %v721_v24 = vld [vmem:[#allocation8 + $0xa8] sm:$0xff]  ;;  %v728_v2 = vld [vmem:[#allocation8 + $0xe0] sm:$0xff] }
  0x70   :  { %v2330_v29 = vpack.c.bf16 %v107_v23, %v105_v18  ;;  %v121_v18 = vld [vmem:[#allocation3 + $0x180] sm:$0xff] }
  0x72   :  { %2291 = vmatpush1.bf16.msra.mxu0 %v2290_v32  ;;  %v96_v32 = vld [vmem:[#allocation3 + $0xb8] sm:$0xff] }
  0x73   :  { %2293 = vmatprep.subr.bf16.mxu0 %v2292_v34  ;;  %v95_v34 = vld [vmem:[#allocation3 + $0xb0] sm:$0xff]  ;;  %v2316_v45 = vpack.c.bf16 %v96_v32, %v94_v31  ;;  %v720_v32 = vld [vmem:[#allocation8 + $0xa0] sm:$0xff] }
  0x74   :  { %v2318_v57 = vpack.c.bf16 %v95_v34, %v93_v33  ;;  %v722_v33 = vld [vmem:[#allocation8 + $0xb0] sm:$0xff] }
  0x75   :  { %v3204_v43 = vpack.c.bf16 %v722_v33, %v720_v32 }
  0x76   :  { %2295 = vmatpush1.bf16.msra.mxu0 %v2294_v42  ;;  %v702_v42 = vld [vmem:[#allocation8 + $0x10] sm:$0xff] }
  0x77   :  { %2297 = vmatprep.subr.bf16.mxu0 %v2296_v47  ;;  %v3174_v47 = vpack.c.bf16 %v702_v42, %v700_v38  ;;  %v727_v38 = vld [vmem:[#allocation8 + $0xd8] sm:$0xff] }
  0x78   :  { %v116_v42 = vld [vmem:[#allocation3 + $0x158] sm:$0xff] }
  0x79   :  { %316 = vmatmul.mubr.f32.vlgmr.msra.gmra.mrb[0].mxu0 %v160_v55  ;;  %v711_v55 = vld [vmem:[#allocation8 + $0x58] sm:$0xff]  ;;  %2427 = vmatpush1.bf16.msra.mxu1 %v3174_v47 }
  0x7a   :  { %2299 = vmatpush1.bf16.msra.mxu0 %v2298_v56  ;;  %321 = vmatprep.mubr.f32.mxu0 %v167_v61  ;;  %v3180_v56 = vpack.c.bf16 %v706_v50, %v704_v49  ;;  %v710_v61 = vld [vmem:[#allocation8 + $0x50] sm:$0xff]  ;;  %v3207_v49 = vpack.c.bf16 %v727_v38, %v725_v37  ;;  %v724_v50 = vld [vmem:[#allocation8 + $0xc0] sm:$0xff]  ;;  %v134_v37 = vld [vmem:[#allocation3 + $0x1e8] sm:$0xff] }
  0x7b   :  { %2301 = vmatprep.subr.bf16.mxu0 %v2300_v59  ;;  %2429 = vmatprep.subr.bf16.mxu1 %v3176_v48  ;;  %v3183_v59 = vpack.c.bf16 %v711_v55, %v709_v51  ;;  %v726_v51 = vld [vmem:[#allocation8 + $0xd0] sm:$0xff]  ;;  %v729_v55 = vld [vmem:[#allocation8 + $0xe8] sm:$0xff]  ;;  %v136_v38 = vld [vmem:[#allocation3 + $0x1f8] sm:$0xff] }
  0x7d   :  { %322 = vmatmul.mubr.f32.gmra.mrb[2].mxu0 %v165_v5  ;;  %2431 = vmatpush1.bf16.msra.mxu1 %v3180_v56  ;;  %v2322_v5 = vpack.c.bf16 %v99_v63, %v97_v58  ;;  %v118_v58 = vld [vmem:[#allocation3 + $0x168] sm:$0xff]  ;;  %v117_v63 = vld [vmem:[#allocation3 + $0x160] sm:$0xff] }
  0x7e   :  { %2303 = vmatpush1.bf16.msra.mxu0 %v2302_v46  ;;  %327 = vmatprep.mubr.f32.mxu0 %v173_v11  ;;  %v3186_v46 = vpack.c.bf16 %v710_v61, %v708_v60  ;;  %v103_v11 = vld [vmem:[#allocation3 + $0xf0] sm:$0xff]  ;;  %v120_v60 = vld [vmem:[#allocation3 + $0x178] sm:$0xff]  ;;  %v3210_v61 = vpack.c.bf16 %v726_v51, %v724_v50  ;;  %v476_v50 = vld [vmem:[#allocation3 + $0x408] sm:$0xff] }
  0x7f   :  { %2305 = vmatprep.subr.bf16.mxu0 %v2304_v8  ;;  %2433 = vmatprep.subr.bf16.mxu1 %v3183_v59  ;;  %v712_v8 = vld [vmem:[#allocation8 + $0x60] sm:$0xff]  ;;  %v2340_v4 = vpack.c.bf16 %v120_v60, %v118_v58  ;;  %v478_v51 = vld [vmem:[#allocation3 + $0x418] sm:$0xff]  ;;  %v480_v58 = vld [vmem:[#allocation3 + $0x428] sm:$0xff] }
  0x80   :  { %v482_v60 = vld [vmem:[#allocation3 + $0x438] sm:$0xff] }
  0x81   :  { %328 = vmatmul.mubr.f32.gmra.mrb[4].mxu0 %v170_v17  ;;  %2435 = vmatpush1.bf16.msra.mxu1 %v3186_v46  ;;  %v2326_v17 = vpack.c.bf16 %v103_v11, %v101_v6  ;;  %v733_v6 = vld [vmem:[#allocation8 + $0x108] sm:$0xff]  ;;  %v3216_v11 = vpack.c.bf16 %v730_v3, %v728_v2  ;;  %v2364_v2 = vpack.c.bf16 %v482_v60, %v480_v58  ;;  %v479_v3 = vld [vmem:[#allocation3 + $0x420] sm:$0xff]  ;;  %v501_v58 = vld [vmem:[#allocation3 + $0x4d0] sm:$0xff] }
  0x82   :  { %2307 = vmatpush1.bf16.msra.mxu0 %v2306_v16  ;;  %333 = vmatprep.mubr.f32.mxu0 %v177_v22  ;;  %v3192_v16 = vpack.c.bf16 %v714_v9, %v712_v8  ;;  %v2328_v22 = vpack.c.bf16 %v108_v15, %v106_v14  ;;  %v735_v8 = vld [vmem:[#allocation8 + $0x118] sm:$0xff]  ;;  %v122_v9 = vld [vmem:[#allocation3 + $0x188] sm:$0xff]  ;;  %v732_v14 = vld [vmem:[#allocation8 + $0x100] sm:$0xff] }
  0x83   :  { %2309 = vmatprep.subr.bf16.mxu0 %v2308_v19  ;;  %2437 = vmatprep.subr.bf16.mxu1 %v3189_v7  ;;  %v3195_v19 = vpack.c.bf16 %v719_v13, %v717_v12  ;;  %v3219_v13 = vpack.c.bf16 %v735_v8, %v733_v6  ;;  %v734_v15 = vld [vmem:[#allocation8 + $0x110] sm:$0xff]  ;;  %v486_v6 = vld [vmem:[#allocation3 + $0x458] sm:$0xff]  ;;  %v504_v60 = vld [vmem:[#allocation3 + $0x4e8] sm:$0xff] }
  0x84   :  { %v3222_v23 = vpack.c.bf16 %v734_v15, %v732_v14  ;;  %v70_v14 = vld [vmem:[%s3742_s0 + $0x38] sm:$0xff]  ;;  %v488_v15 = vld [vmem:[#allocation3 + $0x468] sm:$0xff] }
  0x85   :  { %334 = vmatmul.mubr.f32.gmra.mrb[6].mxu0 %v175_v26  ;;  %v110_v26 = vld [vmem:[#allocation3 + $0x128] sm:$0xff]  ;;  %2439 = vmatpush1.bf16.msra.mxu1 %v3192_v16 }
  0x86   :  { %2311 = vmatpush1.bf16.msra.mxu0 %v2310_v25  ;;  %404 = vmatprep.mubr.f32.mxu0 %v66_v30  ;;  %v723_v25 = vld [vmem:[#allocation8 + $0xb8] sm:$0xff]  ;;  %v109_v30 = vld [vmem:[#allocation3 + $0x120] sm:$0xff] }
  0x87   :  { %2313 = vmatprep.subr.bf16.mxu0 %v2312_v27  ;;  %v112_v27 = vld [vmem:[#allocation3 + $0x138] sm:$0xff]  ;;  %2441 = vmatprep.subr.bf16.mxu1 %v3195_v19  ;;  %v3201_v31 = vpack.c.bf16 %v723_v25, %v721_v24  ;;  %v2334_v44 = vpack.c.bf16 %v111_v35, %v109_v30  ;;  %v2346_v24 = vpack.c.bf16 %v123_v20, %v121_v18  ;;  %v131_v35 = vld [vmem:[#allocation3 + $0x1d0] sm:$0xff]  ;;  %v430_v18 = vld [vmem:[%s3742_s0 + $0x8] sm:$0xfc] }
  0x88   :  { %v2332_v34 = vpack.c.bf16 %v112_v27, %v110_v26  ;;  %v125_v26 = vld [vmem:[#allocation3 + $0x1a0] sm:$0xff]  ;;  %v127_v27 = vld [vmem:[#allocation3 + $0x1b0] sm:$0xff]  ;;  %v132_v30 = vld [vmem:[#allocation3 + $0x1d8] sm:$0xff] }
  0x89   :  { %2443 = vmatpush1.bf16.msra.mxu1 %v3198_v28  ;;  %v2350_v32 = vpack.c.bf16 %v127_v27, %v125_v26  ;;  %v449_v26 = vrot.slane %v430_v18, 2  ;;  %v450_v27 = vrot.slane %v3112_v41, 2 }
  0x8a   :  { %2315 = vmatpush1.bf16.msra.mxu0 %v2314_v39  ;;  %v114_v39 = vld [vmem:[#allocation3 + $0x148] sm:$0xff]  ;;  %2445 = vmatprep.subr.bf16.mxu1 %v3201_v31 }
  0x8b   :  { %2317 = vmatprep.subr.bf16.mxu0 %v2316_v45  ;;  %v113_v45 = vld [vmem:[#allocation3 + $0x140] sm:$0xff]  ;;  %v2336_v52 = vpack.c.bf16 %v116_v42, %v114_v39  ;;  %v2356_v42 = vpack.c.bf16 %v136_v38, %v134_v37  ;;  %v451_v37 = vsel %vm445_vm1, %v449_v26, %v450_v27  ;;  %v496_v38 = vld [vmem:[#allocation3 + $0x4a8] sm:$0xff] }
  0x8d   :  { %2447 = vmatpush1.bf16.msra.mxu1 %v3204_v43 }
  0x8e   :  { %2319 = vmatpush1.bf16.msra.mxu0 %v2318_v57  ;;  %v731_v57 = vld [vmem:[#allocation8 + $0xf8] sm:$0xff]  ;;  %2449 = vmatprep.subr.bf16.mxu1 %v3207_v49 }
  0x8f   :  { %2321 = vmatprep.subr.bf16.mxu0 %v2320_v62  ;;  %v2338_v62 = vpack.c.bf16 %v115_v54, %v113_v45  ;;  %v3213_v1 = vpack.c.bf16 %v731_v57, %v729_v55  ;;  %v135_v45 = vld [vmem:[#allocation3 + $0x1f0] sm:$0xff]  ;;  %v2360_v54 = vpack.c.bf16 %v478_v51, %v476_v50  ;;  %v475_v55 = vld [vmem:[#allocation3 + $0x400] sm:$0xff]  ;;  %v500_v51 = vld [vmem:[#allocation3 + $0x4c8] sm:$0xff] }
  0x90   :  { %v477_v57 = vld [vmem:[#allocation3 + $0x410] sm:$0xff] }
  0x91   :  { %2451 = vmatpush1.bf16.msra.mxu1 %v3210_v61  ;;  %v497_v50 = vld [vmem:[#allocation3 + $0x4b0] sm:$0xff] }
  0x92   :  { %2323 = vmatpush1.bf16.msra.mxu0 %v2322_v5  ;;  %v119_v5 = vld [vmem:[#allocation3 + $0x170] sm:$0xff]  ;;  %2453 = vmatprep.subr.bf16.mxu1 %v3213_v1 }
  0x93   :  { %2325 = vmatprep.subr.bf16.mxu0 %v2324_v10  ;;  %v124_v10 = vld [vmem:[#allocation3 + $0x198] sm:$0xff]  ;;  %v2342_v12 = vpack.c.bf16 %v119_v5, %v117_v63  ;;  %v2362_v63 = vpack.c.bf16 %v477_v57, %v475_v55  ;;  %v484_v5 = vld [vmem:[#allocation3 + $0x448] sm:$0xff]  ;;  %v499_v57 = vld [vmem:[#allocation3 + $0x4c0] sm:$0xff] }
  0x95   :  { %2455 = vmatpush1.bf16.msra.mxu1 %v3216_v11 }
  0x96   :  { %2327 = vmatpush1.bf16.msra.mxu0 %v2326_v17  ;;  %v2344_v17 = vpack.c.bf16 %v124_v10, %v122_v9  ;;  %2457 = vmatprep.subr.bf16.mxu1 %v3219_v13  ;;  %v2368_v9 = vpack.c.bf16 %v486_v6, %v484_v5  ;;  %v483_v10 = vld [vmem:[#allocation3 + $0x440] sm:$0xff]  ;;  %v508_v5 = vld [vmem:[#allocation3 + $0x508] sm:$0xff]  ;;  %v510_v6 = vld [vmem:[#allocation3 + $0x518] sm:$0xff] }
  0x97   :  { %2329 = vmatprep.subr.bf16.mxu0 %v2328_v22  ;;  %v128_v22 = vld [vmem:[#allocation3 + $0x1b8] sm:$0xff] }
  0x98   :  { %v2348_v25 = vpack.c.bf16 %v128_v22, %v126_v21  ;;  %v69_v21 = vld [vmem:[%s3742_s0 + $0x30] sm:$0xff] }
  0x99   :  { %2459 = vmatpush1.bf16.msra.mxu1 %v3222_v23 }
  0x9a   :  { %2331 = vmatpush1.bf16.msra.mxu0 %v2330_v29  ;;  %v130_v29 = vld [vmem:[#allocation3 + $0x1c8] sm:$0xff] }
  0x9b   :  { %2333 = vmatprep.subr.bf16.mxu0 %v2332_v34  ;;  %v2352_v33 = vpack.c.bf16 %v132_v30, %v130_v29  ;;  %v129_v34 = vld [vmem:[#allocation3 + $0x1c0] sm:$0xff]  ;;  %v492_v29 = vld [vmem:[#allocation3 + $0x488] sm:$0xff]  ;;  %v494_v30 = vld [vmem:[#allocation3 + $0x498] sm:$0xff] }
  0x9c   :  { %v2354_v39 = vpack.c.bf16 %v131_v35, %v129_v34  ;;  %v491_v34 = vld [vmem:[#allocation3 + $0x480] sm:$0xff]  ;;  %v493_v35 = vld [vmem:[#allocation3 + $0x490] sm:$0xff] }
  0x9e   :  { %2335 = vmatpush1.bf16.msra.mxu0 %v2334_v44  ;;  %v133_v44 = vld [vmem:[#allocation3 + $0x1e0] sm:$0xff] }
  0x9f   :  { %2337 = vmatprep.subr.bf16.mxu0 %v2336_v52  ;;  %v2358_v52 = vpack.c.bf16 %v135_v45, %v133_v44  ;;  %v495_v45 = vld [vmem:[#allocation3 + $0x4a0] sm:$0xff] }
  0xa2   :  { %2339 = vmatpush1.bf16.msra.mxu0 %v2338_v62  ;;  %v65_v62 = vld [vmem:[%s3742_s0] sm:$0xff] }
  0xa3   :  { %2341 = vmatprep.subr.bf16.mxu0 %v2340_v4  ;;  %v481_v4 = vld [vmem:[#allocation3 + $0x430] sm:$0xff] }
  0xa4   :  { %v2366_v8 = vpack.c.bf16 %v481_v4, %v479_v3  ;;  %v503_v3 = vld [vmem:[#allocation3 + $0x4e0] sm:$0xff]  ;;  %v505_v4 = vld [vmem:[#allocation3 + $0x4f0] sm:$0xff] }
  0xa6   :  { %2343 = vmatpush1.bf16.msra.mxu0 %v2342_v12  ;;  %v485_v12 = vld [vmem:[#allocation3 + $0x450] sm:$0xff] }
  0xa7   :  { %2345 = vmatprep.subr.bf16.mxu0 %v2344_v17  ;;  %v490_v17 = vld [vmem:[#allocation3 + $0x478] sm:$0xff]  ;;  %v2370_v20 = vpack.c.bf16 %v485_v12, %v483_v10  ;;  %v507_v10 = vld [vmem:[#allocation3 + $0x500] sm:$0xff]  ;;  %v509_v12 = vld [vmem:[#allocation3 + $0x510] sm:$0xff] }
  0xa8   :  { %v2372_v22 = vpack.c.bf16 %v490_v17, %v488_v15  ;;  %v514_v15 = vld [vmem:[#allocation3 + $0x538] sm:$0xff]  ;;  %v2394_v17 = vpack.c.bf16 %v509_v12, %v507_v10  ;;  %v535_v12 = vld [vmem:[#allocation3 + $0x5e0] sm:$0xff] }
  0xaa   :  { %2347 = vmatpush1.bf16.msra.mxu0 %v2346_v24  ;;  %v487_v24 = vld [vmem:[#allocation3 + $0x460] sm:$0xff] }
  0xab   :  { %2349 = vmatprep.subr.bf16.mxu0 %v2348_v25  ;;  %v489_v25 = vld [vmem:[#allocation3 + $0x470] sm:$0xff] }
  0xae   :  { %2351 = vmatpush1.bf16.msra.mxu0 %v2350_v32  ;;  %v2374_v32 = vpack.c.bf16 %v489_v25, %v487_v24  ;;  %v518_v24 = vld [vmem:[#allocation3 + $0x558] sm:$0xff] }
  0xaf   :  { %2353 = vmatprep.subr.bf16.mxu0 %v2352_v33  ;;  %v2376_v33 = vpack.c.bf16 %v494_v30, %v492_v29  ;;  %v515_v29 = vld [vmem:[#allocation3 + $0x540] sm:$0xff]  ;;  %v517_v30 = vld [vmem:[#allocation3 + $0x550] sm:$0xff] }
  0xb2   :  { %2355 = vmatpush1.bf16.msra.mxu0 %v2354_v39  ;;  %v498_v39 = vld [vmem:[#allocation3 + $0x4b8] sm:$0xff] }
  0xb3   :  { %2357 = vmatprep.subr.bf16.mxu0 %v2356_v42  ;;  %v2378_v42 = vpack.c.bf16 %v493_v35, %v491_v34  ;;  %v2380_v44 = vpack.c.bf16 %v498_v39, %v496_v38  ;;  %v2402_v34 = vpack.c.bf16 %v517_v30, %v515_v29  ;;  %v521_v38 = vld [vmem:[#allocation3 + $0x570] sm:$0xff]  ;;  %v524_v39 = vld [vmem:[#allocation3 + $0x588] sm:$0xff] }
  0xb6   :  { %2359 = vmatpush1.bf16.msra.mxu0 %v2358_v52  ;;  %v502_v52 = vld [vmem:[#allocation3 + $0x4d8] sm:$0xff] }
  0xb7   :  { %2361 = vmatprep.subr.bf16.mxu0 %v2360_v54  ;;  %v2382_v54 = vpack.c.bf16 %v497_v50, %v495_v45  ;;  %v2384_v55 = vpack.c.bf16 %v502_v52, %v500_v51  ;;  %v523_v50 = vld [vmem:[#allocation3 + $0x580] sm:$0xff]  ;;  %v525_v51 = vld [vmem:[#allocation3 + $0x590] sm:$0xff]  ;;  %v528_v52 = vld [vmem:[#allocation3 + $0x5a8] sm:$0xff] }
  0xb9   :  { %405 = vmatmul.mubr.f32.vlgmr.msra.gmra.mrb[0].mxu0 %v65_v62  ;;  %v506_v62 = vld [vmem:[#allocation3 + $0x4f8] sm:$0xff] }
  0xba   :  { %2363 = vmatpush1.bf16.msra.mxu0 %v2362_v63  ;;  %410 = vmatprep.mubr.f32.mxu0 %v3112_v41  ;;  %v2386_v63 = vpack.c.bf16 %v501_v58, %v499_v57  ;;  %v527_v58 = vld [vmem:[#allocation3 + $0x5a0] sm:$0xff]  ;;  %v457_v41 = vrot.slane %v3152_v0, 2 }
  0xbb   :  { %2365 = vmatprep.subr.bf16.mxu0 %v2364_v2  ;;  %v2388_v2 = vpack.c.bf16 %v506_v62, %v504_v60  ;;  %v529_v60 = vld [vmem:[#allocation3 + $0x5b0] sm:$0xff]  ;;  %v532_v62 = vld [vmem:[#allocation3 + $0x5c8] sm:$0xff] }
  0xbd   :  { %411 = vmatmul.mubr.f32.gmra.mrb[2].mxu0 %v3124_v36 }
  0xbe   :  { %2367 = vmatpush1.bf16.msra.mxu0 %v2366_v8  ;;  %416 = vmatprep.mubr.f32.mxu0 %v70_v14  ;;  %v2390_v8 = vpack.c.bf16 %v505_v4, %v503_v3  ;;  %v512_v14 = vld [vmem:[#allocation3 + $0x528] sm:$0xff]  ;;  %v531_v4 = vld [vmem:[#allocation3 + $0x5c0] sm:$0xff] }
  0xbf   :  { %2369 = vmatprep.subr.bf16.mxu0 %v2368_v9  ;;  %v2392_v9 = vpack.c.bf16 %v510_v6, %v508_v5  ;;  %v2396_v18 = vpack.c.bf16 %v514_v15, %v512_v14  ;;  %v533_v5 = vld [vmem:[#allocation3 + $0x5d0] sm:$0xff]  ;;  %v536_v6 = vld [vmem:[#allocation3 + $0x5e8] sm:$0xff]  ;;  %v429_v15 = vld [vmem:[%s3742_s0] sm:$0xfc] }
  0xc0   :  { %v537_v14 = vld [vmem:[#allocation3 + $0x5f0] sm:$0xff] }
  0xc1   :  { %417 = vmatmul.mubr.f32.gmra.mrb[4].mxu0 %v69_v21  ;;  %v513_v21 = vld [vmem:[#allocation3 + $0x530] sm:$0xff] }
  0xc2   :  { %2371 = vmatpush1.bf16.msra.mxu0 %v2370_v20  ;;  %422 = vmatprep.mubr.f32.mxu0 %v3139_v53  ;;  %v511_v20 = vld [vmem:[#allocation3 + $0x520] sm:$0xff] }
  0xc3   :  { %2373 = vmatprep.subr.bf16.mxu0 %v2372_v22  ;;  %v516_v22 = vld [vmem:[#allocation3 + $0x548] sm:$0xff]  ;;  %v2398_v25 = vpack.c.bf16 %v513_v21, %v511_v20  ;;  %v446_v20 = vrot.slane %v429_v15, 2  ;;  %v447_v21 = vrot.slane %v3124_v36, 2  ;;  %v460_v36 = vrot.slane %v3139_v53, 2  ;;  %v435_v53 = vld [vmem:[%s3742_s0 + $0x50] sm:$0x3] }
  0xc4   :  { %v2400_v26 = vpack.c.bf16 %v518_v24, %v516_v22  ;;  %v431_v24 = vld [vmem:[%s3742_s0 + $0x20] sm:$0x3] }
  0xc5   :  { %423 = vmatmul.mubr.f32.gmra.mrb[6].mxu0 %v3152_v0  ;;  %v452_v29 = vrot.slane %v431_v24, 2  ;;  %v737_v0 = vld [vmem:[#allocation8 + $0x128] sm:$0xff]  ;;  %v748_v15 = vld [vmem:[#allocation8 + $0x180] sm:$0xff] }
  0xc6   :  { %2375 = vmatpush1.bf16.msra.mxu0 %v2374_v32  ;;  %603 = vmatprep.mubr.f32.mxu0 %v451_v37  ;;  %v520_v32 = vld [vmem:[#allocation3 + $0x568] sm:$0xff]  ;;  %v519_v37 = vld [vmem:[#allocation3 + $0x560] sm:$0xff] }
  0xc7   :  { %2377 = vmatprep.subr.bf16.mxu0 %v2376_v33  ;;  %v522_v33 = vld [vmem:[#allocation3 + $0x578] sm:$0xff]  ;;  %v752_v24 = vld [vmem:[#allocation8 + $0x1a0] sm:$0xff] }
  0xc8   :  { %v2404_v35 = vpack.c.bf16 %v522_v33, %v520_v32  ;;  %v433_v33 = vld [vmem:[%s3742_s0 + $0x30] sm:$0xfc] }
  0xca   :  { %2379 = vmatpush1.bf16.msra.mxu0 %v2378_v42  ;;  %v526_v42 = vld [vmem:[#allocation3 + $0x598] sm:$0xff] }
  0xcb   :  { %2381 = vmatprep.subr.bf16.mxu0 %v2380_v44  ;;  %v2406_v44 = vpack.c.bf16 %v521_v38, %v519_v37  ;;  %v2408_v45 = vpack.c.bf16 %v526_v42, %v524_v39  ;;  %v456_v37 = vrot.slane %v433_v33, 2  ;;  %v462_v42 = vrot.slane %v435_v53, 2  ;;  %v758_v33 = vld [vmem:[#allocation8 + $0x1d0] sm:$0xff] }
  0xcd   :  { %v458_v39 = vsel %vm445_vm1, %v456_v37, %v457_v41  ;;  %v763_v37 = vld [vmem:[#allocation8 + $0x1f8] sm:$0xff] }
  0xce   :  { %2383 = vmatpush1.bf16.msra.mxu0 %v2382_v54  ;;  %v530_v54 = vld [vmem:[#allocation3 + $0x5b8] sm:$0xff] }
  0xcf   :  { %2385 = vmatprep.subr.bf16.mxu0 %v2384_v55  ;;  %v2410_v55 = vpack.c.bf16 %v525_v51, %v523_v50  ;;  %v2412_v57 = vpack.c.bf16 %v530_v54, %v528_v52  ;;  %v739_v50 = vld [vmem:[#allocation8 + $0x138] sm:$0xff]  ;;  %v736_v52 = vld [vmem:[#allocation8 + $0x120] sm:$0xff]  ;;  %v738_v54 = vld [vmem:[#allocation8 + $0x130] sm:$0xff] }
  0xd0   :  { %v3279_v51 = vpack.c.bf16 %v739_v50, %v737_v0 }
  0xd2   :  { %2387 = vmatpush1.bf16.msra.mxu0 %v2386_v63  ;;  %v534_v63 = vld [vmem:[#allocation3 + $0x5d8] sm:$0xff]  ;;  %2461 = vmatprep.subr.bf16.mxu1 %v3279_v51 }
  0xd3   :  { %2389 = vmatprep.subr.bf16.mxu0 %v2388_v2  ;;  %v2414_v2 = vpack.c.bf16 %v529_v60, %v527_v58  ;;  %v2416_v3 = vpack.c.bf16 %v534_v63, %v532_v62  ;;  %v743_v58 = vld [vmem:[#allocation8 + $0x158] sm:$0xff]  ;;  %v740_v62 = vld [vmem:[#allocation8 + $0x140] sm:$0xff]  ;;  %v742_v63 = vld [vmem:[#allocation8 + $0x150] sm:$0xff] }
  0xd6   :  { %2391 = vmatpush1.bf16.msra.mxu0 %v2390_v8  ;;  %v538_v8 = vld [vmem:[#allocation3 + $0x5f8] sm:$0xff] }
  0xd7   :  { %2393 = vmatprep.subr.bf16.mxu0 %v2392_v9  ;;  %v2418_v9 = vpack.c.bf16 %v533_v5, %v531_v4  ;;  %v2420_v10 = vpack.c.bf16 %v538_v8, %v536_v6  ;;  %v747_v4 = vld [vmem:[#allocation8 + $0x178] sm:$0xff]  ;;  %v744_v6 = vld [vmem:[#allocation8 + $0x160] sm:$0xff]  ;;  %v746_v8 = vld [vmem:[#allocation8 + $0x170] sm:$0xff] }
  0xda   :  { %2395 = vmatpush1.bf16.msra.mxu0 %v2394_v17  ;;  %v432_v17 = vld [vmem:[%s3742_s0 + $0x28] sm:$0x3] }
  0xdb   :  { %2397 = vmatprep.subr.bf16.mxu0 %v2396_v18  ;;  %v2422_v18 = vpack.c.bf16 %v537_v14, %v535_v12  ;;  %v454_v22 = vrot.slane %v432_v17, 2  ;;  %v751_v12 = vld [vmem:[#allocation8 + $0x198] sm:$0xff]  ;;  %v750_v17 = vld [vmem:[#allocation8 + $0x190] sm:$0xff] }
  0xdd   :  { %v455_v30 = vsel %vm445_vm1, %v450_v27, %v454_v22 }
  0xde   :  { %2399 = vmatpush1.bf16.msra.mxu0 %v2398_v25  ;;  %v434_v25 = vld [vmem:[%s3742_s0 + $0x38] sm:$0xfc] }
  0xdf   :  { %2401 = vmatprep.subr.bf16.mxu0 %v2400_v26  ;;  %v448_v26 = vsel %vm445_vm1, %v446_v20, %v447_v21  ;;  %v459_v32 = vrot.slane %v434_v25, 2  ;;  %v753_v20 = vld [vmem:[#allocation8 + $0x1a8] sm:$0xff]  ;;  %v754_v25 = vld [vmem:[#allocation8 + $0x1b0] sm:$0xff] }
  0xe1   :  { %v461_v27 = vsel %vm445_vm1, %v459_v32, %v460_v36 }
  0xe2   :  { %2403 = vmatpush1.bf16.msra.mxu0 %v2402_v34  ;;  %v436_v34 = vld [vmem:[%s3742_s0 + $0x58] sm:$0x3] }
  0xe3   :  { %2405 = vmatprep.subr.bf16.mxu0 %v2404_v35  ;;  %v453_v35 = vsel %vm445_vm1, %v447_v21, %v452_v29  ;;  %v464_v38 = vrot.slane %v436_v34, 2  ;;  %v755_v21 = vld [vmem:[#allocation8 + $0x1b8] sm:$0xff]  ;;  %v757_v29 = vld [vmem:[#allocation8 + $0x1c8] sm:$0xff] }
  0xe4   :  { %v3303_v22 = vpack.c.bf16 %v755_v21, %v753_v20 }
  0xe6   :  { %2407 = vmatpush1.bf16.msra.mxu0 %v2406_v44  ;;  %v465_v44 = vsel %vm445_vm1, %v460_v36, %v464_v38  ;;  %v756_v36 = vld [vmem:[#allocation8 + $0x1c0] sm:$0xff]  ;;  %v762_v38 = vld [vmem:[#allocation8 + $0x1f0] sm:$0xff] }
  0xe7   :  { %2409 = vmatprep.subr.bf16.mxu0 %v2408_v45  ;;  %v463_v45 = vsel %vm445_vm1, %v457_v41, %v462_v42  ;;  %v3311_v34 = vpack.c.bf16 %v758_v33, %v756_v36 }
  0xea   :  { %2411 = vmatpush1.bf16.msra.mxu0 %v2410_v55  ;;  %v3281_v55 = vpack.c.bf16 %v738_v54, %v736_v52 }
  0xeb   :  { %2413 = vmatprep.subr.bf16.mxu0 %v2412_v57  ;;  %v741_v57 = vld [vmem:[#allocation8 + $0x148] sm:$0xff] }
  0xec   :  { %2463 = vmatpush1.bf16.msra.mxu1 %v3281_v55  ;;  %v3285_v60 = vpack.c.bf16 %v743_v58, %v741_v57 }
  0xee   :  { %2415 = vmatpush1.bf16.msra.mxu0 %v2414_v2  ;;  %v3287_v2 = vpack.c.bf16 %v742_v63, %v740_v62  ;;  %2465 = vmatprep.subr.bf16.mxu1 %v3285_v60 }
  0xef   :  { %2417 = vmatprep.subr.bf16.mxu0 %v2416_v3  ;;  %v745_v3 = vld [vmem:[#allocation8 + $0x168] sm:$0xff] }
  0xf0   :  { %2467 = vmatpush1.bf16.msra.mxu1 %v3287_v2  ;;  %v3291_v5 = vpack.c.bf16 %v747_v4, %v745_v3 }
  0xf2   :  { %2419 = vmatpush1.bf16.msra.mxu0 %v2418_v9  ;;  %v3293_v9 = vpack.c.bf16 %v746_v8, %v744_v6  ;;  %2469 = vmatprep.subr.bf16.mxu1 %v3291_v5 }
  0xf3   :  { %2421 = vmatprep.subr.bf16.mxu0 %v2420_v10  ;;  %v749_v10 = vld [vmem:[#allocation8 + $0x188] sm:$0xff] }
  0xf4   :  { %2471 = vmatpush1.bf16.msra.mxu1 %v3293_v9  ;;  %v3297_v14 = vpack.c.bf16 %v751_v12, %v749_v10 }
  0xf6   :  { %2423 = vmatpush1.bf16.msra.mxu0 %v2422_v18  ;;  %v3299_v18 = vpack.c.bf16 %v750_v17, %v748_v15  ;;  %2473 = vmatprep.subr.bf16.mxu1 %v3297_v14 }
  0xf8   :  { %2475 = vmatpush1.bf16.msra.mxu1 %v3299_v18 }
  0xf9   :  { %604 = vmatmul.mubr.f32.vlgmr.msra.gmra.mrb[0].mxu0 %v448_v26  ;;  %v3305_v26 = vpack.c.bf16 %v754_v25, %v752_v24  ;;  %2477 = vmatprep.subr.bf16.mxu1 %v3303_v22 }
  0xfa   :  { %609 = vmatprep.mubr.f32.mxu0 %v455_v30  ;;  %v759_v30 = vld [vmem:[#allocation8 + $0x1d8] sm:$0xff] }
  0xfb   :  { %v3309_v32 = vpack.c.bf16 %v759_v30, %v757_v29 }
  0xfc   :  { %2479 = vmatpush1.bf16.msra.mxu1 %v3305_v26 }
  0xfd   :  { %610 = vmatmul.mubr.f32.gmra.mrb[2].mxu0 %v453_v35  ;;  %2481 = vmatprep.subr.bf16.mxu1 %v3309_v32  ;;  %v761_v35 = vld [vmem:[#allocation8 + $0x1e8] sm:$0xff] }
  0xfe   :  { %615 = vmatprep.mubr.f32.mxu0 %v461_v27  ;;  %v3315_v41 = vpack.c.bf16 %v763_v37, %v761_v35  ;;  %v760_v27 = vld [vmem:[#allocation8 + $0x1e0] sm:$0xff] }
  0xff   :  { %v3317_v53 = vpack.c.bf16 %v762_v38, %v760_v27 }
 0x100   :  { %2483 = vmatpush1.bf16.msra.mxu1 %v3311_v34  ;;  %3775 = vst [vmem:[#allocation13_spill] sm:$0xff] %v3315_v41 }
 0x101   :  { %616 = vmatmul.mubr.f32.gmra.mrb[4].mxu0 %v458_v39  ;;  %3776 = vst [vmem:[#allocation14_spill] sm:$0xff] %v3317_v53  ;;  %2485 = vmatprep.subr.bf16.mxu1 %v3315_v41 }
 0x102   :  { %621 = vmatprep.mubr.f32.mxu0 %v465_v44 }
 0x104   :  { %2487 = vmatpush1.bf16.msra.mxu1 %v3317_v53 }
 0x105   :  { %622 = vmatmul.mubr.f32.gmra.mrb[6].mxu0 %v463_v45  ;;  %2489 = vmatprep.subr.bf16.mxu1 %v3172_v40 }
 0x1cc   :  { %v3322_v39 = vpop.f32.mrb[0].mxu0 }
 0x1cd   :  { %3777 = vst [vmem:[#allocation15_spill] sm:$0xff] %v3322_v39  ;;  %v3324_v42 = vpop.f32.mrb[1].mxu0  ;;  %v664_v45 = vmul.f32 %v3322_v39, %v3322_v39 }
 0x1ce   :  { %3778 = vst [vmem:[#allocation16_spill] sm:$0xff] %v3324_v42  ;;  %v665_v40 = vmul.f32 %v3324_v42, %v3324_v42 }
 0x1d0   :  { %v3326_v44 = vpop.f32.mrb[2].mxu0 }
 0x1d1   :  { %3779 = vst [vmem:[#allocation17_spill] sm:$0xff] %v3326_v44  ;;  %v636_v0 = vadd.f32 %v3326_v44, %v3322_v39  ;;  %v666_v50 = vmul.f32 %v3326_v44, %v3326_v44  ;;  %v3334_v52 = vpop.f32.mrb[3].mxu0 }
 0x1d2   :  { %3780 = vst [vmem:[#allocation18_spill] sm:$0xff] %v3334_v52  ;;  %v643_v54 = vadd.f32 %v3334_v52, %v3324_v42  ;;  %v667_v57 = vmul.f32 %v3334_v52, %v3334_v52 }
 0x1d3   :  { %v637_v58 = vrot.slane %v636_v0, 4  ;;  %v672_v62 = vadd.f32 %v666_v50, %v664_v45 }
 0x1d4   :  { %v644_v63 = vrot.slane %v643_v54, 4  ;;  %v679_v3 = vadd.f32 %v667_v57, %v665_v40  ;;  %v3342_v4 = vpop.f32.mrb[4].mxu0 }
 0x1d5   :  { %3781 = vst [vmem:[#allocation19_spill] sm:$0xff] %v3342_v4  ;;  %v638_v6 = vadd.f32 %v637_v58, %v636_v0  ;;  %v673_v8 = vrot.slane %v672_v62, 4  ;;  %v3344_v10 = vpop.f32.mrb[5].mxu0  ;;  %v668_v25 = vmul.f32 %v3342_v4, %v3342_v4 }
 0x1d6   :  { %3782 = vst [vmem:[#allocation20_spill] sm:$0xff] %v3344_v10  ;;  %v645_v12 = vadd.f32 %v644_v63, %v643_v54  ;;  %v680_v15 = vrot.slane %v679_v3, 4  ;;  %v669_v35 = vmul.f32 %v3344_v10, %v3344_v10 }
 0x1d7   :  { %v674_v17 = vadd.f32 %v673_v8, %v672_v62  ;;  %v639_v24 = vrot.slane %v638_v6, 2 }
 0x1d8   :  { %v681_v20 = vadd.f32 %v680_v15, %v679_v3  ;;  %v3346_v21 = vpop.f32.mrb[6].mxu0  ;;  %v646_v33 = vrot.slane %v645_v12, 2 }
 0x1d9   :  { %3783 = vst [vmem:[#allocation21_spill] sm:$0xff] %v3346_v21  ;;  %v650_v29 = vadd.f32 %v3346_v21, %v3342_v4  ;;  %v670_v30 = vmul.f32 %v3346_v21, %v3346_v21  ;;  %v3354_v36 = vpop.f32.mrb[7].mxu0  ;;  %v675_v38 = vrot.slane %v674_v17, 2  ;;  %v640_v57 = vadd.f32 %v639_v24, %v638_v6 }
 0x1da   :  { %3784 = vst [vmem:[#allocation22_spill] sm:$0xff] %v3354_v36  ;;  %v657_v37 = vadd.f32 %v3354_v36, %v3344_v10  ;;  %v671_v27 = vmul.f32 %v3354_v36, %v3354_v36  ;;  %v682_v50 = vrot.slane %v681_v20, 2  ;;  %v647_v8 = vadd.f32 %v646_v33, %v645_v12 }
 0x1db   :  { %v651_v45 = vrot.slane %v650_v29, 4  ;;  %v686_v0 = vadd.f32 %v670_v30, %v668_v25  ;;  %v676_v15 = vadd.f32 %v675_v38, %v674_v17  ;;  %v641_v39 = vrot.slane %v640_v57, 1 }
 0x1dc   :  { %v658_v40 = vrot.slane %v657_v37, 4  ;;  %v693_v54 = vadd.f32 %v671_v27, %v669_v35  ;;  %v683_v44 = vadd.f32 %v682_v50, %v681_v20  ;;  %v648_v25 = vrot.slane %v647_v8, 1 }
 0x1dd   :  { %v652_v58 = vadd.f32 %v651_v45, %v650_v29  ;;  %v687_v62 = vrot.slane %v686_v0, 4  ;;  %v677_v6 = vrot.slane %v676_v15, 1  ;;  %v642_v12 = vadd.f32 %v641_v39, %v640_v57  ;;  %v1275_v39 = vld [vmem:[#allocation6 + $0x290] sm:$0xff] }
 0x1de   :  { %v659_v63 = vadd.f32 %v658_v40, %v657_v37  ;;  %v694_v3 = vrot.slane %v693_v54, 4  ;;  %v684_v29 = vrot.slane %v683_v44, 1  ;;  %v649_v27 = vadd.f32 %v648_v25, %v647_v8  ;;  %v1279_v57 = vld [vmem:[#allocation6 + $0x2b0] sm:$0xff]  ;;  %v1281_v8 = vld [vmem:[#allocation6 + $0x2c0] sm:$0xff] }
 0x1df   :  { %v653_v21 = vrot.slane %v652_v58, 2  ;;  %v688_v4 = vadd.f32 %v687_v62, %v686_v0  ;;  %v1282_v62 = vld [vmem:[#allocation6 + $0x2c8] sm:$0xff] }
 0x1e0   :  { %v660_v52 = vrot.slane %v659_v63, 2  ;;  %v695_v10 = vadd.f32 %v694_v3, %v693_v54  ;;  %v1277_v54 = vld [vmem:[#allocation6 + $0x2a0] sm:$0xff] }
 0x1e1   :  { %v654_v42 = vadd.f32 %v653_v21, %v652_v58  ;;  %v689_v36 = vrot.slane %v688_v4, 2  ;;  %v678_v21 = vadd.f32 %v677_v6, %v676_v15  ;;  %v2574_v58 = vpack.c.bf16 %v1279_v57, %v1277_v54  ;;  %v1283_v15 = vld [vmem:[#allocation6 + $0x2d0] sm:$0xff]  ;;  %v1145_v57 = vld [vmem:[#allocation6 + $0x8] sm:$0xff] }
 0x1e2   :  { %v696_v53 = vrot.slane %v695_v10, 2  ;;  %v661_v30 = vadd.f32 %v660_v52, %v659_v63  ;;  %v685_v52 = vadd.f32 %v684_v29, %v683_v44  ;;  %v1278_v44 = vld [vmem:[#allocation6 + $0x2a8] sm:$0xff]  ;;  %v1284_v63 = vld [vmem:[#allocation6 + $0x2d8] sm:$0xff]  ;;  %v2578_v25 = vpack.c.bf16 %v1283_v15, %v1281_v8  ;;  %v1287_v29 = vld [vmem:[#allocation6 + $0x2f0] sm:$0xff] }
 0x1e3   :  { %v690_v41 = vadd.f32 %v689_v36, %v688_v4  ;;  %v655_v35 = vrot.slane %v654_v42, 1  ;;  %v2576_v3 = vpack.c.bf16 %v1284_v63, %v1282_v62 }
 0x1e4   :  { %v662_v24 = vrot.slane %v661_v30, 1  ;;  %v697_v37 = vadd.f32 %v696_v53, %v695_v10  ;;  %v1280_v10 = vld [vmem:[#allocation6 + $0x2b8] sm:$0xff] }
 0x1e5   :  { %v656_v17 = vadd.f32 %v655_v35, %v654_v42  ;;  %v691_v33 = vrot.slane %v690_v41, 1  ;;  %v2572_v40 = vpack.c.bf16 %v1280_v10, %v1278_v44  ;;  %v1288_v35 = vld [vmem:[#allocation6 + $0x2f8] sm:$0xff]  ;;  %v1317_v44 = vld [vmem:[#allocation6 + $0x3e0] sm:$0xff] }
 0x1e6   :  { %v663_v38 = vadd.f32 %v662_v24, %v661_v30  ;;  %v698_v45 = vrot.slane %v697_v37, 1  ;;  %v1286_v30 = vld [vmem:[#allocation6 + $0x2e8] sm:$0xff]  ;;  %v1285_v24 = vld [vmem:[#allocation6 + $0x2e0] sm:$0xff] }
 0x1e7   :  { %v769_v20 = vsel %vm768_vm2, %v656_v17, %v642_v12  ;;  %v692_v0 = vadd.f32 %v691_v33, %v690_v41  ;;  %v1273_v41 = vld [vmem:[#allocation6 + $0x280] sm:$0xff]  ;;  %v2580_v6 = vpack.c.bf16 %v1288_v35, %v1286_v30  ;;  %v1290_v12 = vld [vmem:[#allocation6 + $0x308] sm:$0xff]  ;;  %v1292_v17 = vld [vmem:[#allocation6 + $0x318] sm:$0xff] }
 0x1e8   :  { %v770_v50 = vsel %vm768_vm2, %v663_v38, %v649_v27  ;;  %v699_v4 = vadd.f32 %v698_v45, %v697_v37  ;;  %v2570_v42 = vpack.c.bf16 %v1275_v39, %v1273_v41  ;;  %v2582_v37 = vpack.c.bf16 %v1287_v29, %v1285_v24  ;;  %v1289_v27 = vld [vmem:[#allocation6 + $0x300] sm:$0xff]  ;;  %v1291_v38 = vld [vmem:[#allocation6 + $0x310] sm:$0xff]  ;;  %v1318_v39 = vld [vmem:[#allocation6 + $0x3e8] sm:$0xff] }
 0x1e9   :  { %837 = vmatprep.mubr.f32.mxu1 %v770_v50  ;;  %v848_v36 = vsel %vm768_vm2, %v692_v0, %v678_v21  ;;  %v2584_v33 = vpack.c.bf16 %v1292_v17, %v1290_v12  ;;  %v2586_v45 = vpack.c.bf16 %v1291_v38, %v1289_v27  ;;  %v1296_v21 = vld [vmem:[#allocation6 + $0x338] sm:$0xff]  ;;  %v1293_v50 = vld [vmem:[#allocation6 + $0x320] sm:$0xff]  ;;  %v3020_v27 = vmov 1966171168  }
 0x1ea   :  { %838 = vmatmul.mubr.f32.vlgmr.msra.gmra.mrb[0].mxu1 %v769_v20  ;;  %v849_v53 = vsel %vm768_vm2, %v699_v4, %v685_v52  ;;  %v1294_v20 = vld [vmem:[#allocation6 + $0x328] sm:$0xff]  ;;  %v1295_v52 = vld [vmem:[#allocation6 + $0x330] sm:$0xff]  ;;  %v931_v17 = vld [vmem:[%s3746_s4] ss:$2 sm:$0x3]  ;;  %v966_v38 = vunpack.c.l.s4 %v3020_v27 }
 0x1eb   :  { %2491 = vmatpush1.bf16.msra.mxu1 %v3174_v47  ;;  %916 = vmatprep.mubr.f32.mxu1 %v849_v53  ;;  %v3785_v47 = vld [vmem:[#allocation13_spill] sm:$0xff]  ;;  %v2588_v0 = vpack.c.bf16 %v1296_v21, %v1294_v20  ;;  %v2590_v4 = vpack.c.bf16 %v1295_v52, %v1293_v50  ;;  %v1300_v53 = vld [vmem:[#allocation6 + $0x358] sm:$0xff] }
 0x1ec   :  { %2493 = vmatprep.subr.bf16.mxu1 %v3176_v48  ;;  %v3786_v48 = vld [vmem:[#allocation14_spill] sm:$0xff]  ;;  %v2230_v20 = vld [vmem:[%s3746_s4 + $0x1] ss:$2 sm:$0x3] }
 0x1ef   :  { %2495 = vmatpush1.bf16.msra.mxu1 %v3180_v56  ;;  %v1258_v56 = vld [vmem:[#allocation6 + $0x208] sm:$0xff] }
 0x1f0   :  { %2497 = vmatprep.subr.bf16.mxu1 %v3183_v59  ;;  %v1260_v59 = vld [vmem:[#allocation6 + $0x218] sm:$0xff] }
 0x1f3   :  { %2499 = vmatpush1.bf16.msra.mxu1 %v3186_v46  ;;  %v1257_v46 = vld [vmem:[#allocation6 + $0x200] sm:$0xff] }
 0x1f4   :  { %2501 = vmatprep.subr.bf16.mxu1 %v3189_v7  ;;  %v2552_v7 = vpack.c.bf16 %v1260_v59, %v1258_v56  ;;  %v1299_v56 = vld [vmem:[#allocation6 + $0x350] sm:$0xff] }
 0x1f7   :  { %2503 = vmatpush1.bf16.msra.mxu1 %v3192_v16  ;;  %v1259_v16 = vld [vmem:[#allocation6 + $0x210] sm:$0xff] }
 0x1f8   :  { %2505 = vmatprep.subr.bf16.mxu1 %v3195_v19  ;;  %v1262_v19 = vld [vmem:[#allocation6 + $0x228] sm:$0xff] }
 0x1fb   :  { %2507 = vmatpush1.bf16.msra.mxu1 %v3198_v28  ;;  %v1264_v28 = vld [vmem:[#allocation6 + $0x238] sm:$0xff] }
 0x1fc   :  { %2509 = vmatprep.subr.bf16.mxu1 %v3201_v31  ;;  %v2554_v31 = vpack.c.bf16 %v1259_v16, %v1257_v46  ;;  %v1302_v46 = vld [vmem:[#allocation6 + $0x368] sm:$0xff] }
 0x1ff   :  { %2511 = vmatpush1.bf16.msra.mxu1 %v3204_v43  ;;  %v2556_v43 = vpack.c.bf16 %v1264_v28, %v1262_v19  ;;  %v1301_v19 = vld [vmem:[#allocation6 + $0x360] sm:$0xff]  ;;  %v1303_v28 = vld [vmem:[#allocation6 + $0x370] sm:$0xff] }
 0x200   :  { %2513 = vmatprep.subr.bf16.mxu1 %v3207_v49  ;;  %v1261_v49 = vld [vmem:[#allocation6 + $0x220] sm:$0xff] }
 0x203   :  { %2515 = vmatpush1.bf16.msra.mxu1 %v3210_v61  ;;  %v1263_v61 = vld [vmem:[#allocation6 + $0x230] sm:$0xff] }
 0x204   :  { %2517 = vmatprep.subr.bf16.mxu1 %v3213_v1  ;;  %v1266_v1 = vld [vmem:[#allocation6 + $0x248] sm:$0xff] }
 0x207   :  { %2519 = vmatpush1.bf16.msra.mxu1 %v3216_v11  ;;  %v1268_v11 = vld [vmem:[#allocation6 + $0x258] sm:$0xff] }
 0x208   :  { %2521 = vmatprep.subr.bf16.mxu1 %v3219_v13  ;;  %v2558_v13 = vpack.c.bf16 %v1263_v61, %v1261_v49  ;;  %v1308_v49 = vld [vmem:[#allocation6 + $0x398] sm:$0xff] }
 0x20b   :  { %2523 = vmatpush1.bf16.msra.mxu1 %v3222_v23  ;;  %v2560_v23 = vpack.c.bf16 %v1268_v11, %v1266_v1  ;;  %v1305_v1 = vld [vmem:[#allocation6 + $0x380] sm:$0xff]  ;;  %v1307_v11 = vld [vmem:[#allocation6 + $0x390] sm:$0xff] }
 0x20c   :  { %2525 = vmatprep.subr.bf16.mxu1 %v3279_v51  ;;  %v1265_v51 = vld [vmem:[#allocation6 + $0x240] sm:$0xff] }
 0x20f   :  { %2527 = vmatpush1.bf16.msra.mxu1 %v3281_v55  ;;  %v1267_v55 = vld [vmem:[#allocation6 + $0x250] sm:$0xff] }
 0x210   :  { %2529 = vmatprep.subr.bf16.mxu1 %v3285_v60  ;;  %v1270_v60 = vld [vmem:[#allocation6 + $0x268] sm:$0xff] }
 0x213   :  { %2531 = vmatpush1.bf16.msra.mxu1 %v3287_v2  ;;  %v1272_v2 = vld [vmem:[#allocation6 + $0x278] sm:$0xff] }
 0x214   :  { %2533 = vmatprep.subr.bf16.mxu1 %v3291_v5  ;;  %v2562_v5 = vpack.c.bf16 %v1267_v55, %v1265_v51  ;;  %v1312_v51 = vld [vmem:[#allocation6 + $0x3b8] sm:$0xff] }
 0x217   :  { %2535 = vmatpush1.bf16.msra.mxu1 %v3293_v9  ;;  %v2564_v9 = vpack.c.bf16 %v1272_v2, %v1270_v60  ;;  %v1309_v60 = vld [vmem:[#allocation6 + $0x3a0] sm:$0xff]  ;;  %v1311_v2 = vld [vmem:[#allocation6 + $0x3b0] sm:$0xff] }
 0x218   :  { %2537 = vmatprep.subr.bf16.mxu1 %v3297_v14  ;;  %v1269_v14 = vld [vmem:[#allocation6 + $0x260] sm:$0xff] }
 0x21b   :  { %2539 = vmatpush1.bf16.msra.mxu1 %v3299_v18  ;;  %v1271_v18 = vld [vmem:[#allocation6 + $0x270] sm:$0xff] }
 0x21c   :  { %2541 = vmatprep.subr.bf16.mxu1 %v3303_v22  ;;  %v2566_v22 = vpack.c.bf16 %v1271_v18, %v1269_v14  ;;  %v1314_v14 = vld [vmem:[#allocation6 + $0x3c8] sm:$0xff]  ;;  %v1316_v18 = vld [vmem:[#allocation6 + $0x3d8] sm:$0xff] }
 0x21f   :  { %2543 = vmatpush1.bf16.msra.mxu1 %v3305_v26  ;;  %v1274_v26 = vld [vmem:[#allocation6 + $0x288] sm:$0xff] }
 0x220   :  { %2545 = vmatprep.subr.bf16.mxu1 %v3309_v32  ;;  %v1276_v32 = vld [vmem:[#allocation6 + $0x298] sm:$0xff] }
 0x223   :  { %2547 = vmatpush1.bf16.msra.mxu1 %v3311_v34  ;;  %v2568_v34 = vpack.c.bf16 %v1276_v32, %v1274_v26  ;;  %v1313_v26 = vld [vmem:[#allocation6 + $0x3c0] sm:$0xff]  ;;  %v1315_v32 = vld [vmem:[#allocation6 + $0x3d0] sm:$0xff] }
 0x224   :  { %2549 = vmatprep.subr.bf16.mxu1 %v3785_v47  ;;  %v2610_v41 = vpack.c.bf16 %v1315_v32, %v1313_v26  ;;  %v3794_v32 = vld [vmem:[#allocation19_spill] sm:$0xff] }
 0x227   :  { %2551 = vmatpush1.bf16.msra.mxu1 %v3786_v48  ;;  %v1297_v48 = vld [vmem:[#allocation6 + $0x340] sm:$0xff] }
 0x228   :  { %2553 = vmatprep.subr.bf16.mxu1 %v2552_v7  ;;  %v2594_v59 = vpack.c.bf16 %v1299_v56, %v1297_v48  ;;  %v1304_v7 = vld [vmem:[#allocation6 + $0x378] sm:$0xff] }
 0x229   :  { %v2596_v16 = vpack.c.bf16 %v1304_v7, %v1302_v46 }
 0x22a   :  { %917 = vmatmul.mubr.f32.vlgmr.msra.gmra.mrb[2].mxu1 %v848_v36  ;;  %v1298_v36 = vld [vmem:[#allocation6 + $0x348] sm:$0xff] }
 0x22b   :  { %2555 = vmatpush1.bf16.msra.mxu1 %v2554_v31  ;;  %v2592_v47 = vpack.c.bf16 %v1300_v53, %v1298_v36  ;;  %v2598_v31 = vpack.c.bf16 %v1303_v28, %v1301_v19 }
 0x22c   :  { %2557 = vmatprep.subr.bf16.mxu1 %v2556_v43  ;;  %v1306_v43 = vld [vmem:[#allocation6 + $0x388] sm:$0xff] }
 0x22d   :  { %v2600_v61 = vpack.c.bf16 %v1308_v49, %v1306_v43 }
 0x22f   :  { %2559 = vmatpush1.bf16.msra.mxu1 %v2558_v13  ;;  %v2602_v13 = vpack.c.bf16 %v1307_v11, %v1305_v1 }
 0x230   :  { %2561 = vmatprep.subr.bf16.mxu1 %v2560_v23  ;;  %v1310_v23 = vld [vmem:[#allocation6 + $0x3a8] sm:$0xff] }
 0x231   :  { %v2604_v55 = vpack.c.bf16 %v1312_v51, %v1310_v23  ;;  %v3790_v51 = vld [vmem:[#allocation15_spill] sm:$0xff] }
 0x233   :  { %2563 = vmatpush1.bf16.msra.mxu1 %v2562_v5  ;;  %v933_v5 = vlaneseq }
 0x234   :  { %2565 = vmatprep.subr.bf16.mxu1 %v2564_v9  ;;  %v2606_v9 = vpack.c.bf16 %v1311_v2, %v1309_v60  ;;  %v3791_v60 = vld [vmem:[#allocation16_spill] sm:$0xff] }
 0x235   :  { %vm1078_vm3 = vcmp.lt.s32.totalorder %v933_v5, 256  ;;  %v934_v29 = vshrl.u32 %v933_v5, 7  ;;  %v3792_v5 = vld [vmem:[#allocation17_spill] sm:$0xff] }
 0x237   :  { %2567 = vmatpush1.bf16.msra.mxu1 %v2566_v22  ;;  %v2608_v22 = vpack.c.bf16 %v1316_v18, %v1314_v14  ;;  %v3397_v12 = vsub.s32 0, %v934_v29  ;;  %v3793_v14 = vld [vmem:[#allocation18_spill] sm:$0xff] }
 0x238   :  { %2569 = vmatprep.subr.bf16.mxu1 %v2568_v34  ;;  %v3019_v34 = vmov 0.0  }
 0x239   :  { %1080 = vst.msk [vmem:[#allocation2] ss:$8 sm:$0x3] %vm1078_vm3, %v3019_v34  ;;  %1083 = vst.msk [vmem:[#allocation2 + $0x30] ss:$8 sm:$0x3] %vm1078_vm3, %v3019_v34  ;;  %v953_v36 = vrot.slane %v2230_v20, %v3397_v12 }
 0x23a   :  { %1086 = vst.msk [vmem:[#allocation2 + $0x21] ss:$8 sm:$0x3] %vm1078_vm3, %v3019_v34  ;;  %1089 = vst.msk [vmem:[#allocation2 + $0x51] ss:$8 sm:$0x3] %vm1078_vm3, %v3019_v34 }
 0x23b   :  { %2571 = vmatpush1.bf16.msra.mxu1 %v2570_v42  ;;  %v1320_v42 = vld [vmem:[#allocation6 + $0x3f8] sm:$0xff]  ;;  %3787 = vst [vmem:[#allocation13_spill] sm:$0xff] %v3397_v12 }
 0x23c   :  { %2573 = vmatprep.subr.bf16.mxu1 %v2572_v40  ;;  %v2612_v10 = vpack.c.bf16 %v1320_v42, %v1318_v39  ;;  %v1319_v40 = vld [vmem:[#allocation6 + $0x3f0] sm:$0xff]  ;;  %v3796_v42 = vld [vmem:[#allocation21_spill] sm:$0xff] }
 0x23d   :  { %v2614_v54 = vpack.c.bf16 %v1319_v40, %v1317_v44 }
 0x23f   :  { %2575 = vmatpush1.bf16.msra.mxu1 %v2574_v58  ;;  %v1147_v58 = vld [vmem:[#allocation6 + $0x18] sm:$0xff] }
 0x240   :  { %2577 = vmatprep.subr.bf16.mxu1 %v2576_v3  ;;  %v2616_v62 = vpack.c.bf16 %v1147_v58, %v1145_v57 }
 0x243   :  { %2579 = vmatpush1.bf16.msra.mxu1 %v2578_v25 }
 0x244   :  { %2581 = vmatprep.subr.bf16.mxu1 %v2580_v6 }
 0x247   :  { %2583 = vmatpush1.bf16.msra.mxu1 %v2582_v37 }
 0x248   :  { %2585 = vmatprep.subr.bf16.mxu1 %v2584_v33  ;;  %v3402_v33 = vsub.s32 1, %v934_v29 }
 0x24a   :  { %3788 = vst [vmem:[#allocation14_spill] sm:$0xff] %v3402_v33  ;;  %v940_v21 = vrot.slane %v931_v17, %v3402_v33 }
 0x24b   :  { %2587 = vmatpush1.bf16.msra.mxu1 %v2586_v45  ;;  %v936_v45 = vrot.slane %v931_v17, %v3397_v12 }
 0x24c   :  { %2589 = vmatprep.subr.bf16.mxu1 %v2588_v0  ;;  %v967_v0 = vunpack.c.0.s8 %v966_v38 }
 0x24e   :  { %v3411_v48 = vsub.s32 %v967_v0, %v934_v29 }
 0x24f   :  { %2591 = vmatpush1.bf16.msra.mxu1 %v2590_v4 }
 0x250   :  { %2593 = vmatprep.subr.bf16.mxu1 %v2592_v47  ;;  %v957_v47 = vrot.slane %v2230_v20, %v3402_v33  ;;  %3789 = vst [vmem:[#allocation23_spill] sm:$0xff] %v3411_v48 }
 0x253   :  { %2595 = vmatpush1.bf16.msra.mxu1 %v2594_v59 }
 0x254   :  { %2597 = vmatprep.subr.bf16.mxu1 %v2596_v16 }
 0x257   :  { %2599 = vmatpush1.bf16.msra.mxu1 %v2598_v31 }
 0x258   :  { %2601 = vmatprep.subr.bf16.mxu1 %v2600_v61 }
 0x25b   :  { %2603 = vmatpush1.bf16.msra.mxu1 %v2602_v13 }
 0x25c   :  { %2605 = vmatprep.subr.bf16.mxu1 %v2604_v55 }
 0x25f   :  { %2607 = vmatpush1.bf16.msra.mxu1 %v2606_v9 }
 0x260   :  { %2609 = vmatprep.subr.bf16.mxu1 %v2608_v22 }
 0x263   :  { %2611 = vmatpush1.bf16.msra.mxu1 %v2610_v41  ;;  %v3795_v41 = vld [vmem:[#allocation20_spill] sm:$0xff] }
 0x264   :  { %2613 = vmatprep.subr.bf16.mxu1 %v2612_v10  ;;  %v3797_v10 = vld [vmem:[#allocation22_spill] sm:$0xff] }
 0x267   :  { %2615 = vmatpush1.bf16.msra.mxu1 %v2614_v54 }
 0x268   :  { %2617 = vmatprep.subr.bf16.mxu1 %v2616_v62 }
 0x2bd   :  { %v839_v63 = vpop.f32.mrb[0].mxu1 }
 0x2be   :  { %v841_v3 = vpop.f32.mrb[1].mxu1  ;;  %v923_v8 = vmul.f32 %v839_v63, %v839_v63 }
 0x2bf   :  { %v924_v15 = vmul.f32 %v841_v3, %v841_v3 }
 0x2fd   :  { %v918_v25 = vpop.f32.mrb[2].mxu1 }
 0x2fe   :  { %v925_v30 = vsub.f32 %v918_v25, %v923_v8  ;;  %v920_v35 = vpop.f32.mrb[3].mxu1 }
 0x2ff   :  { %v926_v6 = vsub.f32 %v920_v35, %v924_v15 }
 0x300   :  { %v927_v24 = vadd.f32 1e-05, %v925_v30 }
 0x301   :  { %v928_v37 = vadd.f32 1e-05, %v926_v6 }
 0x302   :  { %2912 = vrsqrt.f32 %v927_v24 }
 0x303   :  { %2914 = vrsqrt.f32 %v928_v37 }
 0x30c   :  { %v2913_v50 = vpop.eup %2912 }
 0x30d   :  { %v2915_v52 = vpop.eup %2914  ;;  %v943_v4 = vmul.f32 %v2913_v50, %v936_v45 }
 0x30e   :  { %v944_v53 = vmul.f32 %v2915_v52, %v940_v21 }
 0x30f   :  { %v947_v56 = vmul.f32 %v943_v4, %v839_v63 }
 0x310   :  { %v948_v59 = vmul.f32 %v944_v53, %v841_v3  ;;  %v964_v46 = vcombine.low %v943_v4, %v944_v53 }
 0x311   :  { %v960_v7 = vsub.f32 %v953_v36, %v947_v56 }
 0x312   :  { %v961_v16 = vsub.f32 %v957_v47, %v948_v59  ;;  %v971_v19 = vrot.slane %v964_v46, %v3411_v48 }
 0x314   :  { %v972_v28 = vcombine.high %v971_v19, %v971_v19  ;;  %v979_v31 = vrot.slane %v971_v19, %v3411_v48  ;;  %v1017_v43 = vcombine.low %v960_v7, %v961_v16  ;;  %v1144_v19 = vld [vmem:[#allocation6] sm:$0xff] }
 0x316   :  { %v986_v49 = vrot.slane %v972_v28, %v3411_v48  ;;  %v990_v61 = vrot.slane %v979_v31, %v3397_v12  ;;  %v994_v1 = vrot.slane %v979_v31, %v3402_v33  ;;  %v1024_v11 = vrot.slane %v1017_v43, %v3411_v48  ;;  %v1146_v31 = vld [vmem:[#allocation6 + $0x10] sm:$0xff]  ;;  %v1149_v43 = vld [vmem:[#allocation6 + $0x28] sm:$0xff] }
 0x318   :  { %v998_v13 = vrot.slane %v986_v49, %v3397_v12  ;;  %v1002_v23 = vrot.slane %v986_v49, %v3402_v33  ;;  %v1007_v55 = vmul.f32 %v990_v61, %v3790_v51  ;;  %v1008_v2 = vmul.f32 %v994_v1, %v3791_v60  ;;  %v1151_v49 = vld [vmem:[#allocation6 + $0x38] sm:$0xff] }
 0x319   :  { %v1009_v9 = vmul.f32 %v990_v61, %v3792_v5  ;;  %v1010_v18 = vmul.f32 %v994_v1, %v3793_v14  ;;  %v1025_v22 = vcombine.high %v1024_v11, %v1024_v11  ;;  %v1032_v26 = vrot.slane %v1024_v11, %v3411_v48 }
 0x31a   :  { %v1011_v34 = vmul.f32 %v998_v13, %v3794_v32  ;;  %v1012_v39 = vmul.f32 %v1002_v23, %v3795_v41  ;;  %v1013_v44 = vmul.f32 %v998_v13, %v3796_v42  ;;  %v1014_v40 = vmul.f32 %v1002_v23, %v3797_v10  ;;  %v1155_v41 = vld [vmem:[#allocation6 + $0x58] sm:$0xff] }
 0x31b   :  { %v1039_v54 = vrot.slane %v1025_v22, %v3411_v48  ;;  %v1043_v57 = vrot.slane %v1032_v26, %v3397_v12  ;;  %v1047_v58 = vrot.slane %v1032_v26, %v3402_v33  ;;  %v1148_v22 = vld [vmem:[#allocation6 + $0x20] sm:$0xff]  ;;  %v1150_v26 = vld [vmem:[#allocation6 + $0x30] sm:$0xff] }
 0x31c   :  { %v2622_v10 = vpack.c.bf16 %v1150_v26, %v1148_v22  ;;  %v1780_v22 = vld [vmem:[#allocation8 + $0x58] sm:$0xff] }
 0x31d   :  { %v1051_v62 = vrot.slane %v1039_v54, %v3397_v12  ;;  %v1055_v63 = vrot.slane %v1039_v54, %v3402_v33  ;;  %v1060_v3 = vadd.f32 %v1043_v57, %v1007_v55  ;;  %v1061_v8 = vadd.f32 %v1047_v58, %v1008_v2 }
 0x31e   :  { %v1062_v15 = vadd.f32 %v1043_v57, %v1009_v9  ;;  %v1063_v25 = vadd.f32 %v1047_v58, %v1010_v18  ;;  %v2618_v2 = vpack.c.bf16 %v1146_v31, %v1144_v19  ;;  %v2620_v18 = vpack.c.bf16 %v1151_v49, %v1149_v43  ;;  %v1152_v58 = vld [vmem:[#allocation6 + $0x40] sm:$0xff]  ;;  %v1770_v31 = vld [vmem:[#allocation8 + $0x8] sm:$0xff]  ;;  %v1772_v43 = vld [vmem:[#allocation8 + $0x18] sm:$0xff] }
 0x31f   :  { %v1064_v30 = vadd.f32 %v1051_v62, %v1011_v34  ;;  %v1065_v35 = vadd.f32 %v1055_v63, %v1012_v39  ;;  %v1066_v6 = vadd.f32 %v1051_v62, %v1013_v44  ;;  %v1067_v24 = vadd.f32 %v1055_v63, %v1014_v40  ;;  %v1153_v34 = vld [vmem:[#allocation6 + $0x48] sm:$0xff]  ;;  %v1154_v62 = vld [vmem:[#allocation6 + $0x50] sm:$0xff]  ;;  %v1164_v19 = vld [vmem:[#allocation6 + $0xa0] sm:$0xff] }
 0x320   :  { %v1068_v29 = vmax.f32 %v1060_v3, 0.0  ;;  %v1069_v37 = vmax.f32 %v1061_v8, 0.0  ;;  %v1070_v17 = vmax.f32 %v1062_v15, 0.0  ;;  %v1071_v27 = vmax.f32 %v1063_v25, 0.0  ;;  %v1157_v8 = vld [vmem:[#allocation6 + $0x68] sm:$0xff]  ;;  %v1159_v15 = vld [vmem:[#allocation6 + $0x78] sm:$0xff] }
 0x321   :  { %v1072_v38 = vmax.f32 %v1064_v30, 0.0  ;;  %v1073_v45 = vmax.f32 %v1065_v35, 0.0  ;;  %v1074_v20 = vmax.f32 %v1066_v6, 0.0  ;;  %v1075_v21 = vmax.f32 %v1067_v24, 0.0  ;;  %v1769_v49 = vld [vmem:[#allocation8] sm:$0xff] }
 0x322   :  { %v1100_v0 = vrot.slane %v1068_v29, 7  ;;  %v1101_v50 = vrot.slane %v1069_v37, 7  ;;  %v1102_v52 = vrot.slane %v1070_v17, 7  ;;  %v1104_v4 = vrot.slane %v1071_v27, 7  ;;  %v1156_v37 = vld [vmem:[#allocation6 + $0x60] sm:$0xff]  ;;  %v1158_v17 = vld [vmem:[#allocation6 + $0x70] sm:$0xff] }
 0x323   :  { %v1106_v36 = vrot.slane %v1072_v38, 7  ;;  %v1107_v53 = vrot.slane %v1073_v45, 7  ;;  %v1108_v47 = vrot.slane %v1074_v20, 7  ;;  %v1110_v56 = vrot.slane %v1075_v21, 7  ;;  %v1161_v45 = vld [vmem:[#allocation6 + $0x88] sm:$0xff]  ;;  %v1163_v20 = vld [vmem:[#allocation6 + $0x98] sm:$0xff] }
 0x324   :  { %v3436_v59 = vsel %vm1099_vm4, %v1100_v0, %v1102_v52  ;;  %v3439_v46 = vsel %vm1099_vm4, %v1101_v50, %v1104_v4  ;;  %1124 = vst [vmem:[#allocation2] sm:$0xfe] %v1100_v0  ;;  %1125 = vst [vmem:[#allocation2 + $0x8] sm:$0xfe] %v1101_v50  ;;  %v2624_v57 = vpack.c.bf16 %v1155_v41, %v1153_v34  ;;  %v1168_v34 = vld [vmem:[#allocation6 + $0xc0] sm:$0xff] }
 0x325   :  { %1128 = vst [vmem:[#allocation2 + $0x20] sm:$0x1] %v1102_v52  ;;  %1129 = vst [vmem:[#allocation2 + $0x28] sm:$0x1] %v1104_v4  ;;  %v3442_v7 = vsel %vm1099_vm4, %v1106_v36, %v1108_v47  ;;  %v3445_v16 = vsel %vm1099_vm4, %v1107_v53, %v1110_v56  ;;  %v1232_v28 = vrot.slane %v3439_v46, 1  ;;  %v1229_v51 = vrot.slane %v3436_v59, 1 }
 0x326   :  { %1130 = vst [vmem:[#allocation2 + $0x30] sm:$0xfe] %v1106_v36  ;;  %1131 = vst [vmem:[#allocation2 + $0x38] sm:$0xfe] %v1107_v53  ;;  %v1242_v54 = vrot.slane %v3445_v16, 1  ;;  %v1239_v6 = vrot.slane %v3442_v7, 1  ;;  %v2626_v24 = vpack.c.bf16 %v1154_v62, %v1152_v58  ;;  %v2628_v29 = vpack.c.bf16 %v1159_v15, %v1157_v8 }
 0x327   :  { %1134 = vst [vmem:[#allocation2 + $0x50] sm:$0x1] %v1108_v47  ;;  %1135 = vst [vmem:[#allocation2 + $0x58] sm:$0x1] %v1110_v56  ;;  %v2630_v0 = vpack.c.bf16 %v1158_v17, %v1156_v37  ;;  %v2632_v50 = vpack.c.bf16 %v1163_v20, %v1161_v45  ;;  %v1160_v52 = vld [vmem:[#allocation6 + $0x80] sm:$0xff]  ;;  %v1162_v4 = vld [vmem:[#allocation6 + $0x90] sm:$0xff] }
 0x328   :  { %v1165_v47 = vld [vmem:[#allocation6 + $0xa8] sm:$0xff]  ;;  %v1167_v56 = vld [vmem:[#allocation6 + $0xb8] sm:$0xff]  ;;  %v1781_v15 = vld [vmem:[#allocation8 + $0x60] sm:$0xff] }
 0x329   :  { %v1175_v58 = vld [vmem:[#allocation6 + $0xf8] sm:$0xff]  ;;  %v1785_v20 = vld [vmem:[#allocation8 + $0x80] sm:$0xff] }
 0x32a   :  { %v1179_v37 = vld [vmem:[#allocation6 + $0x118] sm:$0xff] }
 0x32b   :  { %v1209_v61 = vld [vmem:[#allocation2 + $0x8] sm:$0xfe]  ;;  %v1208_v1 = vld [vmem:[#allocation2] sm:$0xfe] }
 0x32c   :  { %v1211_v11 = vld [vmem:[#allocation2 + $0x28] sm:$0x1]  ;;  %v1231_v13 = vrot.slane %v1209_v61, 1  ;;  %v1228_v23 = vrot.slane %v1208_v1, 1  ;;  %v1210_v60 = vld [vmem:[#allocation2 + $0x20] sm:$0x1]  ;;  %v2634_v61 = vpack.c.bf16 %v1162_v4, %v1160_v52  ;;  %v3459_v1 = vpack.c.bf16 %v1772_v43, %v1770_v31 }
 0x32d   :  { %v1236_v55 = vrot.slane %v1211_v11, 1  ;;  %v1213_v5 = vld [vmem:[#allocation2 + $0x38] sm:$0xfe]  ;;  %v1234_v32 = vrot.slane %v1210_v60, 1  ;;  %v1212_v44 = vld [vmem:[#allocation2 + $0x30] sm:$0xfe] }
 0x32e   :  { %v1233_v9 = vsel %vm157_vm0, %v1231_v13, %v1232_v28  ;;  %v1230_v14 = vsel %vm157_vm0, %v1228_v23, %v1229_v51  ;;  %v1241_v42 = vrot.slane %v1213_v5, 1  ;;  %v1215_v40 = vld [vmem:[#allocation2 + $0x58] sm:$0x1]  ;;  %v1238_v3 = vrot.slane %v1212_v44, 1  ;;  %v1214_v35 = vld [vmem:[#allocation2 + $0x50] sm:$0x1]  ;;  %2745 = vmatprep.subr.bf16.mxu0 %v3459_v1 }
 0x32f   :  { %1385 = vmatprep.mubr.f32.mxu1 %v1233_v9  ;;  %v1237_v39 = vsel %vm157_vm0, %v1232_v28, %v1236_v55  ;;  %v1235_v63 = vsel %vm157_vm0, %v1229_v51, %v1234_v32  ;;  %v1246_v30 = vrot.slane %v1215_v40, 1  ;;  %v1244_v38 = vrot.slane %v1214_v35, 1  ;;  %v1137_v53 = vld [vmem:[#allocation2 + $0x8] sm:$0xff]  ;;  %v1166_v28 = vld [vmem:[#allocation6 + $0xb0] sm:$0xff]  ;;  %v1776_v23 = vld [vmem:[#allocation8 + $0x38] sm:$0xff] }
 0x330   :  { %1386 = vmatmul.mubr.f32.vlgmr.msra.gmra.mrb[4].mxu1 %v1230_v14  ;;  %v1243_v25 = vsel %vm157_vm0, %v1241_v42, %v1242_v54  ;;  %v1240_v27 = vsel %vm157_vm0, %v1238_v3, %v1239_v6  ;;  %v1771_v11 = vld [vmem:[#allocation8 + $0x10] sm:$0xff]  ;;  %v1774_v13 = vld [vmem:[#allocation8 + $0x28] sm:$0xff]  ;;  %v2636_v51 = vpack.c.bf16 %v1167_v56, %v1165_v47  ;;  %v2638_v32 = vpack.c.bf16 %v1166_v28, %v1164_v19  ;;  %v1172_v3 = vld [vmem:[#allocation6 + $0xe0] sm:$0xff] }
 0x331   :  { %2619 = vmatpush1.bf16.msra.mxu1 %v2618_v2  ;;  %1391 = vmatprep.mubr.f32.mxu1 %v1237_v39  ;;  %v1247_v21 = vsel %vm157_vm0, %v1242_v54, %v1246_v30  ;;  %v1245_v36 = vsel %vm157_vm0, %v1239_v6, %v1244_v38  ;;  %v3461_v55 = vpack.c.bf16 %v1771_v11, %v1769_v49  ;;  %v1773_v2 = vld [vmem:[#allocation8 + $0x20] sm:$0xff]  ;;  %v1775_v5 = vld [vmem:[#allocation8 + $0x30] sm:$0xff]  ;;  %v1778_v9 = vld [vmem:[#allocation8 + $0x48] sm:$0xff] }
 0x332   :  { %2621 = vmatprep.subr.bf16.mxu1 %v2620_v18  ;;  %v3463_v60 = vpack.c.bf16 %v1776_v23, %v1774_v13  ;;  %v1169_v14 = vld [vmem:[#allocation6 + $0xc8] sm:$0xff]  ;;  %v1171_v18 = vld [vmem:[#allocation6 + $0xd8] sm:$0xff]  ;;  %v3467_v26 = vpack.c.bf16 %v1775_v5, %v1773_v2  ;;  %v3470_v41 = vpack.c.bf16 %v1780_v22, %v1778_v9  ;;  %v1777_v39 = vld [vmem:[#allocation8 + $0x40] sm:$0xff] }
 0x333   :  { %2747 = vmatpush1.bf16.msra.mxu0 %v3461_v55  ;;  %v1779_v42 = vld [vmem:[#allocation8 + $0x50] sm:$0xff]  ;;  %v2640_v44 = vpack.c.bf16 %v1171_v18, %v1169_v14  ;;  %v1782_v40 = vld [vmem:[#allocation8 + $0x68] sm:$0xff]  ;;  %v1784_v54 = vld [vmem:[#allocation8 + $0x78] sm:$0xff] }
 0x334   :  { %1392 = vmatmul.mubr.f32.gmra.mrb[6].mxu1 %v1235_v63  ;;  %2749 = vmatprep.subr.bf16.mxu0 %v3463_v60  ;;  %v3473_v62 = vpack.c.bf16 %v1779_v42, %v1777_v39  ;;  %v3476_v8 = vpack.c.bf16 %v1784_v54, %v1782_v40  ;;  %v1174_v35 = vld [vmem:[#allocation6 + $0xf0] sm:$0xff]  ;;  %v1786_v6 = vld [vmem:[#allocation8 + $0x88] sm:$0xff]  ;;  %v1176_v38 = vld [vmem:[#allocation6 + $0x100] sm:$0xff] }
 0x335   :  { %2623 = vmatpush1.bf16.msra.mxu1 %v2622_v10  ;;  %1397 = vmatprep.mubr.f32.mxu1 %v1243_v25  ;;  %v1170_v10 = vld [vmem:[#allocation6 + $0xd0] sm:$0xff]  ;;  %v1790_v52 = vld [vmem:[#allocation8 + $0xa8] sm:$0xff]  ;;  %v1792_v4 = vld [vmem:[#allocation8 + $0xb8] sm:$0xff] }
 0x336   :  { %2625 = vmatprep.subr.bf16.mxu1 %v2624_v57  ;;  %v1173_v57 = vld [vmem:[#allocation6 + $0xe8] sm:$0xff]  ;;  %v2642_v63 = vpack.c.bf16 %v1170_v10, %v1168_v34  ;;  %v1783_v25 = vld [vmem:[#allocation8 + $0x70] sm:$0xff]  ;;  %v1180_v19 = vld [vmem:[#allocation6 + $0x120] sm:$0xff]  ;;  %v3488_v28 = vpack.c.bf16 %v1792_v4, %v1790_v52 }
 0x337   :  { %2751 = vmatpush1.bf16.msra.mxu0 %v3467_v26  ;;  %v2644_v30 = vpack.c.bf16 %v1175_v58, %v1173_v57  ;;  %v3479_v17 = vpack.c.bf16 %v1783_v25, %v1781_v15  ;;  %v1789_v31 = vld [vmem:[#allocation8 + $0xa0] sm:$0xff]  ;;  %v1791_v43 = vld [vmem:[#allocation8 + $0xb0] sm:$0xff]  ;;  %v1794_v11 = vld [vmem:[#allocation8 + $0xc8] sm:$0xff] }
 0x338   :  { %1398 = vmatmul.mubr.f32.gmra.mrb[8].mxu1 %v1240_v27  ;;  %2753 = vmatprep.subr.bf16.mxu0 %v3470_v41  ;;  %v2646_v27 = vpack.c.bf16 %v1174_v35, %v1172_v3  ;;  %v1796_v13 = vld [vmem:[#allocation8 + $0xd8] sm:$0xff]  ;;  %v1185_v23 = vld [vmem:[#allocation6 + $0x148] sm:$0xff]  ;;  %v3491_v2 = vpack.c.bf16 %v1791_v43, %v1789_v31  ;;  %v1184_v9 = vld [vmem:[#allocation6 + $0x140] sm:$0xff] }
 0x339   :  { %2627 = vmatpush1.bf16.msra.mxu1 %v2626_v24  ;;  %1403 = vmatprep.mubr.f32.mxu1 %v1247_v21  ;;  %v1788_v24 = vld [vmem:[#allocation8 + $0x98] sm:$0xff]  ;;  %v1787_v21 = vld [vmem:[#allocation8 + $0x90] sm:$0xff]  ;;  %v3494_v14 = vpack.c.bf16 %v1796_v13, %v1794_v11  ;;  %v1793_v18 = vld [vmem:[#allocation8 + $0xc0] sm:$0xff] }
 0x33a   :  { %2629 = vmatprep.subr.bf16.mxu1 %v2628_v29  ;;  %v1177_v29 = vld [vmem:[#allocation6 + $0x108] sm:$0xff]  ;;  %v3482_v45 = vpack.c.bf16 %v1788_v24, %v1786_v6  ;;  %v3485_v47 = vpack.c.bf16 %v1787_v21, %v1785_v20  ;;  %v1795_v22 = vld [vmem:[#allocation8 + $0xd0] sm:$0xff]  ;;  %v1800_v42 = vld [vmem:[#allocation8 + $0xf8] sm:$0xff] }
 0x33b   :  { %2755 = vmatpush1.bf16.msra.mxu0 %v3473_v62  ;;  %v1186_v34 = vld [vmem:[#allocation6 + $0x150] sm:$0xff]  ;;  %v1798_v39 = vld [vmem:[#allocation8 + $0xe8] sm:$0xff]  ;;  %v1191_v10 = vld [vmem:[#allocation6 + $0x178] sm:$0xff]  ;;  %v3497_v40 = vpack.c.bf16 %v1795_v22, %v1793_v18 }
 0x33c   :  { %1404 = vmatmul.mubr.f32.gmra.mrb[10].mxu1 %v1245_v36  ;;  %2757 = vmatprep.subr.bf16.mxu0 %v3476_v8  ;;  %v1181_v36 = vld [vmem:[#allocation6 + $0x128] sm:$0xff]  ;;  %v2658_v54 = vpack.c.bf16 %v1186_v34, %v1184_v9  ;;  %v1188_v57 = vld [vmem:[#allocation6 + $0x160] sm:$0xff]  ;;  %v3500_v58 = vpack.c.bf16 %v1800_v42, %v1798_v39  ;;  %v1799_v3 = vld [vmem:[#allocation8 + $0xf0] sm:$0xff] }
 0x33d   :  { %2631 = vmatpush1.bf16.msra.mxu1 %v2630_v0  ;;  %1474 = vmatprep.mubr.f32.mxu1 %v1137_v53  ;;  %v2648_v0 = vpack.c.bf16 %v1179_v37, %v1177_v29  ;;  %v1183_v53 = vld [vmem:[#allocation6 + $0x138] sm:$0xff]  ;;  %v1190_v25 = vld [vmem:[#allocation6 + $0x170] sm:$0xff]  ;;  %v1193_v6 = vld [vmem:[#allocation6 + $0x188] sm:$0xff] }
 0x33e   :  { %2633 = vmatprep.subr.bf16.mxu1 %v2632_v50  ;;  %v1178_v50 = vld [vmem:[#allocation6 + $0x110] sm:$0xff]  ;;  %v2652_v49 = vpack.c.bf16 %v1183_v53, %v1181_v36  ;;  %v1804_v35 = vld [vmem:[#allocation8 + $0x118] sm:$0xff]  ;;  %v2662_v37 = vpack.c.bf16 %v1190_v25, %v1188_v57  ;;  %v1197_v52 = vld [vmem:[#allocation6 + $0x1a8] sm:$0xff] }
 0x33f   :  { %2759 = vmatpush1.bf16.msra.mxu0 %v3479_v17  ;;  %v2650_v56 = vpack.c.bf16 %v1178_v50, %v1176_v38  ;;  %v1195_v24 = vld [vmem:[#allocation6 + $0x198] sm:$0xff]  ;;  %v1801_v38 = vld [vmem:[#allocation8 + $0x100] sm:$0xff]  ;;  %v1803_v20 = vld [vmem:[#allocation8 + $0x110] sm:$0xff] }
 0x340   :  { %2761 = vmatprep.subr.bf16.mxu0 %v3482_v45  ;;  %v2664_v21 = vpack.c.bf16 %v1195_v24, %v1193_v6  ;;  %v1194_v50 = vld [vmem:[#allocation6 + $0x190] sm:$0xff]  ;;  %v1199_v4 = vld [vmem:[#allocation6 + $0x1b8] sm:$0xff]  ;;  %v3509_v36 = vpack.c.bf16 %v1803_v20, %v1801_v38  ;;  %v1201_v43 = vld [vmem:[#allocation6 + $0x1c8] sm:$0xff] }
 0x341   :  { %2635 = vmatpush1.bf16.msra.mxu1 %v2634_v61  ;;  %v1182_v61 = vld [vmem:[#allocation6 + $0x130] sm:$0xff]  ;;  %v1200_v13 = vld [vmem:[#allocation6 + $0x1c0] sm:$0xff]  ;;  %v1545_v34 = vld [vmem:[#allocation6 + $0x408] sm:$0xff] }
 0x342   :  { %2637 = vmatprep.subr.bf16.mxu1 %v2636_v51  ;;  %v1187_v51 = vld [vmem:[#allocation6 + $0x158] sm:$0xff]  ;;  %v2654_v5 = vpack.c.bf16 %v1182_v61, %v1180_v19  ;;  %v1196_v19 = vld [vmem:[#allocation6 + $0x1a0] sm:$0xff]  ;;  %v1198_v31 = vld [vmem:[#allocation6 + $0x1b0] sm:$0xff] }
 0x343   :  { %2763 = vmatpush1.bf16.msra.mxu0 %v3485_v47  ;;  %v2670_v61 = vpack.c.bf16 %v1198_v31, %v1196_v19  ;;  %v1204_v22 = vld [vmem:[#allocation6 + $0x1e0] sm:$0xff]  ;;  %v1547_v39 = vld [vmem:[#allocation6 + $0x418] sm:$0xff]  ;;  %v1549_v57 = vld [vmem:[#allocation6 + $0x428] sm:$0xff] }
 0x344   :  { %2765 = vmatprep.subr.bf16.mxu0 %v3488_v28  ;;  %v1548_v25 = vld [vmem:[#allocation6 + $0x420] sm:$0xff]  ;;  %v1553_v6 = vld [vmem:[#allocation6 + $0x448] sm:$0xff]  ;;  %v1555_v24 = vld [vmem:[#allocation6 + $0x458] sm:$0xff] }
 0x345   :  { %2639 = vmatpush1.bf16.msra.mxu1 %v2638_v32  ;;  %v2656_v32 = vpack.c.bf16 %v1187_v51, %v1185_v23  ;;  %v1202_v23 = vld [vmem:[#allocation6 + $0x1d0] sm:$0xff]  ;;  %v1205_v51 = vld [vmem:[#allocation6 + $0x1e8] sm:$0xff]  ;;  %v2688_v38 = vpack.c.bf16 %v1555_v24, %v1553_v6  ;;  %v1552_v20 = vld [vmem:[#allocation6 + $0x440] sm:$0xff] }
 0x346   :  { %2641 = vmatprep.subr.bf16.mxu1 %v2640_v44  ;;  %v1189_v44 = vld [vmem:[#allocation6 + $0x168] sm:$0xff]  ;;  %v2674_v9 = vpack.c.bf16 %v1202_v23, %v1200_v13  ;;  %v1556_v19 = vld [vmem:[#allocation6 + $0x460] sm:$0xff]  ;;  %v1558_v31 = vld [vmem:[#allocation6 + $0x470] sm:$0xff]  ;;  %v1519_v23 = vrot.slane %v3439_v46, 2 }
 0x347   :  { %2767 = vmatpush1.bf16.msra.mxu0 %v3491_v2  ;;  %v2660_v15 = vpack.c.bf16 %v1191_v10, %v1189_v44  ;;  %v2680_v44 = vpack.c.bf16 %v1547_v39, %v1545_v34  ;;  %v1544_v10 = vld [vmem:[#allocation6 + $0x400] sm:$0xff]  ;;  %v2694_v13 = vpack.c.bf16 %v1558_v31, %v1556_v19 }
 0x348   :  { %2769 = vmatprep.subr.bf16.mxu0 %v3494_v14  ;;  %v1572_v24 = vld [vmem:[#allocation6 + $0x4e0] sm:$0xff] }
 0x349   :  { %2643 = vmatpush1.bf16.msra.mxu1 %v2642_v63  ;;  %v1797_v63 = vld [vmem:[#allocation8 + $0xe0] sm:$0xff] }
 0x34a   :  { %2645 = vmatprep.subr.bf16.mxu1 %v2644_v30  ;;  %v1802_v30 = vld [vmem:[#allocation8 + $0x108] sm:$0xff]  ;;  %v3503_v29 = vpack.c.bf16 %v1799_v3, %v1797_v63  ;;  %v1551_v63 = vld [vmem:[#allocation6 + $0x438] sm:$0xff]  ;;  %v1580_v31 = vld [vmem:[#allocation6 + $0x520] sm:$0xff] }
 0x34b   :  { %2771 = vmatpush1.bf16.msra.mxu0 %v3497_v40 }
 0x34c   :  { %2773 = vmatprep.subr.bf16.mxu0 %v3500_v58 }
 0x34d   :  { %2647 = vmatpush1.bf16.msra.mxu1 %v2646_v27  ;;  %v3506_v27 = vpack.c.bf16 %v1804_v35, %v1802_v30  ;;  %v1550_v30 = vld [vmem:[#allocation6 + $0x430] sm:$0xff]  ;;  %v1136_v35 = vld [vmem:[#allocation2] sm:$0xff] }
 0x34e   :  { %2649 = vmatprep.subr.bf16.mxu1 %v2648_v0  ;;  %v1192_v0 = vld [vmem:[#allocation6 + $0x180] sm:$0xff] }
 0x34f   :  { %2775 = vmatpush1.bf16.msra.mxu0 %v3503_v29  ;;  %v2666_v53 = vpack.c.bf16 %v1194_v50, %v1192_v0  ;;  %v1557_v0 = vld [vmem:[#allocation6 + $0x468] sm:$0xff]  ;;  %v1559_v50 = vld [vmem:[#allocation6 + $0x478] sm:$0xff] }
 0x350   :  { %2777 = vmatprep.subr.bf16.mxu0 %v3506_v27 }
 0x351   :  { %2651 = vmatpush1.bf16.msra.mxu1 %v2650_v56  ;;  %v2668_v56 = vpack.c.bf16 %v1199_v4, %v1197_v52  ;;  %v1141_v52 = vld [vmem:[#allocation2 + $0x38] sm:$0xff] }
 0x352   :  { %2653 = vmatprep.subr.bf16.mxu1 %v2652_v49  ;;  %v1203_v49 = vld [vmem:[#allocation6 + $0x1d8] sm:$0xff] }
 0x353   :  { %2779 = vmatpush1.bf16.msra.mxu0 %v3509_v36  ;;  %v2672_v11 = vpack.c.bf16 %v1203_v49, %v1201_v43  ;;  %v1140_v43 = vld [vmem:[#allocation2 + $0x30] sm:$0xff]  ;;  %v1561_v49 = vld [vmem:[#allocation6 + $0x488] sm:$0xff] }
 0x355   :  { %2655 = vmatpush1.bf16.msra.mxu1 %v2654_v5  ;;  %v1207_v5 = vld [vmem:[#allocation6 + $0x1f8] sm:$0xff] }
 0x356   :  { %2657 = vmatprep.subr.bf16.mxu1 %v2656_v32  ;;  %v2676_v18 = vpack.c.bf16 %v1207_v5, %v1205_v51  ;;  %v1206_v32 = vld [vmem:[#allocation6 + $0x1f0] sm:$0xff]  ;;  %v1560_v5 = vld [vmem:[#allocation6 + $0x480] sm:$0xff] }
 0x357   :  { %v2678_v42 = vpack.c.bf16 %v1206_v32, %v1204_v22  ;;  %v1567_v22 = vld [vmem:[#allocation6 + $0x4b8] sm:$0xff] }
 0x359   :  { %2659 = vmatpush1.bf16.msra.mxu1 %v2658_v54  ;;  %v1546_v54 = vld [vmem:[#allocation6 + $0x410] sm:$0xff] }
 0x35a   :  { %2661 = vmatprep.subr.bf16.mxu1 %v2660_v15  ;;  %v2682_v3 = vpack.c.bf16 %v1546_v54, %v1544_v10  ;;  %v2684_v15 = vpack.c.bf16 %v1551_v63, %v1549_v57  ;;  %v1569_v10 = vld [vmem:[#allocation6 + $0x4c8] sm:$0xff]  ;;  %v1571_v54 = vld [vmem:[#allocation6 + $0x4d8] sm:$0xff] }
 0x35b   :  { %v2704_v63 = vpack.c.bf16 %v1571_v54, %v1569_v10 }
 0x35d   :  { %2663 = vmatpush1.bf16.msra.mxu1 %v2662_v37  ;;  %v2686_v37 = vpack.c.bf16 %v1550_v30, %v1548_v25  ;;  %v1573_v25 = vld [vmem:[#allocation6 + $0x4e8] sm:$0xff]  ;;  %v1575_v30 = vld [vmem:[#allocation6 + $0x4f8] sm:$0xff] }
 0x35e   :  { %2665 = vmatprep.subr.bf16.mxu1 %v2664_v21  ;;  %v1554_v21 = vld [vmem:[#allocation6 + $0x450] sm:$0xff]  ;;  %v2708_v6 = vpack.c.bf16 %v1575_v30, %v1573_v25 }
 0x35f   :  { %v2690_v4 = vpack.c.bf16 %v1554_v21, %v1552_v20  ;;  %v1579_v20 = vld [vmem:[#allocation6 + $0x518] sm:$0xff] }
 0x361   :  { %2667 = vmatpush1.bf16.msra.mxu1 %v2666_v53  ;;  %v1500_v53 = vld [vmem:[#allocation2 + $0x8] sm:$0xfc] }
 0x362   :  { %2669 = vmatprep.subr.bf16.mxu1 %v2668_v56  ;;  %v2692_v56 = vpack.c.bf16 %v1559_v50, %v1557_v0  ;;  %v1576_v50 = vld [vmem:[#allocation6 + $0x500] sm:$0xff] }
 0x365   :  { %2671 = vmatpush1.bf16.msra.mxu1 %v2670_v61  ;;  %v1563_v61 = vld [vmem:[#allocation6 + $0x498] sm:$0xff] }
 0x366   :  { %2673 = vmatprep.subr.bf16.mxu1 %v2672_v11  ;;  %v1518_v11 = vrot.slane %v1500_v53, 2  ;;  %v2696_v51 = vpack.c.bf16 %v1563_v61, %v1561_v49  ;;  %v1583_v53 = vld [vmem:[#allocation6 + $0x538] sm:$0xff]  ;;  %v1585_v49 = vld [vmem:[#allocation6 + $0x548] sm:$0xff] }
 0x367   :  { %v1587_v61 = vld [vmem:[#allocation6 + $0x558] sm:$0xff] }
 0x368   :  { %v1520_v32 = vsel %vm445_vm1, %v1518_v11, %v1519_v23 }
 0x369   :  { %2675 = vmatpush1.bf16.msra.mxu1 %v2674_v9  ;;  %v1562_v9 = vld [vmem:[#allocation6 + $0x490] sm:$0xff] }
 0x36a   :  { %2677 = vmatprep.subr.bf16.mxu1 %v2676_v18  ;;  %v1565_v18 = vld [vmem:[#allocation6 + $0x4a8] sm:$0xff]  ;;  %v2698_v34 = vpack.c.bf16 %v1562_v9, %v1560_v5  ;;  %v1586_v5 = vld [vmem:[#allocation6 + $0x550] sm:$0xff] }
 0x36b   :  { %v2700_v39 = vpack.c.bf16 %v1567_v22, %v1565_v18  ;;  %v1589_v9 = vld [vmem:[#allocation6 + $0x568] sm:$0xff]  ;;  %v1591_v18 = vld [vmem:[#allocation6 + $0x578] sm:$0xff] }
 0x36d   :  { %2679 = vmatpush1.bf16.msra.mxu1 %v2678_v42  ;;  %v1564_v42 = vld [vmem:[#allocation6 + $0x4a0] sm:$0xff] }
 0x36e   :  { %2681 = vmatprep.subr.bf16.mxu1 %v2680_v44  ;;  %v1566_v44 = vld [vmem:[#allocation6 + $0x4b0] sm:$0xff] }
 0x36f   :  { %v2702_v57 = vpack.c.bf16 %v1566_v44, %v1564_v42  ;;  %v1593_v42 = vld [vmem:[#allocation6 + $0x588] sm:$0xff]  ;;  %v1595_v44 = vld [vmem:[#allocation6 + $0x598] sm:$0xff] }
 0x370   :  { %1475 = vmatmul.mubr.f32.vlgmr.msra.gmra.mrb[4].mxu1 %v1136_v35  ;;  %v2728_v54 = vpack.c.bf16 %v1595_v44, %v1593_v42  ;;  %v1529_v42 = vrot.slane %v3445_v16, 2 }
 0x371   :  { %1480 = vmatprep.mubr.f32.mxu1 %v3439_v46  ;;  %2683 = vmatpush1.bf16.msra.mxu1 %v2682_v3  ;;  %v1568_v3 = vld [vmem:[#allocation6 + $0x4c0] sm:$0xff] }
 0x372   :  { %2685 = vmatprep.subr.bf16.mxu1 %v2684_v15  ;;  %v1570_v15 = vld [vmem:[#allocation6 + $0x4d0] sm:$0xff] }
 0x373   :  { %v2706_v35 = vpack.c.bf16 %v1570_v15, %v1568_v3  ;;  %v1597_v3 = vld [vmem:[#allocation6 + $0x5a8] sm:$0xff]  ;;  %v1599_v15 = vld [vmem:[#allocation6 + $0x5b8] sm:$0xff] }
 0x374   :  { %1481 = vmatmul.mubr.f32.gmra.mrb[6].mxu1 %v3436_v59  ;;  %v2732_v30 = vpack.c.bf16 %v1599_v15, %v1597_v3  ;;  %v1806_v15 = vld [vmem:[#allocation8 + $0x128] sm:$0xff] }
 0x375   :  { %1486 = vmatprep.mubr.f32.mxu1 %v1141_v52  ;;  %2687 = vmatpush1.bf16.msra.mxu1 %v2686_v37  ;;  %v1574_v37 = vld [vmem:[#allocation6 + $0x4f0] sm:$0xff] }
 0x376   :  { %2689 = vmatprep.subr.bf16.mxu1 %v2688_v38  ;;  %v1577_v38 = vld [vmem:[#allocation6 + $0x508] sm:$0xff]  ;;  %v2710_v21 = vpack.c.bf16 %v1574_v37, %v1572_v24  ;;  %v1578_v52 = vld [vmem:[#allocation6 + $0x510] sm:$0xff]  ;;  %v1603_v37 = vld [vmem:[#allocation6 + $0x5d8] sm:$0xff] }
 0x377   :  { %v2712_v0 = vpack.c.bf16 %v1579_v20, %v1577_v38  ;;  %v1601_v24 = vld [vmem:[#allocation6 + $0x5c8] sm:$0xff] }
 0x378   :  { %1487 = vmatmul.mubr.f32.gmra.mrb[8].mxu1 %v1140_v43  ;;  %v1582_v43 = vld [vmem:[#allocation6 + $0x530] sm:$0xff]  ;;  %v2736_v20 = vpack.c.bf16 %v1603_v37, %v1601_v24  ;;  %v1812_v37 = vld [vmem:[#allocation8 + $0x158] sm:$0xff] }
 0x379   :  { %1492 = vmatprep.mubr.f32.mxu1 %v3445_v16  ;;  %2691 = vmatpush1.bf16.msra.mxu1 %v2690_v4  ;;  %v1581_v4 = vld [vmem:[#allocation6 + $0x528] sm:$0xff]  ;;  %v2718_v11 = vpack.c.bf16 %v1582_v43, %v1580_v31  ;;  %v1499_v31 = vld [vmem:[#allocation2] sm:$0xfc] }
 0x37a   :  { %2693 = vmatprep.subr.bf16.mxu1 %v2692_v56  ;;  %v2714_v56 = vpack.c.bf16 %v1578_v52, %v1576_v50  ;;  %v2716_v19 = vpack.c.bf16 %v1583_v53, %v1581_v4  ;;  %v1605_v50 = vld [vmem:[#allocation6 + $0x5e8] sm:$0xff]  ;;  %v1607_v52 = vld [vmem:[#allocation6 + $0x5f8] sm:$0xff] }
 0x37b   :  { %v2740_v53 = vpack.c.bf16 %v1607_v52, %v1605_v50  ;;  %v1814_v50 = vld [vmem:[#allocation8 + $0x168] sm:$0xff]  ;;  %v1816_v52 = vld [vmem:[#allocation8 + $0x178] sm:$0xff] }
 0x37c   :  { %1493 = vmatmul.mubr.f32.gmra.mrb[10].mxu1 %v3442_v7 }
 0x37d   :  { %2695 = vmatpush1.bf16.msra.mxu1 %v2694_v13  ;;  %1672 = vmatprep.mubr.f32.mxu1 %v1520_v32  ;;  %v2720_v13 = vpack.c.bf16 %v1587_v61, %v1585_v49  ;;  %v2724_v32 = vpack.c.bf16 %v1591_v18, %v1589_v9  ;;  %v1502_v49 = vld [vmem:[#allocation2 + $0x28] sm:$0x3]  ;;  %v1515_v61 = vrot.slane %v1499_v31, 2 }
 0x37e   :  { %2697 = vmatprep.subr.bf16.mxu1 %v2696_v51  ;;  %v1584_v51 = vld [vmem:[#allocation6 + $0x540] sm:$0xff]  ;;  %v1818_v31 = vld [vmem:[#allocation8 + $0x188] sm:$0xff] }
 0x37f   :  { %v2722_v22 = vpack.c.bf16 %v1586_v5, %v1584_v51  ;;  %v1516_v51 = vrot.slane %v3436_v59, 2  ;;  %v1504_v5 = vld [vmem:[#allocation2 + $0x38] sm:$0xfc] }
 0x381   :  { %2699 = vmatpush1.bf16.msra.mxu1 %v2698_v34  ;;  %v1588_v34 = vld [vmem:[#allocation6 + $0x560] sm:$0xff]  ;;  %v1517_v9 = vsel %vm445_vm1, %v1515_v61, %v1516_v51 }
 0x382   :  { %2701 = vmatprep.subr.bf16.mxu1 %v2700_v39  ;;  %v1590_v39 = vld [vmem:[#allocation6 + $0x570] sm:$0xff]  ;;  %v1817_v61 = vld [vmem:[#allocation8 + $0x180] sm:$0xff] }
 0x383   :  { %v2726_v10 = vpack.c.bf16 %v1590_v39, %v1588_v34  ;;  %v1503_v34 = vld [vmem:[#allocation2 + $0x30] sm:$0xfc]  ;;  %v1506_v39 = vld [vmem:[#allocation2 + $0x58] sm:$0x3] }
 0x385   :  { %2703 = vmatpush1.bf16.msra.mxu1 %v2702_v57  ;;  %v1592_v57 = vld [vmem:[#allocation6 + $0x580] sm:$0xff] }
 0x386   :  { %2705 = vmatprep.subr.bf16.mxu1 %v2704_v63  ;;  %v1594_v63 = vld [vmem:[#allocation6 + $0x590] sm:$0xff] }
 0x387   :  { %v2730_v25 = vpack.c.bf16 %v1594_v63, %v1592_v57  ;;  %v1505_v57 = vld [vmem:[#allocation2 + $0x50] sm:$0x3]  ;;  %v1526_v63 = vrot.slane %v3442_v7, 2  ;;  %v1810_v7 = vld [vmem:[#allocation8 + $0x148] sm:$0xff] }
 0x389   :  { %2707 = vmatpush1.bf16.msra.mxu1 %v2706_v35  ;;  %v1596_v35 = vld [vmem:[#allocation6 + $0x5a0] sm:$0xff] }
 0x38a   :  { %2709 = vmatprep.subr.bf16.mxu1 %v2708_v6  ;;  %v1598_v6 = vld [vmem:[#allocation6 + $0x5b0] sm:$0xff] }
 0x38b   :  { %v2734_v38 = vpack.c.bf16 %v1598_v6, %v1596_v35  ;;  %v1807_v6 = vld [vmem:[#allocation8 + $0x130] sm:$0xff] }
 0x38d   :  { %2711 = vmatpush1.bf16.msra.mxu1 %v2710_v21  ;;  %v1600_v21 = vld [vmem:[#allocation6 + $0x5c0] sm:$0xff] }
 0x38e   :  { %2713 = vmatprep.subr.bf16.mxu1 %v2712_v0  ;;  %v1602_v0 = vld [vmem:[#allocation6 + $0x5d0] sm:$0xff] }
 0x38f   :  { %v2738_v4 = vpack.c.bf16 %v1602_v0, %v1600_v21  ;;  %v1811_v21 = vld [vmem:[#allocation8 + $0x150] sm:$0xff] }
 0x391   :  { %2715 = vmatpush1.bf16.msra.mxu1 %v2714_v56  ;;  %v1604_v56 = vld [vmem:[#allocation6 + $0x5e0] sm:$0xff] }
 0x392   :  { %2717 = vmatprep.subr.bf16.mxu1 %v2716_v19  ;;  %v1606_v19 = vld [vmem:[#allocation6 + $0x5f0] sm:$0xff] }
 0x393   :  { %v2742_v43 = vpack.c.bf16 %v1606_v19, %v1604_v56  ;;  %v1815_v56 = vld [vmem:[#allocation8 + $0x170] sm:$0xff] }
 0x395   :  { %2719 = vmatpush1.bf16.msra.mxu1 %v2718_v11  ;;  %v1523_v11 = vrot.slane %v1502_v49, 2 }
 0x396   :  { %2721 = vmatprep.subr.bf16.mxu1 %v2720_v13  ;;  %v1501_v13 = vld [vmem:[#allocation2 + $0x20] sm:$0x3] }
 0x397   :  { %v1521_v18 = vrot.slane %v1501_v13, 2 }
 0x399   :  { %2723 = vmatpush1.bf16.msra.mxu1 %v2722_v22  ;;  %v1524_v22 = vsel %vm445_vm1, %v1519_v23, %v1523_v11  ;;  %v1522_v44 = vsel %vm445_vm1, %v1516_v51, %v1521_v18  ;;  %v1531_v23 = vrot.slane %v1505_v57, 2  ;;  %v1819_v11 = vld [vmem:[#allocation8 + $0x190] sm:$0xff]  ;;  %v1822_v51 = vld [vmem:[#allocation8 + $0x1a8] sm:$0xff]  ;;  %v1821_v18 = vld [vmem:[#allocation8 + $0x1a0] sm:$0xff] }
 0x39a   :  { %2725 = vmatprep.subr.bf16.mxu1 %v2724_v32  ;;  %v1528_v32 = vrot.slane %v1504_v5, 2  ;;  %v3553_v13 = vpack.c.bf16 %v1819_v11, %v1817_v61  ;;  %v1824_v5 = vld [vmem:[#allocation8 + $0x1b8] sm:$0xff] }
 0x39b   :  { %v1532_v16 = vsel %vm445_vm1, %v1526_v63, %v1531_v23  ;;  %v1832_v57 = vld [vmem:[#allocation8 + $0x1f8] sm:$0xff] }
 0x39c   :  { %v1530_v59 = vsel %vm445_vm1, %v1528_v32, %v1529_v42 }
 0x39d   :  { %2727 = vmatpush1.bf16.msra.mxu1 %v2726_v10  ;;  %v1525_v10 = vrot.slane %v1503_v34, 2  ;;  %v1826_v34 = vld [vmem:[#allocation8 + $0x1c8] sm:$0xff] }
 0x39e   :  { %2729 = vmatprep.subr.bf16.mxu1 %v2728_v54  ;;  %v1533_v54 = vrot.slane %v1506_v39, 2  ;;  %v1828_v39 = vld [vmem:[#allocation8 + $0x1d8] sm:$0xff] }
 0x39f   :  { %v1527_v46 = vsel %vm445_vm1, %v1525_v10, %v1526_v63  ;;  %v1827_v10 = vld [vmem:[#allocation8 + $0x1d0] sm:$0xff]  ;;  %v1829_v63 = vld [vmem:[#allocation8 + $0x1e0] sm:$0xff] }
 0x3a0   :  { %v1534_v3 = vsel %vm445_vm1, %v1529_v42, %v1533_v54  ;;  %v3563_v42 = vpack.c.bf16 %v1828_v39, %v1826_v34 }
 0x3a1   :  { %2731 = vmatpush1.bf16.msra.mxu1 %v2730_v25  ;;  %v1808_v25 = vld [vmem:[#allocation8 + $0x138] sm:$0xff] }
 0x3a2   :  { %2733 = vmatprep.subr.bf16.mxu1 %v2732_v30  ;;  %v1805_v30 = vld [vmem:[#allocation8 + $0x120] sm:$0xff]  ;;  %v3533_v35 = vpack.c.bf16 %v1808_v25, %v1806_v15 }
 0x3a3   :  { %v3535_v24 = vpack.c.bf16 %v1807_v6, %v1805_v30 }
 0x3a4   :  { %2781 = vmatprep.subr.bf16.mxu0 %v3533_v35 }
 0x3a5   :  { %2735 = vmatpush1.bf16.msra.mxu1 %v2734_v38  ;;  %2783 = vmatpush1.bf16.msra.mxu0 %v3535_v24  ;;  %v3539_v38 = vpack.c.bf16 %v1812_v37, %v1810_v7 }
 0x3a6   :  { %2737 = vmatprep.subr.bf16.mxu1 %v2736_v20  ;;  %v1809_v20 = vld [vmem:[#allocation8 + $0x140] sm:$0xff] }
 0x3a7   :  { %v3541_v0 = vpack.c.bf16 %v1811_v21, %v1809_v20  ;;  %2785 = vmatprep.subr.bf16.mxu0 %v3539_v38 }
 0x3a9   :  { %2739 = vmatpush1.bf16.msra.mxu1 %v2738_v4  ;;  %2787 = vmatpush1.bf16.msra.mxu0 %v3541_v0  ;;  %v3545_v4 = vpack.c.bf16 %v1816_v52, %v1814_v50 }
 0x3aa   :  { %2741 = vmatprep.subr.bf16.mxu1 %v2740_v53  ;;  %v1813_v53 = vld [vmem:[#allocation8 + $0x160] sm:$0xff] }
 0x3ab   :  { %v3547_v19 = vpack.c.bf16 %v1815_v56, %v1813_v53  ;;  %2789 = vmatprep.subr.bf16.mxu0 %v3545_v4 }
 0x3ad   :  { %2743 = vmatpush1.bf16.msra.mxu1 %v2742_v43  ;;  %2791 = vmatpush1.bf16.msra.mxu0 %v3547_v19  ;;  %v1820_v43 = vld [vmem:[#allocation8 + $0x198] sm:$0xff] }
 0x3ae   :  { %v3551_v49 = vpack.c.bf16 %v1820_v43, %v1818_v31 }
 0x3b0   :  { %1673 = vmatmul.mubr.f32.vlgmr.msra.gmra.mrb[4].mxu1 %v1517_v9  ;;  %2793 = vmatprep.subr.bf16.mxu0 %v3551_v49  ;;  %v3557_v9 = vpack.c.bf16 %v1824_v5, %v1822_v51 }
 0x3b1   :  { %1678 = vmatprep.mubr.f32.mxu1 %v1524_v22  ;;  %2795 = vmatpush1.bf16.msra.mxu0 %v3553_v13  ;;  %v1823_v22 = vld [vmem:[#allocation8 + $0x1b0] sm:$0xff] }
 0x3b2   :  { %v3559_v32 = vpack.c.bf16 %v1823_v22, %v1821_v18  ;;  %2797 = vmatprep.subr.bf16.mxu0 %v3557_v9 }
 0x3b4   :  { %1679 = vmatmul.mubr.f32.gmra.mrb[6].mxu1 %v1522_v44  ;;  %v1825_v44 = vld [vmem:[#allocation8 + $0x1c0] sm:$0xff] }
 0x3b5   :  { %1684 = vmatprep.mubr.f32.mxu1 %v1530_v59  ;;  %2799 = vmatpush1.bf16.msra.mxu0 %v3559_v32  ;;  %v1830_v59 = vld [vmem:[#allocation8 + $0x1e8] sm:$0xff]  ;;  %v3565_v54 = vpack.c.bf16 %v1827_v10, %v1825_v44 }
 0x3b6   :  { %2801 = vmatprep.subr.bf16.mxu0 %v3563_v42  ;;  %v3568_v23 = vpack.c.bf16 %v1832_v57, %v1830_v59 }
 0x3b8   :  { %1685 = vmatmul.mubr.f32.gmra.mrb[8].mxu1 %v1527_v46  ;;  %v1831_v46 = vld [vmem:[#allocation8 + $0x1f0] sm:$0xff]  ;;  %3798 = vst [vmem:[#allocation15_spill] sm:$0xff] %v3568_v23 }
 0x3b9   :  { %1690 = vmatprep.mubr.f32.mxu1 %v1534_v3  ;;  %2803 = vmatpush1.bf16.msra.mxu0 %v3565_v54  ;;  %v3571_v3 = vpack.c.bf16 %v1831_v46, %v1829_v63 }
 0x3ba   :  { %2805 = vmatprep.subr.bf16.mxu0 %v3568_v23 }
 0x3bb   :  { %3799 = vst [vmem:[#allocation16_spill] sm:$0xff] %v3571_v3 }
 0x3bc   :  { %1691 = vmatmul.mubr.f32.gmra.mrb[10].mxu1 %v1532_v16 }
 0x3bd   :  { %2807 = vmatpush1.bf16.msra.mxu0 %v3571_v3 }
 0x3be   :  { %2809 = vmatprep.subr.bf16.mxu0 %v3459_v1 }
 0x483   :  { %v3576_v16 = vpop.f32.mrb[4].mxu1 }
 0x484   :  { %3800 = vst [vmem:[#allocation17_spill] sm:$0xff] %v3576_v16  ;;  %v3578_v15 = vpop.f32.mrb[5].mxu1  ;;  %v1733_v30 = vmul.f32 %v3576_v16, %v3576_v16 }
 0x485   :  { %3801 = vst [vmem:[#allocation18_spill] sm:$0xff] %v3578_v15  ;;  %v1734_v1 = vmul.f32 %v3578_v15, %v3578_v15 }
 0x487   :  { %v3580_v25 = vpop.f32.mrb[6].mxu1 }
 0x488   :  { %3802 = vst [vmem:[#allocation19_spill] sm:$0xff] %v3580_v25  ;;  %v1705_v6 = vadd.f32 %v3580_v25, %v3576_v16  ;;  %v1735_v7 = vmul.f32 %v3580_v25, %v3580_v25  ;;  %v3588_v37 = vpop.f32.mrb[7].mxu1 }
 0x489   :  { %3803 = vst [vmem:[#allocation20_spill] sm:$0xff] %v3588_v37  ;;  %v1712_v20 = vadd.f32 %v3588_v37, %v3578_v15  ;;  %v1736_v21 = vmul.f32 %v3588_v37, %v3588_v37 }
 0x48a   :  { %v1706_v50 = vrot.slane %v1705_v6, 4  ;;  %v1741_v52 = vadd.f32 %v1735_v7, %v1733_v30 }
 0x48b   :  { %v1713_v53 = vrot.slane %v1712_v20, 4  ;;  %v1748_v56 = vadd.f32 %v1736_v21, %v1734_v1  ;;  %v3596_v31 = vpop.f32.mrb[8].mxu1 }
 0x48c   :  { %3804 = vst [vmem:[#allocation21_spill] sm:$0xff] %v3596_v31  ;;  %v1707_v43 = vadd.f32 %v1706_v50, %v1705_v6  ;;  %v1742_v61 = vrot.slane %v1741_v52, 4  ;;  %v3598_v11 = vpop.f32.mrb[9].mxu1  ;;  %v1737_v44 = vmul.f32 %v3596_v31, %v3596_v31 }
 0x48d   :  { %3805 = vst [vmem:[#allocation22_spill] sm:$0xff] %v3598_v11  ;;  %v1714_v51 = vadd.f32 %v1713_v53, %v1712_v20  ;;  %v1749_v5 = vrot.slane %v1748_v56, 4  ;;  %v1738_v46 = vmul.f32 %v3598_v11, %v3598_v11 }
 0x48e   :  { %v1743_v18 = vadd.f32 %v1742_v61, %v1741_v52  ;;  %v1708_v39 = vrot.slane %v1707_v43, 2 }
 0x48f   :  { %v1750_v22 = vadd.f32 %v1749_v5, %v1748_v56  ;;  %v3600_v34 = vpop.f32.mrb[10].mxu1  ;;  %v1715_v63 = vrot.slane %v1714_v51, 2 }
 0x490   :  { %3806 = vst [vmem:[#allocation24_spill] sm:$0xff] %v3600_v34  ;;  %v1719_v10 = vadd.f32 %v3600_v34, %v3596_v31  ;;  %v1739_v59 = vmul.f32 %v3600_v34, %v3600_v34  ;;  %v3608_v57 = vpop.f32.mrb[11].mxu1  ;;  %v1744_v7 = vrot.slane %v1743_v18, 2  ;;  %v1709_v53 = vadd.f32 %v1708_v39, %v1707_v43 }
 0x491   :  { %3807 = vst [vmem:[#allocation25_spill] sm:$0xff] %v3608_v57  ;;  %v1726_v30 = vadd.f32 %v3608_v57, %v3598_v11  ;;  %v1740_v6 = vmul.f32 %v3608_v57, %v3608_v57  ;;  %v1751_v21 = vrot.slane %v1750_v22, 2  ;;  %v1716_v5 = vadd.f32 %v1715_v63, %v1714_v51 }
 0x492   :  { %v1720_v1 = vrot.slane %v1719_v10, 4  ;;  %v1755_v20 = vadd.f32 %v1739_v59, %v1737_v44  ;;  %v1745_v37 = vadd.f32 %v1744_v7, %v1743_v18  ;;  %v1710_v33 = vrot.slane %v1709_v53, 1 }
 0x493   :  { %v1727_v50 = vrot.slane %v1726_v30, 4  ;;  %v1762_v52 = vadd.f32 %v1740_v6, %v1738_v46  ;;  %v1752_v48 = vadd.f32 %v1751_v21, %v1750_v22  ;;  %v1717_v59 = vrot.slane %v1716_v5, 1  ;;  %v3812_v21 = vld [vmem:[#allocation23_spill] sm:$0xff] }
 0x494   :  { %v1721_v56 = vadd.f32 %v1720_v1, %v1719_v10  ;;  %v1756_v61 = vrot.slane %v1755_v20, 4  ;;  %v1746_v43 = vrot.slane %v1745_v37, 1  ;;  %v1711_v63 = vadd.f32 %v1710_v33, %v1709_v53  ;;  %v3808_v33 = vld [vmem:[#allocation15_spill] sm:$0xff] }
 0x495   :  { %v1728_v34 = vadd.f32 %v1727_v50, %v1726_v30  ;;  %v1763_v31 = vrot.slane %v1762_v52, 4  ;;  %v1753_v51 = vrot.slane %v1752_v48, 1  ;;  %v1718_v6 = vadd.f32 %v1717_v59, %v1716_v5  ;;  %v2142_v53 = vld [vmem:[%s3742_s0 + $0x30] sm:$0xfe] }
 0x496   :  { %v1722_v25 = vrot.slane %v1721_v56, 2  ;;  %v1757_v15 = vadd.f32 %v1756_v61, %v1755_v20  ;;  %v1747_v22 = vadd.f32 %v1746_v43, %v1745_v37 }
 0x497   :  { %v1729_v16 = vrot.slane %v1728_v34, 2  ;;  %v1764_v11 = vadd.f32 %v1763_v31, %v1762_v52  ;;  %v2141_v52 = vld [vmem:[%s3742_s0 + $0x28] sm:$0x1] }
 0x498   :  { %v1723_v57 = vadd.f32 %v1722_v25, %v1721_v56  ;;  %v1758_v12 = vrot.slane %v1757_v15, 2  ;;  %v2144_v56 = vld [vmem:[%s3742_s0 + $0x40] sm:$0xff] }
 0x499   :  { %v1730_v3 = vadd.f32 %v1729_v16, %v1728_v34  ;;  %v1765_v44 = vrot.slane %v1764_v11, 2  ;;  %v1754_v34 = vadd.f32 %v1753_v51, %v1752_v48  ;;  %v3809_v48 = vld [vmem:[#allocation16_spill] sm:$0xff]  ;;  %v2146_v51 = vld [vmem:[%s3742_s0 + $0x50] sm:$0x1] }
 0x49a   :  { %v1724_v23 = vrot.slane %v1723_v57, 1  ;;  %v1759_v46 = vadd.f32 %v1758_v12, %v1757_v15 }
 0x49b   :  { %v1731_v39 = vrot.slane %v1730_v3, 1  ;;  %v1766_v10 = vadd.f32 %v1765_v44, %v1764_v11  ;;  %v2143_v44 = vld [vmem:[%s3742_s0 + $0x38] sm:$0xfe] }
 0x49c   :  { %v1725_v30 = vadd.f32 %v1724_v23, %v1723_v57  ;;  %v1760_v18 = vrot.slane %v1759_v46, 1 }
 0x49d   :  { %v1732_v7 = vadd.f32 %v1731_v39, %v1730_v3  ;;  %v1767_v1 = vrot.slane %v1766_v10, 1  ;;  %v2140_v3 = vld [vmem:[%s3742_s0 + $0x20] sm:$0x1] }
 0x49e   :  { %v1837_v31 = vsel %vm768_vm2, %v1725_v30, %v1711_v63  ;;  %v1761_v25 = vadd.f32 %v1760_v18, %v1759_v46  ;;  %v2166_v39 = vrot.slane %v2140_v3, 1  ;;  %v2147_v63 = vld [vmem:[%s3742_s0 + $0x58] sm:$0x1]  ;;  %v2168_v18 = vrot.slane %v2141_v52, 1 }
 0x49f   :  { %v1838_v16 = vsel %vm768_vm2, %v1732_v7, %v1718_v6  ;;  %v1768_v20 = vadd.f32 %v1767_v1, %v1766_v10  ;;  %v2145_v10 = vld [vmem:[%s3742_s0 + $0x48] sm:$0xff]  ;;  %v2170_v6 = vrot.slane %v2142_v53, 1  ;;  %v2171_v7 = vrot.slane %v2144_v56, 1 }
 0x4a0   :  { %1905 = vmatprep.mubr.f32.mxu0 %v1838_v16  ;;  %v1916_v12 = vsel %vm768_vm2, %v1761_v25, %v1747_v22  ;;  %v2173_v16 = vrot.slane %v2143_v44, 1 }
 0x4a1   :  { %1906 = vmatmul.mubr.f32.vlgmr.msra.gmra.mrb[8].mxu0 %v1837_v31  ;;  %v1917_v15 = vsel %vm768_vm2, %v1768_v20, %v1754_v34  ;;  %v2174_v34 = vrot.slane %v2145_v10, 1  ;;  %v2176_v20 = vrot.slane %v2146_v51, 1 }
 0x4a2   :  { %2811 = vmatpush1.bf16.msra.mxu0 %v3461_v55  ;;  %1984 = vmatprep.mubr.f32.mxu0 %v1917_v15 }
 0x4a3   :  { %2813 = vmatprep.subr.bf16.mxu0 %v3463_v60 }
 0x4a6   :  { %2815 = vmatpush1.bf16.msra.mxu0 %v3467_v26 }
 0x4a7   :  { %2817 = vmatprep.subr.bf16.mxu0 %v3470_v41 }
 0x4aa   :  { %2819 = vmatpush1.bf16.msra.mxu0 %v3473_v62 }
 0x4ab   :  { %2821 = vmatprep.subr.bf16.mxu0 %v3476_v8 }
 0x4ae   :  { %2823 = vmatpush1.bf16.msra.mxu0 %v3479_v17 }
 0x4af   :  { %2825 = vmatprep.subr.bf16.mxu0 %v3482_v45 }
 0x4b2   :  { %2827 = vmatpush1.bf16.msra.mxu0 %v3485_v47 }
 0x4b3   :  { %2829 = vmatprep.subr.bf16.mxu0 %v3488_v28 }
 0x4b6   :  { %2831 = vmatpush1.bf16.msra.mxu0 %v3491_v2  ;;  %v1999_v2 = vld [vmem:[%s3747_s5] ss:$2 sm:$0x3] }
 0x4b7   :  { %2833 = vmatprep.subr.bf16.mxu0 %v3494_v14  ;;  %v3810_v14 = vld [vmem:[#allocation13_spill] sm:$0xff] }
 0x4ba   :  { %2835 = vmatpush1.bf16.msra.mxu0 %v3497_v40  ;;  %v2004_v40 = vrot.slane %v1999_v2, %v3810_v14 }
 0x4bb   :  { %2837 = vmatprep.subr.bf16.mxu0 %v3500_v58  ;;  %v2231_v58 = vld [vmem:[%s3747_s5 + $0x1] ss:$2 sm:$0x3] }
 0x4be   :  { %2839 = vmatpush1.bf16.msra.mxu0 %v3503_v29  ;;  %v3811_v29 = vld [vmem:[#allocation14_spill] sm:$0xff] }
 0x4bf   :  { %2841 = vmatprep.subr.bf16.mxu0 %v3506_v27  ;;  %v2008_v27 = vrot.slane %v1999_v2, %v3811_v29 }
 0x4c2   :  { %2843 = vmatpush1.bf16.msra.mxu0 %v3509_v36 }
 0x4c3   :  { %2845 = vmatprep.subr.bf16.mxu0 %v3533_v35 }
 0x4c6   :  { %2847 = vmatpush1.bf16.msra.mxu0 %v3535_v24 }
 0x4c7   :  { %2849 = vmatprep.subr.bf16.mxu0 %v3539_v38  ;;  %v2021_v38 = vrot.slane %v2231_v58, %v3810_v14 }
 0x4ca   :  { %2851 = vmatpush1.bf16.msra.mxu0 %v3541_v0 }
 0x4cb   :  { %2853 = vmatprep.subr.bf16.mxu0 %v3545_v4  ;;  %v2025_v4 = vrot.slane %v2231_v58, %v3811_v29 }
 0x4ce   :  { %2855 = vmatpush1.bf16.msra.mxu0 %v3547_v19  ;;  %v2136_v19 = vld [vmem:[%s3742_s0] sm:$0xfe] }
 0x4cf   :  { %2857 = vmatprep.subr.bf16.mxu0 %v3551_v49  ;;  %v2138_v49 = vld [vmem:[%s3742_s0 + $0x10] sm:$0xff]  ;;  %v2160_v37 = vrot.slane %v2136_v19, 1 }
 0x4d0   :  { %v2161_v11 = vrot.slane %v2138_v49, 1 }
 0x4d2   :  { %2859 = vmatpush1.bf16.msra.mxu0 %v3553_v13  ;;  %v2162_v30 = vsel %vm157_vm0, %v2160_v37, %v2161_v11  ;;  %v2167_v49 = vsel %vm157_vm0, %v2161_v11, %v2166_v39 }
 0x4d3   :  { %2861 = vmatprep.subr.bf16.mxu0 %v3557_v9 }
 0x4d6   :  { %2863 = vmatpush1.bf16.msra.mxu0 %v3559_v32 }
 0x4d7   :  { %2865 = vmatprep.subr.bf16.mxu0 %v3563_v42  ;;  %v2137_v42 = vld [vmem:[%s3742_s0 + $0x8] sm:$0xfe] }
 0x4d8   :  { %v2163_v61 = vrot.slane %v2137_v42, 1 }
 0x4da   :  { %2867 = vmatpush1.bf16.msra.mxu0 %v3565_v54  ;;  %v2139_v54 = vld [vmem:[%s3742_s0 + $0x18] sm:$0xff]  ;;  %s3021_s0 = smov [#allocation9]  }
 0x4db   :  { %2869 = vmatprep.subr.bf16.mxu0 %v3808_v33  ;;  %v2164_v5 = vrot.slane %v2139_v54, 1  ;;  %s2217_s12 = sshll.u32 %s3021_s0, 4  ;;  %s2218_s12 = int_to_ptr.vmem [resolvable:$true] %s2217_s12 }
 0x4dc   :  { %s2986_s13 = scalar_lea.vmem %s2218_s12, 1024  ;;  %p2991_p11 = scmp.lt.s32.totalorder %s2218_s12, %s2218_s12 }
 0x4dd   :  { %v2165_v19 = vsel %vm157_vm0, %v2163_v61, %v2164_v5  ;;  %p2987_p10 = scmp.ne.s32.totalorder %s2218_s12, %s2986_s13  ;;  %p2992_p12 = scmp.lt.s32.totalorder %s2986_s13, %s2986_s13 }
 0x4de   :  { %2871 = vmatpush1.bf16.msra.mxu0 %v3809_v48  ;;  %v3813_v48 = vld [vmem:[#allocation17_spill] sm:$0xff] }
 0x4df   :  { %p2993_p13 = por %p2992_p12, %p2991_p11 }
 0x4e1   :  { %1985 = vmatmul.mubr.f32.vlgmr.msra.gmra.mrb[10].mxu0 %v1916_v12  ;;  %v2178_v12 = vrot.slane %v2147_v63, 1  ;;  %p2994_p0 = pnand %p2993_p13, %p2987_p10 }
 0x574   :  { %v1907_v55 = vpop.f32.mrb[8].mxu0 }
 0x575   :  { %v1909_v60 = vpop.f32.mrb[9].mxu0  ;;  %v1991_v26 = vmul.f32 %v1907_v55, %v1907_v55 }
 0x576   :  { %v1992_v41 = vmul.f32 %v1909_v60, %v1909_v60 }
 0x5b4   :  { %v1986_v62 = vpop.f32.mrb[10].mxu0 }
 0x5b5   :  { %v1993_v8 = vsub.f32 %v1986_v62, %v1991_v26  ;;  %v1988_v17 = vpop.f32.mrb[11].mxu0 }
 0x5b6   :  { %v1994_v45 = vsub.f32 %v1988_v17, %v1992_v41  ;;  %v3815_v41 = vld [vmem:[#allocation19_spill] sm:$0xff] }
 0x5b7   :  { %v1995_v47 = vadd.f32 1e-05, %v1993_v8  ;;  %v3816_v8 = vld [vmem:[#allocation20_spill] sm:$0xff] }
 0x5b8   :  { %v1996_v28 = vadd.f32 1e-05, %v1994_v45 }
 0x5b9   :  { %2916 = vrsqrt.f32 %v1995_v47 }
 0x5ba   :  { %2918 = vrsqrt.f32 %v1996_v28  ;;  %v3817_v28 = vld [vmem:[#allocation21_spill] sm:$0xff] }
 0x5c3   :  { %v2917_v36 = vpop.eup %2916 }
 0x5c4   :  { %v2919_v35 = vpop.eup %2918  ;;  %v2011_v24 = vmul.f32 %v2917_v36, %v2004_v40  ;;  %v3818_v40 = vld [vmem:[#allocation22_spill] sm:$0xff] }
 0x5c5   :  { %v2012_v0 = vmul.f32 %v2919_v35, %v2008_v27  ;;  %v3819_v27 = vld [vmem:[#allocation24_spill] sm:$0xff]  ;;  %v3820_v35 = vld [vmem:[#allocation25_spill] sm:$0xff] }
 0x5c6   :  { %v2015_v13 = vmul.f32 %v2011_v24, %v1907_v55 }
 0x5c7   :  { %v2016_v9 = vmul.f32 %v2012_v0, %v1909_v60  ;;  %v2032_v32 = vcombine.low %v2011_v24, %v2012_v0  ;;  %v3814_v60 = vld [vmem:[#allocation18_spill] sm:$0xff] }
 0x5c8   :  { %v2028_v23 = vsub.f32 %v2021_v38, %v2015_v13  ;;  %v2169_v13 = vsel %vm157_vm0, %v2164_v5, %v2168_v18 }
 0x5c9   :  { %v2029_v57 = vsub.f32 %v2025_v4, %v2016_v9  ;;  %v2039_v50 = vrot.slane %v2032_v32, %v3812_v21  ;;  %v2172_v9 = vsel %vm157_vm0, %v2170_v6, %v2171_v7  ;;  %v2175_v32 = vsel %vm157_vm0, %v2173_v16, %v2174_v34 }
 0x5cb   :  { %v2040_v59 = vcombine.high %v2039_v50, %v2039_v50  ;;  %v2047_v46 = vrot.slane %v2039_v50, %v3812_v21  ;;  %v2085_v43 = vcombine.low %v2028_v23, %v2029_v57  ;;  %v2179_v50 = vsel %vm157_vm0, %v2174_v34, %v2178_v12 }
 0x5cd   :  { %v2054_v1 = vrot.slane %v2040_v59, %v3812_v21  ;;  %v2058_v31 = vrot.slane %v2047_v46, %v3810_v14  ;;  %v2062_v22 = vrot.slane %v2047_v46, %v3811_v29  ;;  %v2092_v25 = vrot.slane %v2085_v43, %v3812_v21 }
 0x5cf   :  { %v2066_v15 = vrot.slane %v2054_v1, %v3810_v14  ;;  %v2070_v33 = vrot.slane %v2054_v1, %v3811_v29  ;;  %v2075_v55 = vmul.f32 %v2058_v31, %v3813_v48  ;;  %v2076_v26 = vmul.f32 %v2062_v22, %v3814_v60 }
 0x5d0   :  { %v2077_v62 = vmul.f32 %v2058_v31, %v3815_v41  ;;  %v2078_v17 = vmul.f32 %v2062_v22, %v3816_v8  ;;  %v2093_v45 = vcombine.high %v2092_v25, %v2092_v25  ;;  %v2100_v47 = vrot.slane %v2092_v25, %v3812_v21 }
 0x5d1   :  { %v2079_v2 = vmul.f32 %v2066_v15, %v3817_v28  ;;  %v2080_v58 = vmul.f32 %v2070_v33, %v3818_v40  ;;  %v2081_v36 = vmul.f32 %v2066_v15, %v3819_v27  ;;  %v2082_v24 = vmul.f32 %v2070_v33, %v3820_v35 }
 0x5d2   :  { %v2107_v38 = vrot.slane %v2093_v45, %v3812_v21  ;;  %v2111_v0 = vrot.slane %v2100_v47, %v3810_v14  ;;  %v2115_v4 = vrot.slane %v2100_v47, %v3811_v29  ;;  %v2177_v21 = vsel %vm157_vm0, %v2171_v7, %v2176_v20 }
 0x5d4   :  { %v2119_v42 = vrot.slane %v2107_v38, %v3810_v14  ;;  %v2123_v54 = vrot.slane %v2107_v38, %v3811_v29  ;;  %v2128_v23 = vadd.f32 %v2111_v0, %v2075_v55  ;;  %v2129_v3 = vadd.f32 %v2115_v4, %v2076_v26 }
 0x5d5   :  { %v2130_v37 = vadd.f32 %v2111_v0, %v2077_v62  ;;  %v2131_v57 = vadd.f32 %v2115_v4, %v2078_v17 }
 0x5d6   :  { %v2132_v52 = vadd.f32 %v2119_v42, %v2079_v2  ;;  %v2133_v11 = vadd.f32 %v2123_v54, %v2080_v58  ;;  %v2134_v53 = vadd.f32 %v2119_v42, %v2081_v36  ;;  %v2135_v56 = vadd.f32 %v2123_v54, %v2082_v24 }
 0x5d7   :  { %v2188_v61 = vadd.f32 %v2162_v30, %v2128_v23  ;;  %v2189_v5 = vadd.f32 %v2165_v19, %v2129_v3  ;;  %v2190_v44 = vadd.f32 %v2167_v49, %v2130_v37  ;;  %v2191_v59 = vadd.f32 %v2169_v13, %v2131_v57 }
 0x5d8   :  { %v2192_v14 = vadd.f32 %v2172_v9, %v2132_v52  ;;  %v2193_v29 = vadd.f32 %v2175_v32, %v2133_v11  ;;  %v2194_v46 = vadd.f32 %v2177_v21, %v2134_v53  ;;  %v2195_v43 = vadd.f32 %v2179_v50, %v2135_v56 }
 0x5d9   :  { %v2196_v39 = vmax.f32 %v2188_v61, 0.0  ;;  %v2197_v10 = vmax.f32 %v2189_v5, 0.0  ;;  %v2198_v51 = vmax.f32 %v2190_v44, 0.0  ;;  %v2199_v63 = vmax.f32 %v2191_v59, 0.0 }
 0x5da   :  { %v2200_v18 = vmax.f32 %v2192_v14, 0.0  ;;  %v2201_v6 = vmax.f32 %v2193_v29, 0.0  ;;  %v2202_v7 = vmax.f32 %v2194_v46, 0.0  ;;  %v2203_v1 = vmax.f32 %v2195_v43, 0.0 }
 0x5db   :  { %2204 = vst [vmem:[#allocation9] sm:$0xff] %v2196_v39  ;;  %2205 = vst [vmem:[#allocation9 + $0x8] sm:$0xff] %v2197_v10 }
 0x5dc   :  { %2206 = vst [vmem:[#allocation9 + $0x10] sm:$0xff] %v2198_v51  ;;  %2207 = vst [vmem:[#allocation9 + $0x18] sm:$0xff] %v2199_v63 }
 0x5dd   :  { %2208 = vst [vmem:[#allocation9 + $0x20] sm:$0xff] %v2200_v18  ;;  %2209 = vst [vmem:[#allocation9 + $0x28] sm:$0xff] %v2201_v6 }
 0x5de   :  { %2210 = vst [vmem:[#allocation9 + $0x30] sm:$0xff] %v2202_v7  ;;  %2211 = vst [vmem:[#allocation9 + $0x38] sm:$0xff] %v2203_v1 }
 0x5df   :  { %2997 = shalt.err (!%p2994_p0)
}
 0x5e0   :  { %s2998_s16 = scalar_lea.hbm %s3748_s6, 1024 }
 0x5e1   :  { %p2999_p1 = scmp.ne.s32.totalorder %s3748_s6, %s2998_s16  ;;  %p3002_p2 = scmp.lt.u32.totalorder %s2998_s16, %s3748_s6 }
 0x5e3   :  { %p3004_p3 = pnand %p3002_p2, %p2999_p1 }
 0x5e5   :  { %3007 = shalt.err (!%p3004_p3)
}
 0x5e6   :  { %2223 = dma.vmem_to_hbm [thread:$0]  %s2218_s12, 1024, %s3748_s6, [#allocation5], %s3016_s9, %s3016_s9, %s3017_s10  }
 0x5e7   :  { %3012 = dma.done.wait [#allocation5], 1024  }
 0x5e8   :  { %3013 = vsyncadd [#allocation5], 4294966272 }
 0x5e9   :  { %2227 = vsyncpa [#allocation4], 1 }
 0x5ea   :  { %2228 = vsyncpa [#allocation7], 1 }
 0x5eb   :  { %2229 = vsyncpa [#allocation5], 1 }

</bundles_post_ra>
